<compile_context>
chip_gen: v6e
topology: v6e:2x2x1
jax: 0.10.0
libtpu: 0.0.40
codegen_flags: <defaults>
</compile_context>

<pallas_src>
import numpy as np
import jax
import jax.numpy as jnp
from jax.experimental import pallas as pl
from jax.experimental.pallas import tpu as pltpu


# ----------------------------- Fused Pallas kernel ---------------------------

def _make_fused_lstm_kernel(L, T, TC, Bp, Hp, has_seq):
    """Fused (all LSTM layers + final FC) kernel for static dims.

    L: num layers, T: seq length, TC: time-chunk for the hoisted projection,
    Bp: sublane-padded batch, Hp: lane-padded hidden size (per gate), has_seq: L > 1.
    """
    n_chunks = -(-T // TC)

    def kernel(*refs):
        x_ref = refs[0]                          # (T*Bp, Din)    time-major slabs
        layer_refs = refs[1:1 + 5 * L]           # per layer: Wih^T, Whh^T, bias, h0, c0
        wfc_ref = refs[1 + 5 * L]                # (Hp, Op)
        bfc_ref = refs[2 + 5 * L]                # (1, Op)
        out_ref = refs[3 + 5 * L]                # (Bp, Op)
        hn_ref = refs[4 + 5 * L]                 # (L, Bp, Hp)
        cn_ref = refs[5 + 5 * L]                 # (L, Bp, Hp)
        gx_sc = refs[6 + 5 * L]                  # (TC*Bp, 4Hp)  chunked input-gate projection
        seq_sc = refs[7 + 5 * L] if has_seq else None   # (T*Bp, Hp) inter-layer hidden sequence

        h_top = None
        for l in range(L):
            wih_t_ref, whh_t_ref, b_ref, h0_ref, c0_ref = layer_refs[5 * l:5 * l + 5]

            wih = wih_t_ref[...]                 # (Din_l, 4Hp)  hoisted out of the chunk loop
            whh = whh_t_ref[...]                 # (Hp, 4Hp)     hoisted out of the time loop
            bias = b_ref[...]                    # (1, 4Hp)
            write_seq = (l < L - 1)              # last layer's sequence is never read
            src_ref = x_ref if l == 0 else seq_sc

            h = h0_ref[...]                      # (Bp, Hp)
            c = c0_ref[...]

            for ci in range(n_chunks):           # static Python loop over T-chunks
                t0 = ci * TC
                clen = min(TC, T - t0)

                # ---- Hoisted input projection for this chunk: one MXU matmul ----
                x_chunk = src_ref[t0 * Bp:(t0 + clen) * Bp, :]
                gx_sc[0:clen * Bp, :] = (
                    jnp.dot(x_chunk, wih, preferred_element_type=jnp.float32) + bias)

                # ---- Sequential recurrence over the chunk (latency/EUP bound) ----
                def step(s, carry, t0=t0, write_seq=write_seq):
                    h, c = carry
                    row0 = pl.multiple_of(s * Bp, Bp)             # sublane-aligned slab
                    gates = gx_sc[pl.ds(row0, Bp), :] + jnp.dot(
                        h, whh, preferred_element_type=jnp.float32)   # (Bp, 4Hp)
                    # Gate slices start at lane multiples of 128 (Hp is a 128-multiple).
                    i_g = jax.nn.sigmoid(gates[:, 0 * Hp:1 * Hp])
                    f_g = jax.nn.sigmoid(gates[:, 1 * Hp:2 * Hp])
                    g_g = jnp.tanh(gates[:, 2 * Hp:3 * Hp])
                    o_g = jax.nn.sigmoid(gates[:, 3 * Hp:4 * Hp])
                    c_new = f_g * c + i_g * g_g
                    h_new = o_g * jnp.tanh(c_new)
                    if write_seq:
                        grow = pl.multiple_of(t0 * Bp + s * Bp, Bp)
                        seq_sc[pl.ds(grow, Bp), :] = h_new        # full-lane (8,128k) store
                    return h_new, c_new

                unroll = True if clen <= 16 else 8
                h, c = jax.lax.fori_loop(0, clen, step, (h, c), unroll=unroll)

            hn_ref[l] = h                        # written once per layer (not every step)
            cn_ref[l] = c
            h_top = h

        # ---- Fused final FC on the top layer's last hidden state ----
        out_ref[...] = (jnp.dot(h_top, wfc_ref[...],
                                preferred_element_type=jnp.float32) + bfc_ref[...])

    return kernel


def _pad_gate_cols(w, H, Hp):
    """(rows, 4H) -> (rows, 4Hp): each gate block zero-padded from H to Hp lanes."""
    parts = [jnp.pad(w[:, k * H:(k + 1) * H], ((0, 0), (0, Hp - H))) for k in range(4)]
    return jnp.concatenate(parts, axis=1)


# ------------------------------ Model wrapper ---------------------------------

class LSTMModelPallas:
    """JAX/Pallas equivalent of the PyTorch LSTMModel forward pass."""

    def __init__(self, input_dim, hidden_dim, layer_dim, output_dim, key):
        self.input_dim = input_dim
        self.hidden_dim = hidden_dim
        self.layer_dim = layer_dim
        self.output_dim = output_dim

        # ---- Raw parameters in PyTorch layout (used by the pure-JAX reference) ----
        k = 1.0 / np.sqrt(hidden_dim)
        keys = jax.random.split(key, 4 * layer_dim + 2)
        self.w_ih, self.w_hh, self.b_ih, self.b_hh = [], [], [], []
        for l in range(layer_dim):
            din = input_dim if l == 0 else hidden_dim
            self.w_ih.append(jax.random.uniform(keys[4 * l + 0], (4 * hidden_dim, din),
                                                jnp.float32, -k, k))
            self.w_hh.append(jax.random.uniform(keys[4 * l + 1], (4 * hidden_dim, hidden_dim),
                                                jnp.float32, -k, k))
            self.b_ih.append(jax.random.uniform(keys[4 * l + 2], (4 * hidden_dim,),
                                                jnp.float32, -k, k))
            self.b_hh.append(jax.random.uniform(keys[4 * l + 3], (4 * hidden_dim,),
                                                jnp.float32, -k, k))
        self.w_fc = jax.random.uniform(keys[-2], (output_dim, hidden_dim),
                                       jnp.float32, -k, k)
        self.b_fc = jax.random.uniform(keys[-1], (output_dim,), jnp.float32, -k, k)

        # ---- Kernel-ready layouts: pre-transposed, combined biases, lane-padded gates ----
        Hp = ((hidden_dim + 127) // 128) * 128           # lane-dense hidden width per gate
        Op = ((output_dim + 127) // 128) * 128           # lane-dense FC output width
        self.Hp, self.Op = Hp, Op

        self.w_ih_t_p, self.w_hh_t_p, self.bias_p = [], [], []
        for l in range(layer_dim):
            wih_t = _pad_gate_cols(jnp.transpose(self.w_ih[l]), hidden_dim, Hp)   # (Din_l, 4Hp)
            if l > 0:                                    # pad input rows H -> Hp for layers > 0
                wih_t = jnp.pad(wih_t, ((0, Hp - hidden_dim), (0, 0)))
            whh_t = _pad_gate_cols(jnp.transpose(self.w_hh[l]), hidden_dim, Hp)   # (H, 4Hp)
            whh_t = jnp.pad(whh_t, ((0, Hp - hidden_dim), (0, 0)))                # (Hp, 4Hp)
            bias = _pad_gate_cols((self.b_ih[l] + self.b_hh[l]).reshape(1, 4 * hidden_dim),
                                  hidden_dim, Hp)                                 # (1, 4Hp)
            self.w_ih_t_p.append(wih_t)
            self.w_hh_t_p.append(whh_t)
            self.bias_p.append(bias)

        self.w_fc_t_p = jnp.pad(jnp.transpose(self.w_fc),
                                ((0, Hp - hidden_dim), (0, Op - output_dim)))     # (Hp, Op)
        self.b_fc_p = jnp.pad(self.b_fc.reshape(1, output_dim),
                              ((0, 0), (0, Op - output_dim)))                     # (1, Op)

        # Preprocessing + pallas_call traced/compiled together (no eager HBM copies of x).
        self._jitted = jax.jit(self._forward_impl)

    # ------------------------------ forward -----------------------------------
    def _forward_impl(self, x, h0, c0):
        B, T, Din = x.shape
        H, L, O = self.hidden_dim, self.layer_dim, self.output_dim
        Hp, Op = self.Hp, self.Op
        Bp = max(8, ((B + 7) // 8) * 8)                  # sublane-aligned batch
        TC = T if T <= 64 else 64                        # T-chunk for the hoisted projection

        # Batch-first -> time-major slabs, padded batch / hidden lanes (all under jit).
        xt = jnp.transpose(x.astype(jnp.float32), (1, 0, 2))            # (T, B, Din)
        xt = jnp.pad(xt, ((0, 0), (0, Bp - B), (0, 0)))
        x_flat = xt.reshape(T * Bp, Din)
        h0p = jnp.pad(h0.astype(jnp.float32), ((0, 0), (0, Bp - B), (0, Hp - H)))
        c0p = jnp.pad(c0.astype(jnp.float32), ((0, 0), (0, Bp - B), (0, Hp - H)))

        args = [x_flat]
        for l in range(L):
            args += [self.w_ih_t_p[l], self.w_hh_t_p[l], self.bias_p[l], h0p[l], c0p[l]]
        args += [self.w_fc_t_p, self.b_fc_p]

        scratch = [pltpu.VMEM((TC * Bp, 4 * Hp), jnp.float32)]          # chunked gate projection
        if L > 1:
            scratch.append(pltpu.VMEM((T * Bp, Hp), jnp.float32))       # inter-layer sequence

        # VMEM budget: inputs + outputs + scratch, 2x headroom, clamped to [16 MiB, 64 MiB]
        # (64 MiB = v7x physical per-TC VMEM; v5e/v6e have 128 MiB so this is always safe).
        footprint = sum(int(np.prod(a.shape)) * 4 for a in args)
        footprint += (Bp * Op + 2 * L * Bp * Hp) * 4                    # outputs
        footprint += (TC * Bp * 4 * Hp) * 4                             # gx scratch
        if L > 1:
            footprint += (T * Bp * Hp) * 4                              # seq scratch
        vmem_limit = int(min(max(2 * footprint, 16 << 20), 64 << 20))

        kernel = _make_fused_lstm_kernel(L, T, TC, Bp, Hp, L > 1)
        out_p, hn_p, cn_p = pl.pallas_call(
            kernel,
            out_shape=(jax.ShapeDtypeStruct((Bp, Op), jnp.float32),
                       jax.ShapeDtypeStruct((L, Bp, Hp), jnp.float32),
                       jax.ShapeDtypeStruct((L, Bp, Hp), jnp.float32)),
            scratch_shapes=scratch,
            compiler_params=pltpu.CompilerParams(vmem_limit_bytes=vmem_limit),
        )(*args)

        return out_p[:B, :O], hn_p[:, :B, :H], cn_p[:, :B, :H]

    def __call__(self, x, h0=None, c0=None):
        B = x.shape[0]
        if h0 is None or c0 is None:
            h0 = jnp.zeros((self.layer_dim, B, self.hidden_dim), jnp.float32)
            c0 = jnp.zeros((self.layer_dim, B, self.hidden_dim), jnp.float32)
        return self._jitted(x, h0, c0)


# ------------------------------ Pure-JAX reference ----------------------------

def _reference_forward(model, x):
    B, T, _ = x.shape
    H, L = model.hidden_dim, model.layer_dim
    h = [jnp.zeros((B, H), jnp.float32) for _ in range(L)]
    c = [jnp.zeros((B, H), jnp.float32) for _ in range(L)]
    seq = x.astype(jnp.float32)
    for l in range(L):
        outs = []
        for t in range(T):
            xt = seq[:, t, :]
            g = (xt @ model.w_ih[l].T + model.b_ih[l]
                 + h[l] @ model.w_hh[l].T + model.b_hh[l])
            i_g = jax.nn.sigmoid(g[:, 0 * H:1 * H])
            f_g = jax.nn.sigmoid(g[:, 1 * H:2 * H])
            g_g = jnp.tanh(g[:, 2 * H:3 * H])
            o_g = jax.nn.sigmoid(g[:, 3 * H:4 * H])
            c[l] = f_g * c[l] + i_g * g_g
            h[l] = o_g * jnp.tanh(c[l])
            outs.append(h[l])
        seq = jnp.stack(outs, axis=1)
    out = h[-1] @ model.w_fc.T + model.b_fc
    return out, jnp.stack(h, 0), jnp.stack(c, 0)


# ---------------------------------- main ---------------------------------------

if __name__ == "__main__":
    B, T = 2, 8
    input_dim, hidden_dim, layer_dim, output_dim = 16, 32, 2, 4

    key = jax.random.PRNGKey(0)
    k_param, k_x = jax.random.split(key)
    model = LSTMModelPallas(input_dim, hidden_dim, layer_dim, output_dim, k_param)

    x = jax.random.normal(k_x, (B, T, input_dim), jnp.float32)

    out, hn, cn = model(x)
    out, hn, cn = jax.block_until_ready((out, hn, cn))

    ref_out, ref_hn, ref_cn = _reference_forward(model, x)
    assert out.shape == (B, output_dim)
    assert hn.shape == (layer_dim, B, hidden_dim)
    assert cn.shape == (layer_dim, B, hidden_dim)
    # Tolerance loose enough for transcendental-ULP / accumulation-order differences, tight
    # enough to catch any gate-order / layout bug (those show up at O(0.1..1)).
    np.testing.assert_allclose(np.asarray(out), np.asarray(ref_out), rtol=1e-4, atol=1e-4)
    np.testing.assert_allclose(np.asarray(hn), np.asarray(ref_hn), rtol=1e-4, atol=1e-4)
    np.testing.assert_allclose(np.asarray(cn), np.asarray(ref_cn), rtol=1e-4, atol=1e-4)

    print("KERNEL_OK")
</pallas_src>

<mosaic_0001>
module attributes {stable_mosaic.version = 11 : i64} {
  func.func @kernel(%arg0: memref<64x16xf32, #tpu.memory_space<vmem>>, %arg1: memref<16x512xf32, #tpu.memory_space<vmem>>, %arg2: memref<128x512xf32, #tpu.memory_space<vmem>>, %arg3: memref<1x512xf32, #tpu.memory_space<vmem>>, %arg4: memref<8x128xf32, #tpu.memory_space<vmem>>, %arg5: memref<8x128xf32, #tpu.memory_space<vmem>>, %arg6: memref<128x512xf32, #tpu.memory_space<vmem>>, %arg7: memref<128x512xf32, #tpu.memory_space<vmem>>, %arg8: memref<1x512xf32, #tpu.memory_space<vmem>>, %arg9: memref<8x128xf32, #tpu.memory_space<vmem>>, %arg10: memref<8x128xf32, #tpu.memory_space<vmem>>, %arg11: memref<128x128xf32, #tpu.memory_space<vmem>>, %arg12: memref<1x128xf32, #tpu.memory_space<vmem>>, %arg13: memref<8x128xf32, #tpu.memory_space<vmem>>, %arg14: memref<2x8x128xf32, #tpu.memory_space<vmem>>, %arg15: memref<2x8x128xf32, #tpu.memory_space<vmem>>, %arg16: memref<64x512xf32, #tpu.memory_space<vmem>>, %arg17: memref<64x128xf32, #tpu.memory_space<vmem>>) attributes {dimension_semantics = [], scalar_prefetch = 0 : i64, scratch_operands = 2 : i64, tpu.core_type = #tpu.core_type<tc>} {
    %c0 = arith.constant 0 : index
    %c0_0 = arith.constant 0 : index
    %0 = vector.load %arg1[%c0, %c0_0] : memref<16x512xf32, #tpu.memory_space<vmem>>, vector<16x512xf32>
    %c0_1 = arith.constant 0 : index
    %c0_2 = arith.constant 0 : index
    %1 = vector.load %arg2[%c0_1, %c0_2] : memref<128x512xf32, #tpu.memory_space<vmem>>, vector<128x512xf32>
    %c0_3 = arith.constant 0 : index
    %c0_4 = arith.constant 0 : index
    %2 = vector.load %arg3[%c0_3, %c0_4] : memref<1x512xf32, #tpu.memory_space<vmem>>, vector<1x512xf32>
    %c0_5 = arith.constant 0 : index
    %c0_6 = arith.constant 0 : index
    %3 = vector.load %arg4[%c0_5, %c0_6] : memref<8x128xf32, #tpu.memory_space<vmem>>, vector<8x128xf32>
    %c0_7 = arith.constant 0 : index
    %c0_8 = arith.constant 0 : index
    %4 = vector.load %arg5[%c0_7, %c0_8] : memref<8x128xf32, #tpu.memory_space<vmem>>, vector<8x128xf32>
    %c0_9 = arith.constant 0 : index
    %c0_10 = arith.constant 0 : index
    %5 = vector.load %arg0[%c0_9, %c0_10] : memref<64x16xf32, #tpu.memory_space<vmem>>, vector<64x16xf32>
    %cst = arith.constant dense<0.000000e+00> : vector<64x512xf32>
    %6 = tpu.matmul %5, %0, %cst {dimension_numbers = #tpu.dot_dimension_numbers<[1], [0], [0], [1], [0, 0, 1, 1], [], []>} : vector<64x16xf32>, vector<16x512xf32>, vector<64x512xf32> -> vector<64x512xf32>
    %7 = vector.broadcast %2 : vector<1x512xf32> to vector<64x512xf32>
    %8 = arith.addf %6, %7 : vector<64x512xf32>
    %c0_11 = arith.constant 0 : index
    %c0_12 = arith.constant 0 : index
    %9 = vector.load %arg16[%c0_11, %c0_12] : memref<64x512xf32, #tpu.memory_space<vmem>>, vector<64x512xf32>
    tpu.vector_store %arg16[%c0_11, %c0_12], %8 {strides = array<i32>} : memref<64x512xf32, #tpu.memory_space<vmem>>, vector<64x512xf32>,
    %c0_i32 = arith.constant 0 : i32
    %c8_i32 = arith.constant 8 : i32
    %10 = arith.muli %c0_i32, %c8_i32 : i32
    %11 = tpu.assume_multiple %10, 8 : i32
    %12 = arith.index_cast %11 : i32 to index
    %c0_13 = arith.constant 0 : index
    %13 = vector.load %arg16[%12, %c0_13] : memref<64x512xf32, #tpu.memory_space<vmem>>, vector<8x512xf32>
    %cst_14 = arith.constant dense<0.000000e+00> : vector<8x512xf32>
    %14 = tpu.matmul %3, %1, %cst_14 {dimension_numbers = #tpu.dot_dimension_numbers<[1], [0], [0], [1], [0, 0, 1, 1], [], []>} : vector<8x128xf32>, vector<128x512xf32>, vector<8x512xf32> -> vector<8x512xf32>
    %15 = arith.addf %13, %14 : vector<8x512xf32>
    %16 = vector.extract_strided_slice %15 {offsets = [0, 0], sizes = [8, 128], strides = [1, 1]} : vector<8x512xf32> to vector<8x128xf32>
    %17 = arith.negf %16 : vector<8x128xf32>
    %18 = math.exp %17 : vector<8x128xf32>
    %cst_15 = arith.constant 1.000000e+00 : f32
    %19 = vector.broadcast %cst_15 : f32 to vector<8x128xf32>
    %20 = arith.addf %19, %18 : vector<8x128xf32>
    %21 = arith.divf %19, %20 : vector<8x128xf32>
    %22 = vector.extract_strided_slice %15 {offsets = [0, 128], sizes = [8, 128], strides = [1, 1]} : vector<8x512xf32> to vector<8x128xf32>
    %23 = arith.negf %22 : vector<8x128xf32>
    %24 = math.exp %23 : vector<8x128xf32>
    %cst_16 = arith.constant 1.000000e+00 : f32
    %25 = vector.broadcast %cst_16 : f32 to vector<8x128xf32>
    %26 = arith.addf %25, %24 : vector<8x128xf32>
    %27 = arith.divf %25, %26 : vector<8x128xf32>
    %28 = vector.extract_strided_slice %15 {offsets = [0, 256], sizes = [8, 128], strides = [1, 1]} : vector<8x512xf32> to vector<8x128xf32>
    %29 = math.tanh %28 : vector<8x128xf32>
    %30 = vector.extract_strided_slice %15 {offsets = [0, 384], sizes = [8, 128], strides = [1, 1]} : vector<8x512xf32> to vector<8x128xf32>
    %31 = arith.negf %30 : vector<8x128xf32>
    %32 = math.exp %31 : vector<8x128xf32>
    %cst_17 = arith.constant 1.000000e+00 : f32
    %33 = vector.broadcast %cst_17 : f32 to vector<8x128xf32>
    %34 = arith.addf %33, %32 : vector<8x128xf32>
    %35 = arith.divf %33, %34 : vector<8x128xf32>
    %36 = arith.mulf %27, %4 : vector<8x128xf32>
    %37 = arith.mulf %21, %29 : vector<8x128xf32>
    %38 = arith.addf %36, %37 : vector<8x128xf32>
    %39 = math.tanh %38 : vector<8x128xf32>
    %40 = arith.mulf %35, %39 : vector<8x128xf32>
    %c8_i32_18 = arith.constant 8 : i32
    %41 = arith.muli %c0_i32, %c8_i32_18 : i32
    %c0_i32_19 = arith.constant 0 : i32
    %42 = arith.addi %c0_i32_19, %41 : i32
    %43 = tpu.assume_multiple %42, 8 : i32
    %44 = arith.index_cast %43 : i32 to index
    %c0_20 = arith.constant 0 : index
    %45 = vector.load %arg17[%44, %c0_20] : memref<64x128xf32, #tpu.memory_space<vmem>>, vector<8x128xf32>
    tpu.vector_store %arg17[%44, %c0_20], %40 {strides = array<i32>} : memref<64x128xf32, #tpu.memory_space<vmem>>, vector<8x128xf32>,
    %c1_i32 = arith.constant 1 : i32
    %c8_i32_21 = arith.constant 8 : i32
    %46 = arith.muli %c1_i32, %c8_i32_21 : i32
    %47 = tpu.assume_multiple %46, 8 : i32
    %48 = arith.index_cast %47 : i32 to index
    %c0_22 = arith.constant 0 : index
    %49 = vector.load %arg16[%48, %c0_22] : memref<64x512xf32, #tpu.memory_space<vmem>>, vector<8x512xf32>
    %cst_23 = arith.constant dense<0.000000e+00> : vector<8x512xf32>
    %50 = tpu.matmul %40, %1, %cst_23 {dimension_numbers = #tpu.dot_dimension_numbers<[1], [0], [0], [1], [0, 0, 1, 1], [], []>} : vector<8x128xf32>, vector<128x512xf32>, vector<8x512xf32> -> vector<8x512xf32>
    %51 = arith.addf %49, %50 : vector<8x512xf32>
    %52 = vector.extract_strided_slice %51 {offsets = [0, 0], sizes = [8, 128], strides = [1, 1]} : vector<8x512xf32> to vector<8x128xf32>
    %53 = arith.negf %52 : vector<8x128xf32>
    %54 = math.exp %53 : vector<8x128xf32>
    %cst_24 = arith.constant 1.000000e+00 : f32
    %55 = vector.broadcast %cst_24 : f32 to vector<8x128xf32>
    %56 = arith.addf %55, %54 : vector<8x128xf32>
    %57 = arith.divf %55, %56 : vector<8x128xf32>
    %58 = vector.extract_strided_slice %51 {offsets = [0, 128], sizes = [8, 128], strides = [1, 1]} : vector<8x512xf32> to vector<8x128xf32>
    %59 = arith.negf %58 : vector<8x128xf32>
    %60 = math.exp %59 : vector<8x128xf32>
    %cst_25 = arith.constant 1.000000e+00 : f32
    %61 = vector.broadcast %cst_25 : f32 to vector<8x128xf32>
    %62 = arith.addf %61, %60 : vector<8x128xf32>
    %63 = arith.divf %61, %62 : vector<8x128xf32>
    %64 = vector.extract_strided_slice %51 {offsets = [0, 256], sizes = [8, 128], strides = [1, 1]} : vector<8x512xf32> to vector<8x128xf32>
    %65 = math.tanh %64 : vector<8x128xf32>
    %66 = vector.extract_strided_slice %51 {offsets = [0, 384], sizes = [8, 128], strides = [1, 1]} : vector<8x512xf32> to vector<8x128xf32>
    %67 = arith.negf %66 : vector<8x128xf32>
    %68 = math.exp %67 : vector<8x128xf32>
    %cst_26 = arith.constant 1.000000e+00 : f32
    %69 = vector.broadcast %cst_26 : f32 to vector<8x128xf32>
    %70 = arith.addf %69, %68 : vector<8x128xf32>
    %71 = arith.divf %69, %70 : vector<8x128xf32>
    %72 = arith.mulf %63, %38 : vector<8x128xf32>
    %73 = arith.mulf %57, %65 : vector<8x128xf32>
    %74 = arith.addf %72, %73 : vector<8x128xf32>
    %75 = math.tanh %74 : vector<8x128xf32>
    %76 = arith.mulf %71, %75 : vector<8x128xf32>
    %c8_i32_27 = arith.constant 8 : i32
    %77 = arith.muli %c1_i32, %c8_i32_27 : i32
    %c0_i32_28 = arith.constant 0 : i32
    %78 = arith.addi %c0_i32_28, %77 : i32
    %79 = tpu.assume_multiple %78, 8 : i32
    %80 = arith.index_cast %79 : i32 to index
    %c0_29 = arith.constant 0 : index
    %81 = vector.load %arg17[%80, %c0_29] : memref<64x128xf32, #tpu.memory_space<vmem>>, vector<8x128xf32>
    tpu.vector_store %arg17[%80, %c0_29], %76 {strides = array<i32>} : memref<64x128xf32, #tpu.memory_space<vmem>>, vector<8x128xf32>,
    %c2_i32 = arith.constant 2 : i32
    %c8_i32_30 = arith.constant 8 : i32
    %82 = arith.muli %c2_i32, %c8_i32_30 : i32
    %83 = tpu.assume_multiple %82, 8 : i32
    %84 = arith.index_cast %83 : i32 to index
    %c0_31 = arith.constant 0 : index
    %85 = vector.load %arg16[%84, %c0_31] : memref<64x512xf32, #tpu.memory_space<vmem>>, vector<8x512xf32>
    %cst_32 = arith.constant dense<0.000000e+00> : vector<8x512xf32>
    %86 = tpu.matmul %76, %1, %cst_32 {dimension_numbers = #tpu.dot_dimension_numbers<[1], [0], [0], [1], [0, 0, 1, 1], [], []>} : vector<8x128xf32>, vector<128x512xf32>, vector<8x512xf32> -> vector<8x512xf32>
    %87 = arith.addf %85, %86 : vector<8x512xf32>
    %88 = vector.extract_strided_slice %87 {offsets = [0, 0], sizes = [8, 128], strides = [1, 1]} : vector<8x512xf32> to vector<8x128xf32>
    %89 = arith.negf %88 : vector<8x128xf32>
    %90 = math.exp %89 : vector<8x128xf32>
    %cst_33 = arith.constant 1.000000e+00 : f32
    %91 = vector.broadcast %cst_33 : f32 to vector<8x128xf32>
    %92 = arith.addf %91, %90 : vector<8x128xf32>
    %93 = arith.divf %91, %92 : vector<8x128xf32>
    %94 = vector.extract_strided_slice %87 {offsets = [0, 128], sizes = [8, 128], strides = [1, 1]} : vector<8x512xf32> to vector<8x128xf32>
    %95 = arith.negf %94 : vector<8x128xf32>
    %96 = math.exp %95 : vector<8x128xf32>
    %cst_34 = arith.constant 1.000000e+00 : f32
    %97 = vector.broadcast %cst_34 : f32 to vector<8x128xf32>
    %98 = arith.addf %97, %96 : vector<8x128xf32>
    %99 = arith.divf %97, %98 : vector<8x128xf32>
    %100 = vector.extract_strided_slice %87 {offsets = [0, 256], sizes = [8, 128], strides = [1, 1]} : vector<8x512xf32> to vector<8x128xf32>
    %101 = math.tanh %100 : vector<8x128xf32>
    %102 = vector.extract_strided_slice %87 {offsets = [0, 384], sizes = [8, 128], strides = [1, 1]} : vector<8x512xf32> to vector<8x128xf32>
    %103 = arith.negf %102 : vector<8x128xf32>
    %104 = math.exp %103 : vector<8x128xf32>
    %cst_35 = arith.constant 1.000000e+00 : f32
    %105 = vector.broadcast %cst_35 : f32 to vector<8x128xf32>
    %106 = arith.addf %105, %104 : vector<8x128xf32>
    %107 = arith.divf %105, %106 : vector<8x128xf32>
    %108 = arith.mulf %99, %74 : vector<8x128xf32>
    %109 = arith.mulf %93, %101 : vector<8x128xf32>
    %110 = arith.addf %108, %109 : vector<8x128xf32>
    %111 = math.tanh %110 : vector<8x128xf32>
    %112 = arith.mulf %107, %111 : vector<8x128xf32>
    %c8_i32_36 = arith.constant 8 : i32
    %113 = arith.muli %c2_i32, %c8_i32_36 : i32
    %c0_i32_37 = arith.constant 0 : i32
    %114 = arith.addi %c0_i32_37, %113 : i32
    %115 = tpu.assume_multiple %114, 8 : i32
    %116 = arith.index_cast %115 : i32 to index
    %c0_38 = arith.constant 0 : index
    %117 = vector.load %arg17[%116, %c0_38] : memref<64x128xf32, #tpu.memory_space<vmem>>, vector<8x128xf32>
    tpu.vector_store %arg17[%116, %c0_38], %112 {strides = array<i32>} : memref<64x128xf32, #tpu.memory_space<vmem>>, vector<8x128xf32>,
    %c3_i32 = arith.constant 3 : i32
    %c8_i32_39 = arith.constant 8 : i32
    %118 = arith.muli %c3_i32, %c8_i32_39 : i32
    %119 = tpu.assume_multiple %118, 8 : i32
    %120 = arith.index_cast %119 : i32 to index
    %c0_40 = arith.constant 0 : index
    %121 = vector.load %arg16[%120, %c0_40] : memref<64x512xf32, #tpu.memory_space<vmem>>, vector<8x512xf32>
    %cst_41 = arith.constant dense<0.000000e+00> : vector<8x512xf32>
    %122 = tpu.matmul %112, %1, %cst_41 {dimension_numbers = #tpu.dot_dimension_numbers<[1], [0], [0], [1], [0, 0, 1, 1], [], []>} : vector<8x128xf32>, vector<128x512xf32>, vector<8x512xf32> -> vector<8x512xf32>
    %123 = arith.addf %121, %122 : vector<8x512xf32>
    %124 = vector.extract_strided_slice %123 {offsets = [0, 0], sizes = [8, 128], strides = [1, 1]} : vector<8x512xf32> to vector<8x128xf32>
    %125 = arith.negf %124 : vector<8x128xf32>
    %126 = math.exp %125 : vector<8x128xf32>
    %cst_42 = arith.constant 1.000000e+00 : f32
    %127 = vector.broadcast %cst_42 : f32 to vector<8x128xf32>
    %128 = arith.addf %127, %126 : vector<8x128xf32>
    %129 = arith.divf %127, %128 : vector<8x128xf32>
    %130 = vector.extract_strided_slice %123 {offsets = [0, 128], sizes = [8, 128], strides = [1, 1]} : vector<8x512xf32> to vector<8x128xf32>
    %131 = arith.negf %130 : vector<8x128xf32>
    %132 = math.exp %131 : vector<8x128xf32>
    %cst_43 = arith.constant 1.000000e+00 : f32
    %133 = vector.broadcast %cst_43 : f32 to vector<8x128xf32>
    %134 = arith.addf %133, %132 : vector<8x128xf32>
    %135 = arith.divf %133, %134 : vector<8x128xf32>
    %136 = vector.extract_strided_slice %123 {offsets = [0, 256], sizes = [8, 128], strides = [1, 1]} : vector<8x512xf32> to vector<8x128xf32>
    %137 = math.tanh %136 : vector<8x128xf32>
    %138 = vector.extract_strided_slice %123 {offsets = [0, 384], sizes = [8, 128], strides = [1, 1]} : vector<8x512xf32> to vector<8x128xf32>
    %139 = arith.negf %138 : vector<8x128xf32>
    %140 = math.exp %139 : vector<8x128xf32>
    %cst_44 = arith.constant 1.000000e+00 : f32
    %141 = vector.broadcast %cst_44 : f32 to vector<8x128xf32>
    %142 = arith.addf %141, %140 : vector<8x128xf32>
    %143 = arith.divf %141, %142 : vector<8x128xf32>
    %144 = arith.mulf %135, %110 : vector<8x128xf32>
    %145 = arith.mulf %129, %137 : vector<8x128xf32>
    %146 = arith.addf %144, %145 : vector<8x128xf32>
    %147 = math.tanh %146 : vector<8x128xf32>
    %148 = arith.mulf %143, %147 : vector<8x128xf32>
    %c8_i32_45 = arith.constant 8 : i32
    %149 = arith.muli %c3_i32, %c8_i32_45 : i32
    %c0_i32_46 = arith.constant 0 : i32
    %150 = arith.addi %c0_i32_46, %149 : i32
    %151 = tpu.assume_multiple %150, 8 : i32
    %152 = arith.index_cast %151 : i32 to index
    %c0_47 = arith.constant 0 : index
    %153 = vector.load %arg17[%152, %c0_47] : memref<64x128xf32, #tpu.memory_space<vmem>>, vector<8x128xf32>
    tpu.vector_store %arg17[%152, %c0_47], %148 {strides = array<i32>} : memref<64x128xf32, #tpu.memory_space<vmem>>, vector<8x128xf32>,
    %c4_i32 = arith.constant 4 : i32
    %c8_i32_48 = arith.constant 8 : i32
    %154 = arith.muli %c4_i32, %c8_i32_48 : i32
    %155 = tpu.assume_multiple %154, 8 : i32
    %156 = arith.index_cast %155 : i32 to index
    %c0_49 = arith.constant 0 : index
    %157 = vector.load %arg16[%156, %c0_49] : memref<64x512xf32, #tpu.memory_space<vmem>>, vector<8x512xf32>
    %cst_50 = arith.constant dense<0.000000e+00> : vector<8x512xf32>
    %158 = tpu.matmul %148, %1, %cst_50 {dimension_numbers = #tpu.dot_dimension_numbers<[1], [0], [0], [1], [0, 0, 1, 1], [], []>} : vector<8x128xf32>, vector<128x512xf32>, vector<8x512xf32> -> vector<8x512xf32>
    %159 = arith.addf %157, %158 : vector<8x512xf32>
    %160 = vector.extract_strided_slice %159 {offsets = [0, 0], sizes = [8, 128], strides = [1, 1]} : vector<8x512xf32> to vector<8x128xf32>
    %161 = arith.negf %160 : vector<8x128xf32>
    %162 = math.exp %161 : vector<8x128xf32>
    %cst_51 = arith.constant 1.000000e+00 : f32
    %163 = vector.broadcast %cst_51 : f32 to vector<8x128xf32>
    %164 = arith.addf %163, %162 : vector<8x128xf32>
    %165 = arith.divf %163, %164 : vector<8x128xf32>
    %166 = vector.extract_strided_slice %159 {offsets = [0, 128], sizes = [8, 128], strides = [1, 1]} : vector<8x512xf32> to vector<8x128xf32>
    %167 = arith.negf %166 : vector<8x128xf32>
    %168 = math.exp %167 : vector<8x128xf32>
    %cst_52 = arith.constant 1.000000e+00 : f32
    %169 = vector.broadcast %cst_52 : f32 to vector<8x128xf32>
    %170 = arith.addf %169, %168 : vector<8x128xf32>
    %171 = arith.divf %169, %170 : vector<8x128xf32>
    %172 = vector.extract_strided_slice %159 {offsets = [0, 256], sizes = [8, 128], strides = [1, 1]} : vector<8x512xf32> to vector<8x128xf32>
    %173 = math.tanh %172 : vector<8x128xf32>
    %174 = vector.extract_strided_slice %159 {offsets = [0, 384], sizes = [8, 128], strides = [1, 1]} : vector<8x512xf32> to vector<8x128xf32>
    %175 = arith.negf %174 : vector<8x128xf32>
    %176 = math.exp %175 : vector<8x128xf32>
    %cst_53 = arith.constant 1.000000e+00 : f32
    %177 = vector.broadcast %cst_53 : f32 to vector<8x128xf32>
    %178 = arith.addf %177, %176 : vector<8x128xf32>
    %179 = arith.divf %177, %178 : vector<8x128xf32>
    %180 = arith.mulf %171, %146 : vector<8x128xf32>
    %181 = arith.mulf %165, %173 : vector<8x128xf32>
    %182 = arith.addf %180, %181 : vector<8x128xf32>
    %183 = math.tanh %182 : vector<8x128xf32>
    %184 = arith.mulf %179, %183 : vector<8x128xf32>
    %c8_i32_54 = arith.constant 8 : i32
    %185 = arith.muli %c4_i32, %c8_i32_54 : i32
    %c0_i32_55 = arith.constant 0 : i32
    %186 = arith.addi %c0_i32_55, %185 : i32
    %187 = tpu.assume_multiple %186, 8 : i32
    %188 = arith.index_cast %187 : i32 to index
    %c0_56 = arith.constant 0 : index
    %189 = vector.load %arg17[%188, %c0_56] : memref<64x128xf32, #tpu.memory_space<vmem>>, vector<8x128xf32>
    tpu.vector_store %arg17[%188, %c0_56], %184 {strides = array<i32>} : memref<64x128xf32, #tpu.memory_space<vmem>>, vector<8x128xf32>,
    %c5_i32 = arith.constant 5 : i32
    %c8_i32_57 = arith.constant 8 : i32
    %190 = arith.muli %c5_i32, %c8_i32_57 : i32
    %191 = tpu.assume_multiple %190, 8 : i32
    %192 = arith.index_cast %191 : i32 to index
    %c0_58 = arith.constant 0 : index
    %193 = vector.load %arg16[%192, %c0_58] : memref<64x512xf32, #tpu.memory_space<vmem>>, vector<8x512xf32>
    %cst_59 = arith.constant dense<0.000000e+00> : vector<8x512xf32>
    %194 = tpu.matmul %184, %1, %cst_59 {dimension_numbers = #tpu.dot_dimension_numbers<[1], [0], [0], [1], [0, 0, 1, 1], [], []>} : vector<8x128xf32>, vector<128x512xf32>, vector<8x512xf32> -> vector<8x512xf32>
    %195 = arith.addf %193, %194 : vector<8x512xf32>
    %196 = vector.extract_strided_slice %195 {offsets = [0, 0], sizes = [8, 128], strides = [1, 1]} : vector<8x512xf32> to vector<8x128xf32>
    %197 = arith.negf %196 : vector<8x128xf32>
    %198 = math.exp %197 : vector<8x128xf32>
    %cst_60 = arith.constant 1.000000e+00 : f32
    %199 = vector.broadcast %cst_60 : f32 to vector<8x128xf32>
    %200 = arith.addf %199, %198 : vector<8x128xf32>
    %201 = arith.divf %199, %200 : vector<8x128xf32>
    %202 = vector.extract_strided_slice %195 {offsets = [0, 128], sizes = [8, 128], strides = [1, 1]} : vector<8x512xf32> to vector<8x128xf32>
    %203 = arith.negf %202 : vector<8x128xf32>
    %204 = math.exp %203 : vector<8x128xf32>
    %cst_61 = arith.constant 1.000000e+00 : f32
    %205 = vector.broadcast %cst_61 : f32 to vector<8x128xf32>
    %206 = arith.addf %205, %204 : vector<8x128xf32>
    %207 = arith.divf %205, %206 : vector<8x128xf32>
    %208 = vector.extract_strided_slice %195 {offsets = [0, 256], sizes = [8, 128], strides = [1, 1]} : vector<8x512xf32> to vector<8x128xf32>
    %209 = math.tanh %208 : vector<8x128xf32>
    %210 = vector.extract_strided_slice %195 {offsets = [0, 384], sizes = [8, 128], strides = [1, 1]} : vector<8x512xf32> to vector<8x128xf32>
    %211 = arith.negf %210 : vector<8x128xf32>
    %212 = math.exp %211 : vector<8x128xf32>
    %cst_62 = arith.constant 1.000000e+00 : f32
    %213 = vector.broadcast %cst_62 : f32 to vector<8x128xf32>
    %214 = arith.addf %213, %212 : vector<8x128xf32>
    %215 = arith.divf %213, %214 : vector<8x128xf32>
    %216 = arith.mulf %207, %182 : vector<8x128xf32>
    %217 = arith.mulf %201, %209 : vector<8x128xf32>
    %218 = arith.addf %216, %217 : vector<8x128xf32>
    %219 = math.tanh %218 : vector<8x128xf32>
    %220 = arith.mulf %215, %219 : vector<8x128xf32>
    %c8_i32_63 = arith.constant 8 : i32
    %221 = arith.muli %c5_i32, %c8_i32_63 : i32
    %c0_i32_64 = arith.constant 0 : i32
    %222 = arith.addi %c0_i32_64, %221 : i32
    %223 = tpu.assume_multiple %222, 8 : i32
    %224 = arith.index_cast %223 : i32 to index
    %c0_65 = arith.constant 0 : index
    %225 = vector.load %arg17[%224, %c0_65] : memref<64x128xf32, #tpu.memory_space<vmem>>, vector<8x128xf32>
    tpu.vector_store %arg17[%224, %c0_65], %220 {strides = array<i32>} : memref<64x128xf32, #tpu.memory_space<vmem>>, vector<8x128xf32>,
    %c6_i32 = arith.constant 6 : i32
    %c8_i32_66 = arith.constant 8 : i32
    %226 = arith.muli %c6_i32, %c8_i32_66 : i32
    %227 = tpu.assume_multiple %226, 8 : i32
    %228 = arith.index_cast %227 : i32 to index
    %c0_67 = arith.constant 0 : index
    %229 = vector.load %arg16[%228, %c0_67] : memref<64x512xf32, #tpu.memory_space<vmem>>, vector<8x512xf32>
    %cst_68 = arith.constant dense<0.000000e+00> : vector<8x512xf32>
    %230 = tpu.matmul %220, %1, %cst_68 {dimension_numbers = #tpu.dot_dimension_numbers<[1], [0], [0], [1], [0, 0, 1, 1], [], []>} : vector<8x128xf32>, vector<128x512xf32>, vector<8x512xf32> -> vector<8x512xf32>
    %231 = arith.addf %229, %230 : vector<8x512xf32>
    %232 = vector.extract_strided_slice %231 {offsets = [0, 0], sizes = [8, 128], strides = [1, 1]} : vector<8x512xf32> to vector<8x128xf32>
    %233 = arith.negf %232 : vector<8x128xf32>
    %234 = math.exp %233 : vector<8x128xf32>
    %cst_69 = arith.constant 1.000000e+00 : f32
    %235 = vector.broadcast %cst_69 : f32 to vector<8x128xf32>
    %236 = arith.addf %235, %234 : vector<8x128xf32>
    %237 = arith.divf %235, %236 : vector<8x128xf32>
    %238 = vector.extract_strided_slice %231 {offsets = [0, 128], sizes = [8, 128], strides = [1, 1]} : vector<8x512xf32> to vector<8x128xf32>
    %239 = arith.negf %238 : vector<8x128xf32>
    %240 = math.exp %239 : vector<8x128xf32>
    %cst_70 = arith.constant 1.000000e+00 : f32
    %241 = vector.broadcast %cst_70 : f32 to vector<8x128xf32>
    %242 = arith.addf %241, %240 : vector<8x128xf32>
    %243 = arith.divf %241, %242 : vector<8x128xf32>
    %244 = vector.extract_strided_slice %231 {offsets = [0, 256], sizes = [8, 128], strides = [1, 1]} : vector<8x512xf32> to vector<8x128xf32>
    %245 = math.tanh %244 : vector<8x128xf32>
    %246 = vector.extract_strided_slice %231 {offsets = [0, 384], sizes = [8, 128], strides = [1, 1]} : vector<8x512xf32> to vector<8x128xf32>
    %247 = arith.negf %246 : vector<8x128xf32>
    %248 = math.exp %247 : vector<8x128xf32>
    %cst_71 = arith.constant 1.000000e+00 : f32
    %249 = vector.broadcast %cst_71 : f32 to vector<8x128xf32>
    %250 = arith.addf %249, %248 : vector<8x128xf32>
    %251 = arith.divf %249, %250 : vector<8x128xf32>
    %252 = arith.mulf %243, %218 : vector<8x128xf32>
    %253 = arith.mulf %237, %245 : vector<8x128xf32>
    %254 = arith.addf %252, %253 : vector<8x128xf32>
    %255 = math.tanh %254 : vector<8x128xf32>
    %256 = arith.mulf %251, %255 : vector<8x128xf32>
    %c8_i32_72 = arith.constant 8 : i32
    %257 = arith.muli %c6_i32, %c8_i32_72 : i32
    %c0_i32_73 = arith.constant 0 : i32
    %258 = arith.addi %c0_i32_73, %257 : i32
    %259 = tpu.assume_multiple %258, 8 : i32
    %260 = arith.index_cast %259 : i32 to index
    %c0_74 = arith.constant 0 : index
    %261 = vector.load %arg17[%260, %c0_74] : memref<64x128xf32, #tpu.memory_space<vmem>>, vector<8x128xf32>
    tpu.vector_store %arg17[%260, %c0_74], %256 {strides = array<i32>} : memref<64x128xf32, #tpu.memory_space<vmem>>, vector<8x128xf32>,
    %c7_i32 = arith.constant 7 : i32
    %c8_i32_75 = arith.constant 8 : i32
    %262 = arith.muli %c7_i32, %c8_i32_75 : i32
    %263 = tpu.assume_multiple %262, 8 : i32
    %264 = arith.index_cast %263 : i32 to index
    %c0_76 = arith.constant 0 : index
    %265 = vector.load %arg16[%264, %c0_76] : memref<64x512xf32, #tpu.memory_space<vmem>>, vector<8x512xf32>
    %cst_77 = arith.constant dense<0.000000e+00> : vector<8x512xf32>
    %266 = tpu.matmul %256, %1, %cst_77 {dimension_numbers = #tpu.dot_dimension_numbers<[1], [0], [0], [1], [0, 0, 1, 1], [], []>} : vector<8x128xf32>, vector<128x512xf32>, vector<8x512xf32> -> vector<8x512xf32>
    %267 = arith.addf %265, %266 : vector<8x512xf32>
    %268 = vector.extract_strided_slice %267 {offsets = [0, 0], sizes = [8, 128], strides = [1, 1]} : vector<8x512xf32> to vector<8x128xf32>
    %269 = arith.negf %268 : vector<8x128xf32>
    %270 = math.exp %269 : vector<8x128xf32>
    %cst_78 = arith.constant 1.000000e+00 : f32
    %271 = vector.broadcast %cst_78 : f32 to vector<8x128xf32>
    %272 = arith.addf %271, %270 : vector<8x128xf32>
    %273 = arith.divf %271, %272 : vector<8x128xf32>
    %274 = vector.extract_strided_slice %267 {offsets = [0, 128], sizes = [8, 128], strides = [1, 1]} : vector<8x512xf32> to vector<8x128xf32>
    %275 = arith.negf %274 : vector<8x128xf32>
    %276 = math.exp %275 : vector<8x128xf32>
    %cst_79 = arith.constant 1.000000e+00 : f32
    %277 = vector.broadcast %cst_79 : f32 to vector<8x128xf32>
    %278 = arith.addf %277, %276 : vector<8x128xf32>
    %279 = arith.divf %277, %278 : vector<8x128xf32>
    %280 = vector.extract_strided_slice %267 {offsets = [0, 256], sizes = [8, 128], strides = [1, 1]} : vector<8x512xf32> to vector<8x128xf32>
    %281 = math.tanh %280 : vector<8x128xf32>
    %282 = vector.extract_strided_slice %267 {offsets = [0, 384], sizes = [8, 128], strides = [1, 1]} : vector<8x512xf32> to vector<8x128xf32>
    %283 = arith.negf %282 : vector<8x128xf32>
    %284 = math.exp %283 : vector<8x128xf32>
    %cst_80 = arith.constant 1.000000e+00 : f32
    %285 = vector.broadcast %cst_80 : f32 to vector<8x128xf32>
    %286 = arith.addf %285, %284 : vector<8x128xf32>
    %287 = arith.divf %285, %286 : vector<8x128xf32>
    %288 = arith.mulf %279, %254 : vector<8x128xf32>
    %289 = arith.mulf %273, %281 : vector<8x128xf32>
    %290 = arith.addf %288, %289 : vector<8x128xf32>
    %291 = math.tanh %290 : vector<8x128xf32>
    %292 = arith.mulf %287, %291 : vector<8x128xf32>
    %c8_i32_81 = arith.constant 8 : i32
    %293 = arith.muli %c7_i32, %c8_i32_81 : i32
    %c0_i32_82 = arith.constant 0 : i32
    %294 = arith.addi %c0_i32_82, %293 : i32
    %295 = tpu.assume_multiple %294, 8 : i32
    %296 = arith.index_cast %295 : i32 to index
    %c0_83 = arith.constant 0 : index
    %297 = vector.load %arg17[%296, %c0_83] : memref<64x128xf32, #tpu.memory_space<vmem>>, vector<8x128xf32>
    tpu.vector_store %arg17[%296, %c0_83], %292 {strides = array<i32>} : memref<64x128xf32, #tpu.memory_space<vmem>>, vector<8x128xf32>,
    %c8_i32_84 = arith.constant 8 : i32
    %c0_85 = arith.constant 0 : index
    %c0_86 = arith.constant 0 : index
    %c0_87 = arith.constant 0 : index
    %298 = vector.load %arg14[%c0_85, %c0_86, %c0_87] : memref<2x8x128xf32, #tpu.memory_space<vmem>>, vector<1x8x128xf32>
    %299 = vector.shape_cast %298 : vector<1x8x128xf32> to vector<8x128xf32>
    %300 = vector.shape_cast %292 : vector<8x128xf32> to vector<1x8x128xf32>
    tpu.vector_store %arg14[%c0_85, %c0_86, %c0_87], %300 {strides = array<i32>} : memref<2x8x128xf32, #tpu.memory_space<vmem>>, vector<1x8x128xf32>,
    %c0_88 = arith.constant 0 : index
    %c0_89 = arith.constant 0 : index
    %c0_90 = arith.constant 0 : index
    %301 = vector.load %arg15[%c0_88, %c0_89, %c0_90] : memref<2x8x128xf32, #tpu.memory_space<vmem>>, vector<1x8x128xf32>
    %302 = vector.shape_cast %301 : vector<1x8x128xf32> to vector<8x128xf32>
    %303 = vector.shape_cast %290 : vector<8x128xf32> to vector<1x8x128xf32>
    tpu.vector_store %arg15[%c0_88, %c0_89, %c0_90], %303 {strides = array<i32>} : memref<2x8x128xf32, #tpu.memory_space<vmem>>, vector<1x8x128xf32>,
    %c0_91 = arith.constant 0 : index
    %c0_92 = arith.constant 0 : index
    %304 = vector.load %arg6[%c0_91, %c0_92] : memref<128x512xf32, #tpu.memory_space<vmem>>, vector<128x512xf32>
    %c0_93 = arith.constant 0 : index
    %c0_94 = arith.constant 0 : index
    %305 = vector.load %arg7[%c0_93, %c0_94] : memref<128x512xf32, #tpu.memory_space<vmem>>, vector<128x512xf32>
    %c0_95 = arith.constant 0 : index
    %c0_96 = arith.constant 0 : index
    %306 = vector.load %arg8[%c0_95, %c0_96] : memref<1x512xf32, #tpu.memory_space<vmem>>, vector<1x512xf32>
    %c0_97 = arith.constant 0 : index
    %c0_98 = arith.constant 0 : index
    %307 = vector.load %arg9[%c0_97, %c0_98] : memref<8x128xf32, #tpu.memory_space<vmem>>, vector<8x128xf32>
    %c0_99 = arith.constant 0 : index
    %c0_100 = arith.constant 0 : index
    %308 = vector.load %arg10[%c0_99, %c0_100] : memref<8x128xf32, #tpu.memory_space<vmem>>, vector<8x128xf32>
    %c0_101 = arith.constant 0 : index
    %c0_102 = arith.constant 0 : index
    %309 = vector.load %arg17[%c0_101, %c0_102] : memref<64x128xf32, #tpu.memory_space<vmem>>, vector<64x128xf32>
    %cst_103 = arith.constant dense<0.000000e+00> : vector<64x512xf32>
    %310 = tpu.matmul %309, %304, %cst_103 {dimension_numbers = #tpu.dot_dimension_numbers<[1], [0], [0], [1], [0, 0, 1, 1], [], []>} : vector<64x128xf32>, vector<128x512xf32>, vector<64x512xf32> -> vector<64x512xf32>
    %311 = vector.broadcast %306 : vector<1x512xf32> to vector<64x512xf32>
    %312 = arith.addf %310, %311 : vector<64x512xf32>
    %c0_104 = arith.constant 0 : index
    %c0_105 = arith.constant 0 : index
    %313 = vector.load %arg16[%c0_104, %c0_105] : memref<64x512xf32, #tpu.memory_space<vmem>>, vector<64x512xf32>
    tpu.vector_store %arg16[%c0_104, %c0_105], %312 {strides = array<i32>} : memref<64x512xf32, #tpu.memory_space<vmem>>, vector<64x512xf32>,
    %c0_i32_106 = arith.constant 0 : i32
    %c8_i32_107 = arith.constant 8 : i32
    %314 = arith.muli %c0_i32_106, %c8_i32_107 : i32
    %315 = tpu.assume_multiple %314, 8 : i32
    %316 = arith.index_cast %315 : i32 to index
    %c0_108 = arith.constant 0 : index
    %317 = vector.load %arg16[%316, %c0_108] : memref<64x512xf32, #tpu.memory_space<vmem>>, vector<8x512xf32>
    %cst_109 = arith.constant dense<0.000000e+00> : vector<8x512xf32>
    %318 = tpu.matmul %307, %305, %cst_109 {dimension_numbers = #tpu.dot_dimension_numbers<[1], [0], [0], [1], [0, 0, 1, 1], [], []>} : vector<8x128xf32>, vector<128x512xf32>, vector<8x512xf32> -> vector<8x512xf32>
    %319 = arith.addf %317, %318 : vector<8x512xf32>
    %320 = vector.extract_strided_slice %319 {offsets = [0, 0], sizes = [8, 128], strides = [1, 1]} : vector<8x512xf32> to vector<8x128xf32>
    %321 = arith.negf %320 : vector<8x128xf32>
    %322 = math.exp %321 : vector<8x128xf32>
    %cst_110 = arith.constant 1.000000e+00 : f32
    %323 = vector.broadcast %cst_110 : f32 to vector<8x128xf32>
    %324 = arith.addf %323, %322 : vector<8x128xf32>
    %325 = arith.divf %323, %324 : vector<8x128xf32>
    %326 = vector.extract_strided_slice %319 {offsets = [0, 128], sizes = [8, 128], strides = [1, 1]} : vector<8x512xf32> to vector<8x128xf32>
    %327 = arith.negf %326 : vector<8x128xf32>
    %328 = math.exp %327 : vector<8x128xf32>
    %cst_111 = arith.constant 1.000000e+00 : f32
    %329 = vector.broadcast %cst_111 : f32 to vector<8x128xf32>
    %330 = arith.addf %329, %328 : vector<8x128xf32>
    %331 = arith.divf %329, %330 : vector<8x128xf32>
    %332 = vector.extract_strided_slice %319 {offsets = [0, 256], sizes = [8, 128], strides = [1, 1]} : vector<8x512xf32> to vector<8x128xf32>
    %333 = math.tanh %332 : vector<8x128xf32>
    %334 = vector.extract_strided_slice %319 {offsets = [0, 384], sizes = [8, 128], strides = [1, 1]} : vector<8x512xf32> to vector<8x128xf32>
    %335 = arith.negf %334 : vector<8x128xf32>
    %336 = math.exp %335 : vector<8x128xf32>
    %cst_112 = arith.constant 1.000000e+00 : f32
    %337 = vector.broadcast %cst_112 : f32 to vector<8x128xf32>
    %338 = arith.addf %337, %336 : vector<8x128xf32>
    %339 = arith.divf %337, %338 : vector<8x128xf32>
    %340 = arith.mulf %331, %308 : vector<8x128xf32>
    %341 = arith.mulf %325, %333 : vector<8x128xf32>
    %342 = arith.addf %340, %341 : vector<8x128xf32>
    %343 = math.tanh %342 : vector<8x128xf32>
    %344 = arith.mulf %339, %343 : vector<8x128xf32>
    %c1_i32_113 = arith.constant 1 : i32
    %c8_i32_114 = arith.constant 8 : i32
    %345 = arith.muli %c1_i32_113, %c8_i32_114 : i32
    %346 = tpu.assume_multiple %345, 8 : i32
    %347 = arith.index_cast %346 : i32 to index
    %c0_115 = arith.constant 0 : index
    %348 = vector.load %arg16[%347, %c0_115] : memref<64x512xf32, #tpu.memory_space<vmem>>, vector<8x512xf32>
    %cst_116 = arith.constant dense<0.000000e+00> : vector<8x512xf32>
    %349 = tpu.matmul %344, %305, %cst_116 {dimension_numbers = #tpu.dot_dimension_numbers<[1], [0], [0], [1], [0, 0, 1, 1], [], []>} : vector<8x128xf32>, vector<128x512xf32>, vector<8x512xf32> -> vector<8x512xf32>
    %350 = arith.addf %348, %349 : vector<8x512xf32>
    %351 = vector.extract_strided_slice %350 {offsets = [0, 0], sizes = [8, 128], strides = [1, 1]} : vector<8x512xf32> to vector<8x128xf32>
    %352 = arith.negf %351 : vector<8x128xf32>
    %353 = math.exp %352 : vector<8x128xf32>
    %cst_117 = arith.constant 1.000000e+00 : f32
    %354 = vector.broadcast %cst_117 : f32 to vector<8x128xf32>
    %355 = arith.addf %354, %353 : vector<8x128xf32>
    %356 = arith.divf %354, %355 : vector<8x128xf32>
    %357 = vector.extract_strided_slice %350 {offsets = [0, 128], sizes = [8, 128], strides = [1, 1]} : vector<8x512xf32> to vector<8x128xf32>
    %358 = arith.negf %357 : vector<8x128xf32>
    %359 = math.exp %358 : vector<8x128xf32>
    %cst_118 = arith.constant 1.000000e+00 : f32
    %360 = vector.broadcast %cst_118 : f32 to vector<8x128xf32>
    %361 = arith.addf %360, %359 : vector<8x128xf32>
    %362 = arith.divf %360, %361 : vector<8x128xf32>
    %363 = vector.extract_strided_slice %350 {offsets = [0, 256], sizes = [8, 128], strides = [1, 1]} : vector<8x512xf32> to vector<8x128xf32>
    %364 = math.tanh %363 : vector<8x128xf32>
    %365 = vector.extract_strided_slice %350 {offsets = [0, 384], sizes = [8, 128], strides = [1, 1]} : vector<8x512xf32> to vector<8x128xf32>
    %366 = arith.negf %365 : vector<8x128xf32>
    %367 = math.exp %366 : vector<8x128xf32>
    %cst_119 = arith.constant 1.000000e+00 : f32
    %368 = vector.broadcast %cst_119 : f32 to vector<8x128xf32>
    %369 = arith.addf %368, %367 : vector<8x128xf32>
    %370 = arith.divf %368, %369 : vector<8x128xf32>
    %371 = arith.mulf %362, %342 : vector<8x128xf32>
    %372 = arith.mulf %356, %364 : vector<8x128xf32>
    %373 = arith.addf %371, %372 : vector<8x128xf32>
    %374 = math.tanh %373 : vector<8x128xf32>
    %375 = arith.mulf %370, %374 : vector<8x128xf32>
    %c2_i32_120 = arith.constant 2 : i32
    %c8_i32_121 = arith.constant 8 : i32
    %376 = arith.muli %c2_i32_120, %c8_i32_121 : i32
    %377 = tpu.assume_multiple %376, 8 : i32
    %378 = arith.index_cast %377 : i32 to index
    %c0_122 = arith.constant 0 : index
    %379 = vector.load %arg16[%378, %c0_122] : memref<64x512xf32, #tpu.memory_space<vmem>>, vector<8x512xf32>
    %cst_123 = arith.constant dense<0.000000e+00> : vector<8x512xf32>
    %380 = tpu.matmul %375, %305, %cst_123 {dimension_numbers = #tpu.dot_dimension_numbers<[1], [0], [0], [1], [0, 0, 1, 1], [], []>} : vector<8x128xf32>, vector<128x512xf32>, vector<8x512xf32> -> vector<8x512xf32>
    %381 = arith.addf %379, %380 : vector<8x512xf32>
    %382 = vector.extract_strided_slice %381 {offsets = [0, 0], sizes = [8, 128], strides = [1, 1]} : vector<8x512xf32> to vector<8x128xf32>
    %383 = arith.negf %382 : vector<8x128xf32>
    %384 = math.exp %383 : vector<8x128xf32>
    %cst_124 = arith.constant 1.000000e+00 : f32
    %385 = vector.broadcast %cst_124 : f32 to vector<8x128xf32>
    %386 = arith.addf %385, %384 : vector<8x128xf32>
    %387 = arith.divf %385, %386 : vector<8x128xf32>
    %388 = vector.extract_strided_slice %381 {offsets = [0, 128], sizes = [8, 128], strides = [1, 1]} : vector<8x512xf32> to vector<8x128xf32>
    %389 = arith.negf %388 : vector<8x128xf32>
    %390 = math.exp %389 : vector<8x128xf32>
    %cst_125 = arith.constant 1.000000e+00 : f32
    %391 = vector.broadcast %cst_125 : f32 to vector<8x128xf32>
    %392 = arith.addf %391, %390 : vector<8x128xf32>
    %393 = arith.divf %391, %392 : vector<8x128xf32>
    %394 = vector.extract_strided_slice %381 {offsets = [0, 256], sizes = [8, 128], strides = [1, 1]} : vector<8x512xf32> to vector<8x128xf32>
    %395 = math.tanh %394 : vector<8x128xf32>
    %396 = vector.extract_strided_slice %381 {offsets = [0, 384], sizes = [8, 128], strides = [1, 1]} : vector<8x512xf32> to vector<8x128xf32>
    %397 = arith.negf %396 : vector<8x128xf32>
    %398 = math.exp %397 : vector<8x128xf32>
    %cst_126 = arith.constant 1.000000e+00 : f32
    %399 = vector.broadcast %cst_126 : f32 to vector<8x128xf32>
    %400 = arith.addf %399, %398 : vector<8x128xf32>
    %401 = arith.divf %399, %400 : vector<8x128xf32>
    %402 = arith.mulf %393, %373 : vector<8x128xf32>
    %403 = arith.mulf %387, %395 : vector<8x128xf32>
    %404 = arith.addf %402, %403 : vector<8x128xf32>
    %405 = math.tanh %404 : vector<8x128xf32>
    %406 = arith.mulf %401, %405 : vector<8x128xf32>
    %c3_i32_127 = arith.constant 3 : i32
    %c8_i32_128 = arith.constant 8 : i32
    %407 = arith.muli %c3_i32_127, %c8_i32_128 : i32
    %408 = tpu.assume_multiple %407, 8 : i32
    %409 = arith.index_cast %408 : i32 to index
    %c0_129 = arith.constant 0 : index
    %410 = vector.load %arg16[%409, %c0_129] : memref<64x512xf32, #tpu.memory_space<vmem>>, vector<8x512xf32>
    %cst_130 = arith.constant dense<0.000000e+00> : vector<8x512xf32>
    %411 = tpu.matmul %406, %305, %cst_130 {dimension_numbers = #tpu.dot_dimension_numbers<[1], [0], [0], [1], [0, 0, 1, 1], [], []>} : vector<8x128xf32>, vector<128x512xf32>, vector<8x512xf32> -> vector<8x512xf32>
    %412 = arith.addf %410, %411 : vector<8x512xf32>
    %413 = vector.extract_strided_slice %412 {offsets = [0, 0], sizes = [8, 128], strides = [1, 1]} : vector<8x512xf32> to vector<8x128xf32>
    %414 = arith.negf %413 : vector<8x128xf32>
    %415 = math.exp %414 : vector<8x128xf32>
    %cst_131 = arith.constant 1.000000e+00 : f32
    %416 = vector.broadcast %cst_131 : f32 to vector<8x128xf32>
    %417 = arith.addf %416, %415 : vector<8x128xf32>
    %418 = arith.divf %416, %417 : vector<8x128xf32>
    %419 = vector.extract_strided_slice %412 {offsets = [0, 128], sizes = [8, 128], strides = [1, 1]} : vector<8x512xf32> to vector<8x128xf32>
    %420 = arith.negf %419 : vector<8x128xf32>
    %421 = math.exp %420 : vector<8x128xf32>
    %cst_132 = arith.constant 1.000000e+00 : f32
    %422 = vector.broadcast %cst_132 : f32 to vector<8x128xf32>
    %423 = arith.addf %422, %421 : vector<8x128xf32>
    %424 = arith.divf %422, %423 : vector<8x128xf32>
    %425 = vector.extract_strided_slice %412 {offsets = [0, 256], sizes = [8, 128], strides = [1, 1]} : vector<8x512xf32> to vector<8x128xf32>
    %426 = math.tanh %425 : vector<8x128xf32>
    %427 = vector.extract_strided_slice %412 {offsets = [0, 384], sizes = [8, 128], strides = [1, 1]} : vector<8x512xf32> to vector<8x128xf32>
    %428 = arith.negf %427 : vector<8x128xf32>
    %429 = math.exp %428 : vector<8x128xf32>
    %cst_133 = arith.constant 1.000000e+00 : f32
    %430 = vector.broadcast %cst_133 : f32 to vector<8x128xf32>
    %431 = arith.addf %430, %429 : vector<8x128xf32>
    %432 = arith.divf %430, %431 : vector<8x128xf32>
    %433 = arith.mulf %424, %404 : vector<8x128xf32>
    %434 = arith.mulf %418, %426 : vector<8x128xf32>
    %435 = arith.addf %433, %434 : vector<8x128xf32>
    %436 = math.tanh %435 : vector<8x128xf32>
    %437 = arith.mulf %432, %436 : vector<8x128xf32>
    %c4_i32_134 = arith.constant 4 : i32
    %c8_i32_135 = arith.constant 8 : i32
    %438 = arith.muli %c4_i32_134, %c8_i32_135 : i32
    %439 = tpu.assume_multiple %438, 8 : i32
    %440 = arith.index_cast %439 : i32 to index
    %c0_136 = arith.constant 0 : index
    %441 = vector.load %arg16[%440, %c0_136] : memref<64x512xf32, #tpu.memory_space<vmem>>, vector<8x512xf32>
    %cst_137 = arith.constant dense<0.000000e+00> : vector<8x512xf32>
    %442 = tpu.matmul %437, %305, %cst_137 {dimension_numbers = #tpu.dot_dimension_numbers<[1], [0], [0], [1], [0, 0, 1, 1], [], []>} : vector<8x128xf32>, vector<128x512xf32>, vector<8x512xf32> -> vector<8x512xf32>
    %443 = arith.addf %441, %442 : vector<8x512xf32>
    %444 = vector.extract_strided_slice %443 {offsets = [0, 0], sizes = [8, 128], strides = [1, 1]} : vector<8x512xf32> to vector<8x128xf32>
    %445 = arith.negf %444 : vector<8x128xf32>
    %446 = math.exp %445 : vector<8x128xf32>
    %cst_138 = arith.constant 1.000000e+00 : f32
    %447 = vector.broadcast %cst_138 : f32 to vector<8x128xf32>
    %448 = arith.addf %447, %446 : vector<8x128xf32>
    %449 = arith.divf %447, %448 : vector<8x128xf32>
    %450 = vector.extract_strided_slice %443 {offsets = [0, 128], sizes = [8, 128], strides = [1, 1]} : vector<8x512xf32> to vector<8x128xf32>
    %451 = arith.negf %450 : vector<8x128xf32>
    %452 = math.exp %451 : vector<8x128xf32>
    %cst_139 = arith.constant 1.000000e+00 : f32
    %453 = vector.broadcast %cst_139 : f32 to vector<8x128xf32>
    %454 = arith.addf %453, %452 : vector<8x128xf32>
    %455 = arith.divf %453, %454 : vector<8x128xf32>
    %456 = vector.extract_strided_slice %443 {offsets = [0, 256], sizes = [8, 128], strides = [1, 1]} : vector<8x512xf32> to vector<8x128xf32>
    %457 = math.tanh %456 : vector<8x128xf32>
    %458 = vector.extract_strided_slice %443 {offsets = [0, 384], sizes = [8, 128], strides = [1, 1]} : vector<8x512xf32> to vector<8x128xf32>
    %459 = arith.negf %458 : vector<8x128xf32>
    %460 = math.exp %459 : vector<8x128xf32>
    %cst_140 = arith.constant 1.000000e+00 : f32
    %461 = vector.broadcast %cst_140 : f32 to vector<8x128xf32>
    %462 = arith.addf %461, %460 : vector<8x128xf32>
    %463 = arith.divf %461, %462 : vector<8x128xf32>
    %464 = arith.mulf %455, %435 : vector<8x128xf32>
    %465 = arith.mulf %449, %457 : vector<8x128xf32>
    %466 = arith.addf %464, %465 : vector<8x128xf32>
    %467 = math.tanh %466 : vector<8x128xf32>
    %468 = arith.mulf %463, %467 : vector<8x128xf32>
    %c5_i32_141 = arith.constant 5 : i32
    %c8_i32_142 = arith.constant 8 : i32
    %469 = arith.muli %c5_i32_141, %c8_i32_142 : i32
    %470 = tpu.assume_multiple %469, 8 : i32
    %471 = arith.index_cast %470 : i32 to index
    %c0_143 = arith.constant 0 : index
    %472 = vector.load %arg16[%471, %c0_143] : memref<64x512xf32, #tpu.memory_space<vmem>>, vector<8x512xf32>
    %cst_144 = arith.constant dense<0.000000e+00> : vector<8x512xf32>
    %473 = tpu.matmul %468, %305, %cst_144 {dimension_numbers = #tpu.dot_dimension_numbers<[1], [0], [0], [1], [0, 0, 1, 1], [], []>} : vector<8x128xf32>, vector<128x512xf32>, vector<8x512xf32> -> vector<8x512xf32>
    %474 = arith.addf %472, %473 : vector<8x512xf32>
    %475 = vector.extract_strided_slice %474 {offsets = [0, 0], sizes = [8, 128], strides = [1, 1]} : vector<8x512xf32> to vector<8x128xf32>
    %476 = arith.negf %475 : vector<8x128xf32>
    %477 = math.exp %476 : vector<8x128xf32>
    %cst_145 = arith.constant 1.000000e+00 : f32
    %478 = vector.broadcast %cst_145 : f32 to vector<8x128xf32>
    %479 = arith.addf %478, %477 : vector<8x128xf32>
    %480 = arith.divf %478, %479 : vector<8x128xf32>
    %481 = vector.extract_strided_slice %474 {offsets = [0, 128], sizes = [8, 128], strides = [1, 1]} : vector<8x512xf32> to vector<8x128xf32>
    %482 = arith.negf %481 : vector<8x128xf32>
    %483 = math.exp %482 : vector<8x128xf32>
    %cst_146 = arith.constant 1.000000e+00 : f32
    %484 = vector.broadcast %cst_146 : f32 to vector<8x128xf32>
    %485 = arith.addf %484, %483 : vector<8x128xf32>
    %486 = arith.divf %484, %485 : vector<8x128xf32>
    %487 = vector.extract_strided_slice %474 {offsets = [0, 256], sizes = [8, 128], strides = [1, 1]} : vector<8x512xf32> to vector<8x128xf32>
    %488 = math.tanh %487 : vector<8x128xf32>
    %489 = vector.extract_strided_slice %474 {offsets = [0, 384], sizes = [8, 128], strides = [1, 1]} : vector<8x512xf32> to vector<8x128xf32>
    %490 = arith.negf %489 : vector<8x128xf32>
    %491 = math.exp %490 : vector<8x128xf32>
    %cst_147 = arith.constant 1.000000e+00 : f32
    %492 = vector.broadcast %cst_147 : f32 to vector<8x128xf32>
    %493 = arith.addf %492, %491 : vector<8x128xf32>
    %494 = arith.divf %492, %493 : vector<8x128xf32>
    %495 = arith.mulf %486, %466 : vector<8x128xf32>
    %496 = arith.mulf %480, %488 : vector<8x128xf32>
    %497 = arith.addf %495, %496 : vector<8x128xf32>
    %498 = math.tanh %497 : vector<8x128xf32>
    %499 = arith.mulf %494, %498 : vector<8x128xf32>
    %c6_i32_148 = arith.constant 6 : i32
    %c8_i32_149 = arith.constant 8 : i32
    %500 = arith.muli %c6_i32_148, %c8_i32_149 : i32
    %501 = tpu.assume_multiple %500, 8 : i32
    %502 = arith.index_cast %501 : i32 to index
    %c0_150 = arith.constant 0 : index
    %503 = vector.load %arg16[%502, %c0_150] : memref<64x512xf32, #tpu.memory_space<vmem>>, vector<8x512xf32>
    %cst_151 = arith.constant dense<0.000000e+00> : vector<8x512xf32>
    %504 = tpu.matmul %499, %305, %cst_151 {dimension_numbers = #tpu.dot_dimension_numbers<[1], [0], [0], [1], [0, 0, 1, 1], [], []>} : vector<8x128xf32>, vector<128x512xf32>, vector<8x512xf32> -> vector<8x512xf32>
    %505 = arith.addf %503, %504 : vector<8x512xf32>
    %506 = vector.extract_strided_slice %505 {offsets = [0, 0], sizes = [8, 128], strides = [1, 1]} : vector<8x512xf32> to vector<8x128xf32>
    %507 = arith.negf %506 : vector<8x128xf32>
    %508 = math.exp %507 : vector<8x128xf32>
    %cst_152 = arith.constant 1.000000e+00 : f32
    %509 = vector.broadcast %cst_152 : f32 to vector<8x128xf32>
    %510 = arith.addf %509, %508 : vector<8x128xf32>
    %511 = arith.divf %509, %510 : vector<8x128xf32>
    %512 = vector.extract_strided_slice %505 {offsets = [0, 128], sizes = [8, 128], strides = [1, 1]} : vector<8x512xf32> to vector<8x128xf32>
    %513 = arith.negf %512 : vector<8x128xf32>
    %514 = math.exp %513 : vector<8x128xf32>
    %cst_153 = arith.constant 1.000000e+00 : f32
    %515 = vector.broadcast %cst_153 : f32 to vector<8x128xf32>
    %516 = arith.addf %515, %514 : vector<8x128xf32>
    %517 = arith.divf %515, %516 : vector<8x128xf32>
    %518 = vector.extract_strided_slice %505 {offsets = [0, 256], sizes = [8, 128], strides = [1, 1]} : vector<8x512xf32> to vector<8x128xf32>
    %519 = math.tanh %518 : vector<8x128xf32>
    %520 = vector.extract_strided_slice %505 {offsets = [0, 384], sizes = [8, 128], strides = [1, 1]} : vector<8x512xf32> to vector<8x128xf32>
    %521 = arith.negf %520 : vector<8x128xf32>
    %522 = math.exp %521 : vector<8x128xf32>
    %cst_154 = arith.constant 1.000000e+00 : f32
    %523 = vector.broadcast %cst_154 : f32 to vector<8x128xf32>
    %524 = arith.addf %523, %522 : vector<8x128xf32>
    %525 = arith.divf %523, %524 : vector<8x128xf32>
    %526 = arith.mulf %517, %497 : vector<8x128xf32>
    %527 = arith.mulf %511, %519 : vector<8x128xf32>
    %528 = arith.addf %526, %527 : vector<8x128xf32>
    %529 = math.tanh %528 : vector<8x128xf32>
    %530 = arith.mulf %525, %529 : vector<8x128xf32>
    %c7_i32_155 = arith.constant 7 : i32
    %c8_i32_156 = arith.constant 8 : i32
    %531 = arith.muli %c7_i32_155, %c8_i32_156 : i32
    %532 = tpu.assume_multiple %531, 8 : i32
    %533 = arith.index_cast %532 : i32 to index
    %c0_157 = arith.constant 0 : index
    %534 = vector.load %arg16[%533, %c0_157] : memref<64x512xf32, #tpu.memory_space<vmem>>, vector<8x512xf32>
    %cst_158 = arith.constant dense<0.000000e+00> : vector<8x512xf32>
    %535 = tpu.matmul %530, %305, %cst_158 {dimension_numbers = #tpu.dot_dimension_numbers<[1], [0], [0], [1], [0, 0, 1, 1], [], []>} : vector<8x128xf32>, vector<128x512xf32>, vector<8x512xf32> -> vector<8x512xf32>
    %536 = arith.addf %534, %535 : vector<8x512xf32>
    %537 = vector.extract_strided_slice %536 {offsets = [0, 0], sizes = [8, 128], strides = [1, 1]} : vector<8x512xf32> to vector<8x128xf32>
    %538 = arith.negf %537 : vector<8x128xf32>
    %539 = math.exp %538 : vector<8x128xf32>
    %cst_159 = arith.constant 1.000000e+00 : f32
    %540 = vector.broadcast %cst_159 : f32 to vector<8x128xf32>
    %541 = arith.addf %540, %539 : vector<8x128xf32>
    %542 = arith.divf %540, %541 : vector<8x128xf32>
    %543 = vector.extract_strided_slice %536 {offsets = [0, 128], sizes = [8, 128], strides = [1, 1]} : vector<8x512xf32> to vector<8x128xf32>
    %544 = arith.negf %543 : vector<8x128xf32>
    %545 = math.exp %544 : vector<8x128xf32>
    %cst_160 = arith.constant 1.000000e+00 : f32
    %546 = vector.broadcast %cst_160 : f32 to vector<8x128xf32>
    %547 = arith.addf %546, %545 : vector<8x128xf32>
    %548 = arith.divf %546, %547 : vector<8x128xf32>
    %549 = vector.extract_strided_slice %536 {offsets = [0, 256], sizes = [8, 128], strides = [1, 1]} : vector<8x512xf32> to vector<8x128xf32>
    %550 = math.tanh %549 : vector<8x128xf32>
    %551 = vector.extract_strided_slice %536 {offsets = [0, 384], sizes = [8, 128], strides = [1, 1]} : vector<8x512xf32> to vector<8x128xf32>
    %552 = arith.negf %551 : vector<8x128xf32>
    %553 = math.exp %552 : vector<8x128xf32>
    %cst_161 = arith.constant 1.000000e+00 : f32
    %554 = vector.broadcast %cst_161 : f32 to vector<8x128xf32>
    %555 = arith.addf %554, %553 : vector<8x128xf32>
    %556 = arith.divf %554, %555 : vector<8x128xf32>
    %557 = arith.mulf %548, %528 : vector<8x128xf32>
    %558 = arith.mulf %542, %550 : vector<8x128xf32>
    %559 = arith.addf %557, %558 : vector<8x128xf32>
    %560 = math.tanh %559 : vector<8x128xf32>
    %561 = arith.mulf %556, %560 : vector<8x128xf32>
    %c8_i32_162 = arith.constant 8 : i32
    %c1 = arith.constant 1 : index
    %c0_163 = arith.constant 0 : index
    %c0_164 = arith.constant 0 : index
    %562 = vector.load %arg14[%c1, %c0_163, %c0_164] : memref<2x8x128xf32, #tpu.memory_space<vmem>>, vector<1x8x128xf32>
    %563 = vector.shape_cast %562 : vector<1x8x128xf32> to vector<8x128xf32>
    %564 = vector.shape_cast %561 : vector<8x128xf32> to vector<1x8x128xf32>
    tpu.vector_store %arg14[%c1, %c0_163, %c0_164], %564 {strides = array<i32>} : memref<2x8x128xf32, #tpu.memory_space<vmem>>, vector<1x8x128xf32>,
    %c1_165 = arith.constant 1 : index
    %c0_166 = arith.constant 0 : index
    %c0_167 = arith.constant 0 : index
    %565 = vector.load %arg15[%c1_165, %c0_166, %c0_167] : memref<2x8x128xf32, #tpu.memory_space<vmem>>, vector<1x8x128xf32>
    %566 = vector.shape_cast %565 : vector<1x8x128xf32> to vector<8x128xf32>
    %567 = vector.shape_cast %559 : vector<8x128xf32> to vector<1x8x128xf32>
    tpu.vector_store %arg15[%c1_165, %c0_166, %c0_167], %567 {strides = array<i32>} : memref<2x8x128xf32, #tpu.memory_space<vmem>>, vector<1x8x128xf32>,
    %c0_168 = arith.constant 0 : index
    %c0_169 = arith.constant 0 : index
    %568 = vector.load %arg11[%c0_168, %c0_169] : memref<128x128xf32, #tpu.memory_space<vmem>>, vector<128x128xf32>
    %cst_170 = arith.constant dense<0.000000e+00> : vector<8x128xf32>
    %569 = tpu.matmul %561, %568, %cst_170 {dimension_numbers = #tpu.dot_dimension_numbers<[1], [0], [0], [1], [0, 0, 1, 1], [], []>} : vector<8x128xf32>, vector<128x128xf32>, vector<8x128xf32> -> vector<8x128xf32>
    %c0_171 = arith.constant 0 : index
    %c0_172 = arith.constant 0 : index
    %570 = vector.load %arg12[%c0_171, %c0_172] : memref<1x128xf32, #tpu.memory_space<vmem>>, vector<1x128xf32>
    %571 = vector.broadcast %570 : vector<1x128xf32> to vector<8x128xf32>
    %572 = arith.addf %569, %571 : vector<8x128xf32>
    %c0_173 = arith.constant 0 : index
    %c0_174 = arith.constant 0 : index
    %573 = vector.load %arg13[%c0_173, %c0_174] : memref<8x128xf32, #tpu.memory_space<vmem>>, vector<8x128xf32>
    tpu.vector_store %arg13[%c0_173, %c0_174], %572 {strides = array<i32>} : memref<8x128xf32, #tpu.memory_space<vmem>>, vector<8x128xf32>,
    return
  }
}

</mosaic_0001>

<bundles_post_ra>
// kernel: _forward_impl.1
= control target key start
LH: loop header
LB: loop body
LE: loop exit
PB: predicated region body
PF: predicated region fallthrough
CT: control target
= control target key end

     0   :  { %21 = vsyncpa [#allocation5], 0  ;;  %s6662_s0 = inlined_call_operand.vmem [shape: f32[64,16], index: 0, kind: input, shape index: {}]   ;;  %s6663_s1 = inlined_call_operand.hbm [shape: f32[16,512], index: 1, kind: input, shape index: {}]   ;;  %s6664_s2 = inlined_call_operand.hbm [shape: f32[128,512], index: 2, kind: input, shape index: {}]   ;;  %s6665_s3 = inlined_call_operand.vmem [shape: f32[1,512], index: 3, kind: input, shape index: {}]   ;;  %s6666_s4 = inlined_call_operand.vmem [shape: f32[8,128], index: 4, kind: input, shape index: {}]   ;;  %s6667_s5 = inlined_call_operand.vmem [shape: f32[8,128], index: 5, kind: input, shape index: {}]   ;;  %s6668_s6 = inlined_call_operand.hbm [shape: f32[128,512], index: 6, kind: input, shape index: {}]   ;;  %s6669_s7 = inlined_call_operand.hbm [shape: f32[128,512], index: 7, kind: input, shape index: {}]   ;;  %s6670_s8 = inlined_call_operand.vmem [shape: f32[1,512], index: 8, kind: input, shape index: {}]   ;;  %s6671_s9 = inlined_call_operand.vmem [shape: f32[8,128], index: 9, kind: input, shape index: {}]   ;;  %s6672_s10 = inlined_call_operand.vmem [shape: f32[8,128], index: 10, kind: input, shape index: {}]   ;;  %s6673_s11 = inlined_call_operand.vmem [shape: f32[128,128], index: 11, kind: input, shape index: {}]   ;;  %s6674_s12 = inlined_call_operand.vmem [shape: f32[1,128], index: 12, kind: input, shape index: {}]   ;;  %s6675_s13 = inlined_call_operand.vmem [shape: f32[8,128], index: 13, kind: output, shape index: {0}]   ;;  %s6676_s14 = inlined_call_operand.vmem [shape: f32[2,8,128], index: 14, kind: output, shape index: {1}]   ;;  %s6677_s15 = inlined_call_operand.vmem [shape: f32[2,8,128], index: 15, kind: output, shape index: {2}]  }
   0x1   :  { %22 = vsyncpa [#allocation7], 0 }
   0x2   :  { %23 = vsyncpa [#allocation10], 0  ;;  %s4449_s18 = smov [#allocation6]   ;;  %s4450_s20 = smov [#allocation4]  }
   0x3   :  { %s43_s19 = sshll.u32 %s4449_s18, 4  ;;  %s31_s21 = sshll.u32 %s4450_s20, 4  ;;  %s44_s19 = int_to_ptr.vmem [resolvable:$true] %s43_s19  ;;  %s32_s21 = int_to_ptr.vmem [resolvable:$true] %s31_s21 }
   0x4   :  { %s4371_s22 = scalar_lea.vmem %s44_s19, 8192  ;;  %p4376_p1 = scmp.lt.s32.totalorder %s44_s19, %s44_s19 }
   0x5   :  { %p4372_p0 = scmp.ne.s32.totalorder %s44_s19, %s4371_s22  ;;  %p4377_p2 = scmp.lt.s32.totalorder %s4371_s22, %s4371_s22 }
   0x7   :  { %p4378_p3 = por %p4377_p2, %p4376_p1 }
   0x9   :  { %p4379_p4 = pnand %p4378_p3, %p4372_p0 }
   0xb   :  { %4382 = shalt.err (!%p4379_p4)
}
   0xc   :  { %s4451_s23 = smov 512   ;;  %s4452_s24 = smov 32  }
   0xd   :  { %49 = dma.hbm_to_vmem [thread:$0]  %s6664_s2, 8192, %s44_s19, [#allocation7], %s4451_s23, %s4451_s23, %s4452_s24  }
   0xe   :  { %s4391_s27 = scalar_lea.vmem %s32_s21, 1024  ;;  %p4396_p6 = scmp.lt.s32.totalorder %s32_s21, %s32_s21 }
   0xf   :  { %p4392_p5 = scmp.ne.s32.totalorder %s32_s21, %s4391_s27  ;;  %p4397_p7 = scmp.lt.s32.totalorder %s4391_s27, %s4391_s27 }
  0x11   :  { %p4398_p8 = por %p4397_p7, %p4396_p6 }
  0x13   :  { %p4399_p9 = pnand %p4398_p8, %p4392_p5 }
  0x15   :  { %4402 = shalt.err (!%p4399_p9)
}
  0x16   :  { %37 = dma.hbm_to_vmem [thread:$0]  %s6663_s1, 1024, %s32_s21, [#allocation5], %s4451_s23, %s4451_s23, %s4452_s24  }
  0x17   :  { %s4453_s30 = smov [#allocation8]   ;;  %s4454_s17 = smov [#allocation9]  }
  0x18   :  { %s61_s16 = sshll.u32 %s4453_s30, 4  ;;  %s73_s18 = sshll.u32 %s4454_s17, 4  ;;  %s62_s16 = int_to_ptr.vmem [resolvable:$true] %s61_s16  ;;  %s74_s18 = int_to_ptr.vmem [resolvable:$true] %s73_s18 }
  0x19   :  { %s4411_s2 = scalar_lea.vmem %s62_s16, 8192  ;;  %p4416_p11 = scmp.lt.s32.totalorder %s62_s16, %s62_s16 }
  0x1a   :  { %p4412_p10 = scmp.ne.s32.totalorder %s62_s16, %s4411_s2  ;;  %p4417_p12 = scmp.lt.s32.totalorder %s4411_s2, %s4411_s2 }
  0x1c   :  { %p4418_p13 = por %p4417_p12, %p4416_p11 }
  0x1e   :  { %p4419_p0 = pnand %p4418_p13, %p4412_p10 }
  0x20   :  { %4422 = shalt.err (!%p4419_p0)
}
  0x21   :  { %67 = dma.hbm_to_vmem [thread:$0]  %s6668_s6, 8192, %s62_s16, [#allocation7], %s4451_s23, %s4451_s23, %s4452_s24  }
  0x22   :  { %s4431_s1 = scalar_lea.vmem %s74_s18, 8192  ;;  %p4436_p2 = scmp.lt.s32.totalorder %s74_s18, %s74_s18 }
  0x23   :  { %p4432_p1 = scmp.ne.s32.totalorder %s74_s18, %s4431_s1  ;;  %p4437_p3 = scmp.lt.s32.totalorder %s4431_s1, %s4431_s1 }
  0x25   :  { %p4438_p4 = por %p4437_p3, %p4436_p2 }
  0x27   :  { %p4439_p5 = pnand %p4438_p4, %p4432_p1 }
  0x29   :  { %4442 = shalt.err (!%p4439_p5)
}
  0x2a   :  { %79 = dma.hbm_to_vmem [thread:$0]  %s6669_s7, 8192, %s74_s18, [#allocation10], %s4451_s23, %s4451_s23, %s4452_s24  }
  0x2b   :  { %4443 = dma.done.wait [#allocation5], 1024  }
  0x2c   :  { %4444 = vsyncadd [#allocation5], 4294966272 }
  0x2d   :  { %4445 = dma.done.wait [#allocation7], 16384  }
  0x2e   :  { %4446 = vsyncadd [#allocation7], 4294950912 }
  0x2f   :  { %4447 = dma.done.wait [#allocation10], 8192  }
  0x30   :  { %4448 = vsyncadd [#allocation10], 4294959104  ;;  %v6678_v0 = vmov 0.0   ;;  %v107_v1 = vld [vmem:[#allocation4 + $0x28] sm:$0xff]  ;;  %v109_v2 = vld [vmem:[#allocation4 + $0x38] sm:$0xff]  ;;  %vm206_vm0 = vcmask 130048  }
  0x31   :  { %295 = vmatprep.mubr.f32.mxu0 %v6678_v0  ;;  %408 = vmatprep.mubr.f32.mxu1 %v6678_v0  ;;  %v106_v3 = vld [vmem:[#allocation4 + $0x20] sm:$0xff]  ;;  %v108_v4 = vld [vmem:[#allocation4 + $0x30] sm:$0xff]  ;;  %v103_v5 = vld [vmem:[#allocation4 + $0x8] sm:$0xff]  ;;  %vm4456_vm1 = vmmov 0  }
  0x32   :  { %259 = vmatprep.subr.mxu0 %v107_v1  ;;  %372 = vmatprep.subr.mxu1 %v109_v2  ;;  %v105_v6 = vld [vmem:[#allocation4 + $0x18] sm:$0xff]  ;;  %v102_v7 = vld [vmem:[#allocation4] sm:$0xff]  ;;  %v104_v8 = vld [vmem:[#allocation4 + $0x10] sm:$0xff] }
  0x33   :  { %260 = vmatpush1.msra.mxu0 %v106_v3  ;;  %373 = vmatpush1.msra.mxu1 %v108_v4  ;;  %v177_v9 = vld [vmem:[%s6662_s0] sm:$0xff]  ;;  %v4566_v10 = vld [vmem:[#allocation6 + $0x1e8] sm:$0xff]  ;;  %v4568_v11 = vld [vmem:[#allocation6 + $0x1f8] sm:$0xff] }
  0x34   :  { %261 = vmatprep.subr.mxu0 %v103_v5  ;;  %374 = vmatprep.subr.mxu1 %v105_v6  ;;  %6882 = vst [vmem:[#allocation14_spill] sm:$0xff] %v4566_v10  ;;  %6883 = vst [vmem:[#allocation15_spill] sm:$0xff] %v4568_v11  ;;  %v4570_v12 = vld [vmem:[#allocation6 + $0x1e0] sm:$0xff]  ;;  %v4572_v13 = vld [vmem:[#allocation6 + $0x1f0] sm:$0xff] }
  0x35   :  { %262 = vmatpush1.msra.mxu0 %v102_v7  ;;  %375 = vmatpush1.msra.mxu1 %v104_v8  ;;  %v4576_v14 = vld [vmem:[#allocation6 + $0x1c8] sm:$0xff]  ;;  %v4578_v15 = vld [vmem:[#allocation6 + $0x1d8] sm:$0xff]  ;;  %v4584_v16 = vld [vmem:[#allocation6 + $0x1c0] sm:$0xff] }
  0x36   :  { %3852 = vmatmul.mubr.msk.f32.vlgmr.msra.gmra.mxu0 %vm206_vm0, %v177_v9  ;;  %3860 = vmatmul.mubr.msk.f32.vlgmr.msra.gmra.mxu1 %vm206_vm0, %v177_v9  ;;  %v4586_v17 = vld [vmem:[#allocation6 + $0x1d0] sm:$0xff]  ;;  %v178_v18 = vld [vmem:[%s6662_s0 + $0x8] sm:$0xff]  ;;  %v4597_v20 = vld [vmem:[#allocation6 + $0x1b8] sm:$0xff] }
  0x37   :  { %496 = vmatprep.subr.mxu0 %v4566_v10  ;;  %567 = vmatprep.subr.mxu1 %v4568_v11  ;;  %v4595_v19 = vld [vmem:[#allocation6 + $0x1a8] sm:$0xff]  ;;  %v4601_v21 = vld [vmem:[#allocation6 + $0x1a0] sm:$0xff]  ;;  %v4603_v22 = vld [vmem:[#allocation6 + $0x1b0] sm:$0xff] }
  0x38   :  { %497 = vmatpush1.msra.mxu0 %v4570_v12  ;;  %568 = vmatpush1.msra.mxu1 %v4572_v13  ;;  %v4607_v23 = vld [vmem:[#allocation6 + $0x188] sm:$0xff]  ;;  %v4609_v24 = vld [vmem:[#allocation6 + $0x198] sm:$0xff]  ;;  %v4615_v25 = vld [vmem:[#allocation6 + $0x180] sm:$0xff] }
  0x39   :  { %498 = vmatprep.subr.mxu0 %v4576_v14  ;;  %569 = vmatprep.subr.mxu1 %v4578_v15  ;;  %v4617_v26 = vld [vmem:[#allocation6 + $0x190] sm:$0xff]  ;;  %v4626_v28 = vld [vmem:[#allocation6 + $0x168] sm:$0xff]  ;;  %v4628_v29 = vld [vmem:[#allocation6 + $0x178] sm:$0xff] }
  0x3a   :  { %301 = vmatprep.mubr.f32.mxu0 %v6678_v0  ;;  %414 = vmatprep.mubr.f32.mxu1 %v6678_v0  ;;  %v179_v27 = vld [vmem:[%s6662_s0 + $0x10] sm:$0xff]  ;;  %v4632_v30 = vld [vmem:[#allocation6 + $0x160] sm:$0xff]  ;;  %v4638_v32 = vld [vmem:[#allocation6 + $0x148] sm:$0xff] }
  0x3b   :  { %499 = vmatpush1.msra.mxu0 %v4584_v16  ;;  %570 = vmatpush1.msra.mxu1 %v4586_v17  ;;  %v4634_v31 = vld [vmem:[#allocation6 + $0x170] sm:$0xff]  ;;  %v4640_v33 = vld [vmem:[#allocation6 + $0x158] sm:$0xff]  ;;  %v4646_v34 = vld [vmem:[#allocation6 + $0x140] sm:$0xff] }
  0x3c   :  { %3853 = vmatmul.mubr.msk.f32.gmra.mxu0 %vm206_vm0, %v178_v18  ;;  %3861 = vmatmul.mubr.msk.f32.gmra.mxu1 %vm206_vm0, %v178_v18  ;;  %v4648_v35 = vld [vmem:[#allocation6 + $0x150] sm:$0xff]  ;;  %v180_v36 = vld [vmem:[%s6662_s0 + $0x18] sm:$0xff]  ;;  %v4657_v37 = vld [vmem:[#allocation6 + $0x128] sm:$0xff] }
  0x3d   :  { %500 = vmatprep.subr.mxu0 %v4595_v19  ;;  %571 = vmatprep.subr.mxu1 %v4597_v20  ;;  %v4659_v38 = vld [vmem:[#allocation6 + $0x138] sm:$0xff]  ;;  %v4663_v39 = vld [vmem:[#allocation6 + $0x120] sm:$0xff]  ;;  %v4665_v40 = vld [vmem:[#allocation6 + $0x130] sm:$0xff] }
  0x3e   :  { %501 = vmatpush1.msra.mxu0 %v4601_v21  ;;  %572 = vmatpush1.msra.mxu1 %v4603_v22  ;;  %v4669_v41 = vld [vmem:[#allocation6 + $0x108] sm:$0xff]  ;;  %v4671_v42 = vld [vmem:[#allocation6 + $0x118] sm:$0xff]  ;;  %v4677_v43 = vld [vmem:[#allocation6 + $0x100] sm:$0xff] }
  0x3f   :  { %502 = vmatprep.subr.mxu0 %v4607_v23  ;;  %573 = vmatprep.subr.mxu1 %v4609_v24  ;;  %v4679_v44 = vld [vmem:[#allocation6 + $0x110] sm:$0xff]  ;;  %v181_v45 = vld [vmem:[%s6662_s0 + $0x20] sm:$0xff]  ;;  %v4688_v46 = vld [vmem:[#allocation6 + $0xe8] sm:$0xff] }
  0x40   :  { %307 = vmatprep.mubr.f32.mxu0 %v6678_v0  ;;  %420 = vmatprep.mubr.f32.mxu1 %v6678_v0  ;;  %v4690_v47 = vld [vmem:[#allocation6 + $0xf8] sm:$0xff]  ;;  %v4694_v48 = vld [vmem:[#allocation6 + $0xe0] sm:$0xff]  ;;  %v4696_v49 = vld [vmem:[#allocation6 + $0xf0] sm:$0xff] }
  0x41   :  { %503 = vmatpush1.msra.mxu0 %v4615_v25  ;;  %574 = vmatpush1.msra.mxu1 %v4617_v26  ;;  %v4700_v50 = vld [vmem:[#allocation6 + $0xc8] sm:$0xff]  ;;  %v4702_v51 = vld [vmem:[#allocation6 + $0xd8] sm:$0xff]  ;;  %v4708_v52 = vld [vmem:[#allocation6 + $0xc0] sm:$0xff] }
  0x42   :  { %3854 = vmatmul.mubr.msk.f32.gmra.mxu0 %vm206_vm0, %v179_v27  ;;  %3862 = vmatmul.mubr.msk.f32.gmra.mxu1 %vm206_vm0, %v179_v27  ;;  %v4710_v53 = vld [vmem:[#allocation6 + $0xd0] sm:$0xff]  ;;  %v182_v54 = vld [vmem:[%s6662_s0 + $0x28] sm:$0xff]  ;;  %v4721_v56 = vld [vmem:[#allocation6 + $0xb8] sm:$0xff] }
  0x43   :  { %504 = vmatprep.subr.mxu0 %v4626_v28  ;;  %575 = vmatprep.subr.mxu1 %v4628_v29  ;;  %v4719_v55 = vld [vmem:[#allocation6 + $0xa8] sm:$0xff]  ;;  %v4725_v57 = vld [vmem:[#allocation6 + $0xa0] sm:$0xff]  ;;  %v4727_v58 = vld [vmem:[#allocation6 + $0xb0] sm:$0xff] }
  0x44   :  { %505 = vmatpush1.msra.mxu0 %v4632_v30  ;;  %576 = vmatpush1.msra.mxu1 %v4634_v31  ;;  %6884 = vst [vmem:[#allocation16_spill] sm:$0xff] %v4727_v58  ;;  %v4731_v59 = vld [vmem:[#allocation6 + $0x88] sm:$0xff]  ;;  %v4733_v60 = vld [vmem:[#allocation6 + $0x98] sm:$0xff]  ;;  %v4739_v61 = vld [vmem:[#allocation6 + $0x80] sm:$0xff] }
  0x45   :  { %506 = vmatprep.subr.mxu0 %v4638_v32  ;;  %577 = vmatprep.subr.mxu1 %v4640_v33  ;;  %6885 = vst [vmem:[#allocation17_spill] sm:$0xff] %v4731_v59  ;;  %6886 = vst [vmem:[#allocation18_spill] sm:$0xff] %v4733_v60  ;;  %v4741_v62 = vld [vmem:[#allocation6 + $0x90] sm:$0xff]  ;;  %v4750_v1 = vld [vmem:[#allocation6 + $0x68] sm:$0xff] }
  0x46   :  { %313 = vmatprep.mubr.f32.mxu0 %v6678_v0  ;;  %426 = vmatprep.mubr.f32.mxu1 %v6678_v0  ;;  %6887 = vst [vmem:[#allocation19_spill] sm:$0xff] %v4739_v61  ;;  %6888 = vst [vmem:[#allocation20_spill] sm:$0xff] %v4741_v62  ;;  %v183_v63 = vld [vmem:[%s6662_s0 + $0x30] sm:$0xff]  ;;  %v4752_v2 = vld [vmem:[#allocation6 + $0x78] sm:$0xff] }
  0x47   :  { %507 = vmatpush1.msra.mxu0 %v4646_v34  ;;  %578 = vmatpush1.msra.mxu1 %v4648_v35  ;;  %6889 = vst [vmem:[#allocation21_spill] sm:$0xff] %v4750_v1  ;;  %6890 = vst [vmem:[#allocation22_spill] sm:$0xff] %v4752_v2  ;;  %v4756_v3 = vld [vmem:[#allocation6 + $0x60] sm:$0xff]  ;;  %v4758_v4 = vld [vmem:[#allocation6 + $0x70] sm:$0xff] }
  0x48   :  { %3855 = vmatmul.mubr.msk.f32.gmra.mxu0 %vm206_vm0, %v180_v36  ;;  %3863 = vmatmul.mubr.msk.f32.gmra.mxu1 %vm206_vm0, %v180_v36  ;;  %6891 = vst [vmem:[#allocation23_spill] sm:$0xff] %v4756_v3  ;;  %6892 = vst [vmem:[#allocation24_spill] sm:$0xff] %v4758_v4  ;;  %v4762_v5 = vld [vmem:[#allocation6 + $0x48] sm:$0xff]  ;;  %v4764_v6 = vld [vmem:[#allocation6 + $0x58] sm:$0xff] }
  0x49   :  { %508 = vmatprep.subr.mxu0 %v4657_v37  ;;  %579 = vmatprep.subr.mxu1 %v4659_v38  ;;  %6893 = vst [vmem:[#allocation25_spill] sm:$0xff] %v4762_v5  ;;  %6894 = vst [vmem:[#allocation26_spill] sm:$0xff] %v4764_v6  ;;  %v4770_v7 = vld [vmem:[#allocation6 + $0x40] sm:$0xff]  ;;  %v4772_v8 = vld [vmem:[#allocation6 + $0x50] sm:$0xff] }
  0x4a   :  { %509 = vmatpush1.msra.mxu0 %v4663_v39  ;;  %580 = vmatpush1.msra.mxu1 %v4665_v40  ;;  %6895 = vst [vmem:[#allocation27_spill] sm:$0xff] %v4770_v7  ;;  %6896 = vst [vmem:[#allocation28_spill] sm:$0xff] %v4772_v8  ;;  %v184_v9 = vld [vmem:[%s6662_s0 + $0x38] sm:$0xff]  ;;  %v4781_v18 = vld [vmem:[#allocation6 + $0x28] sm:$0xff] }
  0x4b   :  { %510 = vmatprep.subr.mxu0 %v4669_v41  ;;  %581 = vmatprep.subr.mxu1 %v4671_v42  ;;  %6897 = vst [vmem:[#allocation29_spill] sm:$0xff] %v4781_v18  ;;  %v4783_v27 = vld [vmem:[#allocation6 + $0x38] sm:$0xff]  ;;  %v4787_v36 = vld [vmem:[#allocation6 + $0x20] sm:$0xff] }
  0x4c   :  { %319 = vmatprep.mubr.f32.mxu0 %v6678_v0  ;;  %432 = vmatprep.mubr.f32.mxu1 %v6678_v0  ;;  %6898 = vst [vmem:[#allocation30_spill] sm:$0xff] %v4783_v27  ;;  %6899 = vst [vmem:[#allocation31_spill] sm:$0xff] %v4787_v36 }
  0x4d   :  { %511 = vmatpush1.msra.mxu0 %v4677_v43  ;;  %582 = vmatpush1.msra.mxu1 %v4679_v44 }
  0x4e   :  { %3856 = vmatmul.mubr.msk.f32.gmra.mxu0 %vm206_vm0, %v181_v45  ;;  %3864 = vmatmul.mubr.msk.f32.gmra.mxu1 %vm206_vm0, %v181_v45  ;;  %v4789_v45 = vld [vmem:[#allocation6 + $0x30] sm:$0xff] }
  0x4f   :  { %512 = vmatprep.subr.mxu0 %v4688_v46  ;;  %583 = vmatprep.subr.mxu1 %v4690_v47  ;;  %6900 = vst [vmem:[#allocation32_spill] sm:$0xff] %v4789_v45 }
  0x50   :  { %513 = vmatpush1.msra.mxu0 %v4694_v48  ;;  %584 = vmatpush1.msra.mxu1 %v4696_v49 }
  0x51   :  { %514 = vmatprep.subr.mxu0 %v4700_v50  ;;  %585 = vmatprep.subr.mxu1 %v4702_v51 }
  0x52   :  { %325 = vmatprep.mubr.f32.mxu0 %v6678_v0  ;;  %438 = vmatprep.mubr.f32.mxu1 %v6678_v0 }
  0x53   :  { %515 = vmatpush1.msra.mxu0 %v4708_v52  ;;  %586 = vmatpush1.msra.mxu1 %v4710_v53 }
  0x54   :  { %3857 = vmatmul.mubr.msk.f32.gmra.mxu0 %vm206_vm0, %v182_v54  ;;  %3865 = vmatmul.mubr.msk.f32.gmra.mxu1 %vm206_vm0, %v182_v54  ;;  %v4793_v54 = vld [vmem:[#allocation6 + $0x8] sm:$0xff] }
  0x55   :  { %516 = vmatprep.subr.mxu0 %v4719_v55  ;;  %587 = vmatprep.subr.mxu1 %v4721_v56  ;;  %6901 = vst [vmem:[#allocation33_spill] sm:$0xff] %v4793_v54 }
  0x56   :  { %517 = vmatpush1.msra.mxu0 %v4725_v57  ;;  %588 = vmatpush1.msra.mxu1 %v4727_v58 }
  0x57   :  { %518 = vmatprep.subr.mxu0 %v4731_v59  ;;  %589 = vmatprep.subr.mxu1 %v4733_v60 }
  0x58   :  { %331 = vmatprep.mubr.f32.mxu0 %v6678_v0  ;;  %444 = vmatprep.mubr.f32.mxu1 %v6678_v0 }
  0x59   :  { %519 = vmatpush1.msra.mxu0 %v4739_v61  ;;  %590 = vmatpush1.msra.mxu1 %v4741_v62 }
  0x5a   :  { %3858 = vmatmul.mubr.msk.f32.gmra.mxu0 %vm206_vm0, %v183_v63  ;;  %3866 = vmatmul.mubr.msk.f32.gmra.mxu1 %vm206_vm0, %v183_v63  ;;  %v4795_v63 = vld [vmem:[#allocation6 + $0x18] sm:$0xff] }
  0x5b   :  { %520 = vmatprep.subr.mxu0 %v4750_v1  ;;  %591 = vmatprep.subr.mxu1 %v4752_v2  ;;  %6902 = vst [vmem:[#allocation34_spill] sm:$0xff] %v4795_v63 }
  0x5c   :  { %521 = vmatpush1.msra.mxu0 %v4756_v3  ;;  %592 = vmatpush1.msra.mxu1 %v4758_v4 }
  0x5d   :  { %522 = vmatprep.subr.mxu0 %v4762_v5  ;;  %593 = vmatprep.subr.mxu1 %v4764_v6 }
  0x5e   :  { %337 = vmatprep.mubr.f32.mxu0 %v6678_v0  ;;  %450 = vmatprep.mubr.f32.mxu1 %v6678_v0  ;;  %v4799_v0 = vld [vmem:[#allocation6] sm:$0xff] }
  0x5f   :  { %523 = vmatpush1.msra.mxu0 %v4770_v7  ;;  %594 = vmatpush1.msra.mxu1 %v4772_v8  ;;  %6903 = vst [vmem:[#allocation35_spill] sm:$0xff] %v4799_v0  ;;  %v4803_v8 = vld [vmem:[#allocation6 + $0x10] sm:$0xff] }
  0x60   :  { %3859 = vmatmul.mubr.msk.f32.gmra.mxu0 %vm206_vm0, %v184_v9  ;;  %3867 = vmatmul.mubr.msk.f32.gmra.mxu1 %vm206_vm0, %v184_v9  ;;  %6904 = vst [vmem:[#allocation36_spill] sm:$0xff] %v4803_v8  ;;  %v175_v9 = vld [vmem:[%s6666_s4] sm:$0xff] }
  0x61   :  { %524 = vmatprep.subr.mxu0 %v4781_v18  ;;  %595 = vmatprep.subr.mxu1 %v4783_v27  ;;  %v6905_v18 = vmov 0.0  }
  0x62   :  { %525 = vmatpush1.msra.mxu0 %v4787_v36  ;;  %596 = vmatpush1.msra.mxu1 %v4789_v45 }
  0x63   :  { %526 = vmatprep.subr.mxu0 %v4793_v54  ;;  %597 = vmatprep.subr.mxu1 %v4795_v63 }
  0x64   :  { %527 = vmatpush1.msra.mxu0 %v4799_v0  ;;  %560 = vmatprep.mubr.f32.mxu0 %v6905_v18 }
  0x65   :  { %598 = vmatpush1.msra.mxu1 %v4803_v8  ;;  %631 = vmatprep.mubr.f32.mxu1 %v6905_v18 }
  0x66   :  { %561 = vmatmul.mubr.f32.vlgmr.msra.gmra.mxu0 %v175_v9  ;;  %632 = vmatmul.mubr.f32.vlgmr.msra.gmra.mxu1 %v175_v9  ;;  %v6906_v9 = vld [vmem:[#allocation28_spill] sm:$0xff] }
  0x67   :  { %674 = vmatprep.subr.mxu0 %v4566_v10  ;;  %745 = vmatprep.subr.mxu1 %v4568_v11 }
  0x68   :  { %675 = vmatpush1.msra.mxu0 %v4570_v12  ;;  %746 = vmatpush1.msra.mxu1 %v4572_v13 }
  0x69   :  { %676 = vmatprep.subr.mxu0 %v4576_v14  ;;  %747 = vmatprep.subr.mxu1 %v4578_v15 }
  0x6a   :  { %677 = vmatpush1.msra.mxu0 %v4584_v16  ;;  %748 = vmatpush1.msra.mxu1 %v4586_v17 }
  0x6b   :  { %678 = vmatprep.subr.mxu0 %v4595_v19  ;;  %749 = vmatprep.subr.mxu1 %v4597_v20 }
  0x6c   :  { %679 = vmatpush1.msra.mxu0 %v4601_v21  ;;  %750 = vmatpush1.msra.mxu1 %v4603_v22 }
  0x6d   :  { %680 = vmatprep.subr.mxu0 %v4607_v23  ;;  %751 = vmatprep.subr.mxu1 %v4609_v24 }
  0x6e   :  { %681 = vmatpush1.msra.mxu0 %v4615_v25  ;;  %752 = vmatpush1.msra.mxu1 %v4617_v26 }
  0x6f   :  { %682 = vmatprep.subr.mxu0 %v4626_v28  ;;  %753 = vmatprep.subr.mxu1 %v4628_v29 }
  0x70   :  { %683 = vmatpush1.msra.mxu0 %v4632_v30  ;;  %754 = vmatpush1.msra.mxu1 %v4634_v31 }
  0x71   :  { %684 = vmatprep.subr.mxu0 %v4638_v32  ;;  %755 = vmatprep.subr.mxu1 %v4640_v33 }
  0x72   :  { %685 = vmatpush1.msra.mxu0 %v4646_v34  ;;  %756 = vmatpush1.msra.mxu1 %v4648_v35 }
  0x73   :  { %686 = vmatprep.subr.mxu0 %v4657_v37  ;;  %757 = vmatprep.subr.mxu1 %v4659_v38 }
  0x74   :  { %687 = vmatpush1.msra.mxu0 %v4663_v39  ;;  %758 = vmatpush1.msra.mxu1 %v4665_v40 }
  0x75   :  { %688 = vmatprep.subr.mxu0 %v4669_v41  ;;  %759 = vmatprep.subr.mxu1 %v4671_v42 }
  0x76   :  { %689 = vmatpush1.msra.mxu0 %v4677_v43  ;;  %760 = vmatpush1.msra.mxu1 %v4679_v44 }
  0x77   :  { %690 = vmatprep.subr.mxu0 %v4688_v46  ;;  %761 = vmatprep.subr.mxu1 %v4690_v47 }
  0x78   :  { %691 = vmatpush1.msra.mxu0 %v4694_v48  ;;  %762 = vmatpush1.msra.mxu1 %v4696_v49 }
  0x79   :  { %692 = vmatprep.subr.mxu0 %v4700_v50  ;;  %763 = vmatprep.subr.mxu1 %v4702_v51 }
  0x7a   :  { %693 = vmatpush1.msra.mxu0 %v4708_v52  ;;  %764 = vmatpush1.msra.mxu1 %v4710_v53 }
  0x7b   :  { %694 = vmatprep.subr.mxu0 %v4719_v55  ;;  %765 = vmatprep.subr.mxu1 %v4721_v56 }
  0x7c   :  { %695 = vmatpush1.msra.mxu0 %v4725_v57  ;;  %766 = vmatpush1.msra.mxu1 %v4727_v58 }
  0x7d   :  { %696 = vmatprep.subr.mxu0 %v4731_v59  ;;  %767 = vmatprep.subr.mxu1 %v4733_v60  ;;  %v6907_v60 = vld [vmem:[#allocation29_spill] sm:$0xff] }
  0x7e   :  { %697 = vmatpush1.msra.mxu0 %v4739_v61  ;;  %768 = vmatpush1.msra.mxu1 %v4741_v62 }
  0x7f   :  { %698 = vmatprep.subr.mxu0 %v4750_v1  ;;  %769 = vmatprep.subr.mxu1 %v4752_v2 }
  0x80   :  { %699 = vmatpush1.msra.mxu0 %v4756_v3  ;;  %770 = vmatpush1.msra.mxu1 %v4758_v4 }
  0x81   :  { %700 = vmatprep.subr.mxu0 %v4762_v5  ;;  %771 = vmatprep.subr.mxu1 %v4764_v6 }
  0x82   :  { %701 = vmatpush1.msra.mxu0 %v4770_v7  ;;  %772 = vmatpush1.msra.mxu1 %v6906_v9 }
  0x83   :  { %702 = vmatprep.subr.mxu0 %v6907_v60  ;;  %773 = vmatprep.subr.mxu1 %v4783_v27  ;;  %v186_v27 = vlaneseq }
  0x84   :  { %703 = vmatpush1.msra.mxu0 %v4787_v36  ;;  %774 = vmatpush1.msra.mxu1 %v4789_v45 }
  0x85   :  { %704 = vmatprep.subr.mxu0 %v4793_v54  ;;  %775 = vmatprep.subr.mxu1 %v4795_v63  ;;  %v4882_v36 = vshrl.u32 %v186_v27, 7 }
  0x86   :  { %705 = vmatpush1.msra.mxu0 %v4799_v0  ;;  %738 = vmatprep.mubr.f32.mxu0 %v6905_v18 }
  0x87   :  { %776 = vmatpush1.msra.mxu1 %v4803_v8  ;;  %809 = vmatprep.mubr.f32.mxu1 %v6905_v18  ;;  %6908 = vst [vmem:[#allocation37_spill] sm:$0xff] %v4882_v36  ;;  %v6717_v63 = vsub.s32 0, %v4882_v36  ;;  %v6720_v0 = vsub.s32 2, %v4882_v36  ;;  %v174_v8 = vld [vmem:[%s6665_s3] sm:$0xf]  ;;  %v6728_v27 = vsub.s32 3, %v4882_v36 }
  0x88   :  { %853 = vmatprep.subr.mxu0 %v4566_v10  ;;  %924 = vmatprep.subr.mxu1 %v4568_v11  ;;  %v6727_v11 = vsub.s32 1, %v4882_v36 }
  0x89   :  { %v189_v60 = vrot.slane %v174_v8, %v6717_v63  ;;  %v4903_v9 = vrot.slane %v174_v8, %v6720_v0  ;;  %v4909_v4 = vrot.slane %v174_v8, %v6728_v27 }
  0x8a   :  { %v193_v5 = vrot.slane %v174_v8, %v6727_v11 }
  0xf6   :  { %v4884_v45 = vpop.f32.mrf.mxu0  ;;  %v4886_v54 = vpop.f32.mrf.mxu1 }
  0xf8   :  { %v4893_v18 = vpop.f32.mrf.mxu0  ;;  %v4895_v10 = vpop.f32.mrf.mxu1 }
  0xfc   :  { %v303_v7 = vpop.f32.mrf.mxu0  ;;  %v416_v6 = vpop.f32.mrf.mxu1 }
  0xfd   :  { %v4911_v3 = vadd.f32 %v303_v7, %v189_v60  ;;  %v4914_v2 = vadd.f32 %v416_v6, %v4903_v9 }
  0xfe   :  { %v305_v1 = vpop.f32.mrf.mxu0  ;;  %v418_v63 = vpop.f32.mrf.mxu1 }
  0xff   :  { %6909 = vst [vmem:[#allocation38_spill] sm:$0xff] %v4914_v2  ;;  %v4916_v62 = vadd.f32 %v305_v1, %v193_v5  ;;  %v4919_v0 = vadd.f32 %v418_v63, %v4909_v4 }
 0x101   :  { %6910 = vst [vmem:[#allocation39_spill] sm:$0xff] %v4916_v62  ;;  %6911 = vst [vmem:[#allocation40_spill] sm:$0xff] %v4919_v0 }
 0x102   :  { %v309_v61 = vpop.f32.mrf.mxu0  ;;  %v422_v59 = vpop.f32.mrf.mxu1 }
 0x103   :  { %v4921_v58 = vadd.f32 %v309_v61, %v189_v60  ;;  %v4924_v11 = vadd.f32 %v422_v59, %v4903_v9 }
 0x104   :  { %v311_v8 = vpop.f32.mrf.mxu0  ;;  %v424_v7 = vpop.f32.mrf.mxu1 }
 0x105   :  { %6912 = vst [vmem:[#allocation41_spill] sm:$0xff] %v4921_v58  ;;  %6913 = vst [vmem:[#allocation42_spill] sm:$0xff] %v4924_v11  ;;  %v4926_v27 = vadd.f32 %v311_v8, %v193_v5  ;;  %v4929_v6 = vadd.f32 %v424_v7, %v4909_v4 }
 0x107   :  { %6914 = vst [vmem:[#allocation43_spill] sm:$0xff] %v4926_v27  ;;  %6915 = vst [vmem:[#allocation44_spill] sm:$0xff] %v4929_v6 }
 0x108   :  { %v315_v36 = vpop.f32.mrf.mxu0  ;;  %v428_v1 = vpop.f32.mrf.mxu1 }
 0x109   :  { %v4931_v2 = vadd.f32 %v315_v36, %v189_v60  ;;  %v4934_v63 = vadd.f32 %v428_v1, %v4903_v9 }
 0x10a   :  { %v317_v0 = vpop.f32.mrf.mxu0  ;;  %v430_v61 = vpop.f32.mrf.mxu1 }
 0x10b   :  { %6916 = vst [vmem:[#allocation45_spill] sm:$0xff] %v4931_v2  ;;  %6917 = vst [vmem:[#allocation46_spill] sm:$0xff] %v4934_v63  ;;  %v4936_v58 = vadd.f32 %v317_v0, %v193_v5  ;;  %v4939_v59 = vadd.f32 %v430_v61, %v4909_v4 }
 0x10d   :  { %6918 = vst [vmem:[#allocation47_spill] sm:$0xff] %v4936_v58  ;;  %6919 = vst [vmem:[#allocation48_spill] sm:$0xff] %v4939_v59 }
 0x10e   :  { %v321_v11 = vpop.f32.mrf.mxu0  ;;  %v434_v8 = vpop.f32.mrf.mxu1 }
 0x10f   :  { %v4941_v27 = vadd.f32 %v321_v11, %v189_v60  ;;  %v4944_v7 = vadd.f32 %v434_v8, %v4903_v9 }
 0x110   :  { %v323_v6 = vpop.f32.mrf.mxu0  ;;  %v436_v36 = vpop.f32.mrf.mxu1 }
 0x111   :  { %6920 = vst [vmem:[#allocation49_spill] sm:$0xff] %v4941_v27  ;;  %6921 = vst [vmem:[#allocation50_spill] sm:$0xff] %v4944_v7  ;;  %v4946_v2 = vadd.f32 %v323_v6, %v193_v5  ;;  %v4949_v1 = vadd.f32 %v436_v36, %v4909_v4 }
 0x113   :  { %6922 = vst [vmem:[#allocation51_spill] sm:$0xff] %v4946_v2  ;;  %6923 = vst [vmem:[#allocation52_spill] sm:$0xff] %v4949_v1 }
 0x114   :  { %v327_v63 = vpop.f32.mrf.mxu0  ;;  %v440_v0 = vpop.f32.mrf.mxu1 }
 0x115   :  { %v4951_v58 = vadd.f32 %v327_v63, %v189_v60  ;;  %v4954_v61 = vadd.f32 %v440_v0, %v4903_v9 }
 0x116   :  { %v329_v59 = vpop.f32.mrf.mxu0  ;;  %v442_v11 = vpop.f32.mrf.mxu1 }
 0x117   :  { %6924 = vst [vmem:[#allocation53_spill] sm:$0xff] %v4951_v58  ;;  %6925 = vst [vmem:[#allocation54_spill] sm:$0xff] %v4954_v61  ;;  %v4956_v27 = vadd.f32 %v329_v59, %v193_v5  ;;  %v4959_v8 = vadd.f32 %v442_v11, %v4909_v4 }
 0x119   :  { %6926 = vst [vmem:[#allocation55_spill] sm:$0xff] %v4956_v27  ;;  %6927 = vst [vmem:[#allocation56_spill] sm:$0xff] %v4959_v8 }
 0x11a   :  { %v333_v7 = vpop.f32.mrf.mxu0  ;;  %v446_v6 = vpop.f32.mrf.mxu1 }
 0x11b   :  { %v4961_v2 = vadd.f32 %v333_v7, %v189_v60  ;;  %v4964_v36 = vadd.f32 %v446_v6, %v4903_v9 }
 0x11c   :  { %v335_v1 = vpop.f32.mrf.mxu0  ;;  %v448_v63 = vpop.f32.mrf.mxu1 }
 0x11d   :  { %6928 = vst [vmem:[#allocation57_spill] sm:$0xff] %v4961_v2  ;;  %6929 = vst [vmem:[#allocation58_spill] sm:$0xff] %v4964_v36  ;;  %v4966_v58 = vadd.f32 %v335_v1, %v193_v5  ;;  %v4969_v0 = vadd.f32 %v448_v63, %v4909_v4  ;;  %v298_v1 = vadd.f32 %v4884_v45, %v189_v60 }
 0x11e   :  { %v300_v63 = vadd.f32 %v4893_v18, %v193_v5 }
 0x11f   :  { %6930 = vst [vmem:[#allocation59_spill] sm:$0xff] %v4966_v58  ;;  %6931 = vst [vmem:[#allocation60_spill] sm:$0xff] %v4969_v0 }
 0x120   :  { %v339_v61 = vpop.f32.mrf.mxu0  ;;  %v452_v59 = vpop.f32.mrf.mxu1 }
 0x121   :  { %v4971_v27 = vadd.f32 %v339_v61, %v189_v60  ;;  %v4974_v11 = vadd.f32 %v452_v59, %v4903_v9 }
 0x122   :  { %v341_v8 = vpop.f32.mrf.mxu0  ;;  %v454_v7 = vpop.f32.mrf.mxu1 }
 0x123   :  { %6932 = vst [vmem:[#allocation61_spill] sm:$0xff] %v4971_v27  ;;  %6933 = vst [vmem:[#allocation62_spill] sm:$0xff] %v4974_v11  ;;  %v4976_v2 = vadd.f32 %v341_v8, %v193_v5  ;;  %v4979_v6 = vadd.f32 %v454_v7, %v4909_v4  ;;  %v413_v8 = vadd.f32 %v4895_v10, %v4909_v4  ;;  %v176_v10 = vld [vmem:[%s6667_s5] sm:$0xff] }
 0x124   :  { %v411_v7 = vadd.f32 %v4886_v54, %v4903_v9 }
 0x125   :  { %6934 = vst [vmem:[#allocation63_spill] sm:$0xff] %v4976_v2  ;;  %6935 = vst [vmem:[#allocation64_spill] sm:$0xff] %v4979_v6 }
 0x126   :  { %v562_v36 = vpop.f32.mrf.mxu0  ;;  %v633_v27 = vpop.f32.mrf.mxu1 }
 0x127   :  { %v638_v0 = vadd.f32 %v562_v36, %v298_v1  ;;  %v640_v6 = vadd.f32 %v633_v27, %v411_v7  ;;  %v6941_v7 = vld [vmem:[#allocation20_spill] sm:$0xff] }
 0x128   :  { %v564_v58 = vpop.f32.mrf.mxu0  ;;  %v635_v11 = vpop.f32.mrf.mxu1 }
 0x129   :  { %v3868_v62 = vmul.f32 -1.442695, %v638_v0  ;;  %v639_v61 = vadd.f32 %v564_v58, %v300_v63  ;;  %v641_v2 = vadd.f32 %v635_v11, %v413_v8  ;;  %v6937_v63 = vld [vmem:[#allocation16_spill] sm:$0xff]  ;;  %v6940_v8 = vld [vmem:[#allocation19_spill] sm:$0xff] }
 0x12b   :  { %3979 = vpow2.f32 %v3868_v62  ;;  %v3869_v59 = vmul.f32 -1.442695, %v639_v61  ;;  %v3870_v60 = vmul.f32 -1.442695, %v641_v2  ;;  %v6938_v61 = vld [vmem:[#allocation17_spill] sm:$0xff] }
 0x12d   :  { %3981 = vpow2.f32 %v3869_v59  ;;  %v6939_v59 = vld [vmem:[#allocation18_spill] sm:$0xff] }
 0x12e   :  { %3983 = vpow2.f32 %v3870_v60  ;;  %v6942_v60 = vld [vmem:[#allocation21_spill] sm:$0xff] }
 0x138   :  { %v3980_v45 = vpop.eup %3979 }
 0x139   :  { %v645_v5 = vadd.f32 1.0, %v3980_v45  ;;  %v6943_v45 = vld [vmem:[#allocation22_spill] sm:$0xff] }
 0x13a   :  { %v3982_v18 = vpop.eup %3981 }
 0x13b   :  { %3985 = vrcp.f32 %v645_v5  ;;  %v651_v58 = vadd.f32 1.0, %v3982_v18  ;;  %v3984_v62 = vpop.eup %3983  ;;  %v6944_v5 = vld [vmem:[#allocation23_spill] sm:$0xff]  ;;  %v6945_v18 = vld [vmem:[#allocation24_spill] sm:$0xff] }
 0x13c   :  { %3987 = vtanh.f32 %v640_v6  ;;  %v658_v11 = vadd.f32 1.0, %v3984_v62  ;;  %v6947_v62 = vld [vmem:[#allocation26_spill] sm:$0xff] }
 0x13d   :  { %3989 = vrcp.f32 %v651_v58  ;;  %v6946_v58 = vld [vmem:[#allocation25_spill] sm:$0xff] }
 0x13e   :  { %3991 = vrcp.f32 %v658_v11  ;;  %v6952_v11 = vld [vmem:[#allocation31_spill] sm:$0xff] }
 0x148   :  { %v3986_v36 = vpop.eup %3985 }
 0x149   :  { %v3988_v4 = vpop.eup %3987 }
 0x14a   :  { %v3990_v0 = vpop.eup %3989  ;;  %v662_v54 = vmul.f32 %v3988_v4, %v3986_v36  ;;  %v6948_v36 = vld [vmem:[#allocation27_spill] sm:$0xff]  ;;  %v6950_v4 = vld [vmem:[#allocation29_spill] sm:$0xff] }
 0x14b   :  { %v661_v2 = vmul.f32 %v3990_v0, %v176_v10  ;;  %v3992_v27 = vpop.eup %3991  ;;  %v6949_v10 = vld [vmem:[#allocation28_spill] sm:$0xff]  ;;  %v6951_v0 = vld [vmem:[#allocation30_spill] sm:$0xff] }
 0x14d   :  { %v4990_v9 = vadd.f32 %v662_v54, %v661_v2  ;;  %v6953_v54 = vld [vmem:[#allocation32_spill] sm:$0xff]  ;;  %v6954_v2 = vld [vmem:[#allocation33_spill] sm:$0xff] }
 0x14f   :  { %3993 = vtanh.f32 %v4990_v9 }
 0x15c   :  { %v3994_v1 = vpop.eup %3993 }
 0x15d   :  { %v4993_v6 = vmul.f32 %v3994_v1, %v3992_v27  ;;  %v6955_v27 = vld [vmem:[#allocation34_spill] sm:$0xff]  ;;  %v6956_v1 = vld [vmem:[#allocation35_spill] sm:$0xff] }
 0x15f   :  { %6936 = vst [vmem:[#allocation65_spill] sm:$0xff] %v4993_v6  ;;  %739 = vmatmul.mubr.f32.vlgmr.msra.gmra.mxu0 %v4993_v6  ;;  %810 = vmatmul.mubr.f32.vlgmr.msra.gmra.mxu1 %v4993_v6  ;;  %v6957_v6 = vmov 0.0  }
 0x160   :  { %854 = vmatpush1.msra.mxu0 %v4570_v12  ;;  %925 = vmatpush1.msra.mxu1 %v4572_v13 }
 0x161   :  { %855 = vmatprep.subr.mxu0 %v4576_v14  ;;  %926 = vmatprep.subr.mxu1 %v4578_v15 }
 0x162   :  { %856 = vmatpush1.msra.mxu0 %v4584_v16  ;;  %927 = vmatpush1.msra.mxu1 %v4586_v17 }
 0x163   :  { %857 = vmatprep.subr.mxu0 %v4595_v19  ;;  %928 = vmatprep.subr.mxu1 %v4597_v20 }
 0x164   :  { %858 = vmatpush1.msra.mxu0 %v4601_v21  ;;  %929 = vmatpush1.msra.mxu1 %v4603_v22 }
 0x165   :  { %859 = vmatprep.subr.mxu0 %v4607_v23  ;;  %930 = vmatprep.subr.mxu1 %v4609_v24 }
 0x166   :  { %860 = vmatpush1.msra.mxu0 %v4615_v25  ;;  %931 = vmatpush1.msra.mxu1 %v4617_v26 }
 0x167   :  { %861 = vmatprep.subr.mxu0 %v4626_v28  ;;  %932 = vmatprep.subr.mxu1 %v4628_v29 }
 0x168   :  { %862 = vmatpush1.msra.mxu0 %v4632_v30  ;;  %933 = vmatpush1.msra.mxu1 %v4634_v31 }
 0x169   :  { %863 = vmatprep.subr.mxu0 %v4638_v32  ;;  %934 = vmatprep.subr.mxu1 %v4640_v33 }
 0x16a   :  { %864 = vmatpush1.msra.mxu0 %v4646_v34  ;;  %935 = vmatpush1.msra.mxu1 %v4648_v35 }
 0x16b   :  { %865 = vmatprep.subr.mxu0 %v4657_v37  ;;  %936 = vmatprep.subr.mxu1 %v4659_v38 }
 0x16c   :  { %866 = vmatpush1.msra.mxu0 %v4663_v39  ;;  %937 = vmatpush1.msra.mxu1 %v4665_v40 }
 0x16d   :  { %867 = vmatprep.subr.mxu0 %v4669_v41  ;;  %938 = vmatprep.subr.mxu1 %v4671_v42 }
 0x16e   :  { %868 = vmatpush1.msra.mxu0 %v4677_v43  ;;  %939 = vmatpush1.msra.mxu1 %v4679_v44 }
 0x16f   :  { %869 = vmatprep.subr.mxu0 %v4688_v46  ;;  %940 = vmatprep.subr.mxu1 %v4690_v47 }
 0x170   :  { %870 = vmatpush1.msra.mxu0 %v4694_v48  ;;  %941 = vmatpush1.msra.mxu1 %v4696_v49 }
 0x171   :  { %871 = vmatprep.subr.mxu0 %v4700_v50  ;;  %942 = vmatprep.subr.mxu1 %v4702_v51 }
 0x172   :  { %872 = vmatpush1.msra.mxu0 %v4708_v52  ;;  %943 = vmatpush1.msra.mxu1 %v4710_v53 }
 0x173   :  { %873 = vmatprep.subr.mxu0 %v4719_v55  ;;  %944 = vmatprep.subr.mxu1 %v4721_v56 }
 0x174   :  { %874 = vmatpush1.msra.mxu0 %v4725_v57  ;;  %945 = vmatpush1.msra.mxu1 %v6937_v63 }
 0x175   :  { %875 = vmatprep.subr.mxu0 %v6938_v61  ;;  %946 = vmatprep.subr.mxu1 %v6939_v59 }
 0x176   :  { %876 = vmatpush1.msra.mxu0 %v6940_v8  ;;  %947 = vmatpush1.msra.mxu1 %v6941_v7 }
 0x177   :  { %877 = vmatprep.subr.mxu0 %v6942_v60  ;;  %948 = vmatprep.subr.mxu1 %v6943_v45  ;;  %v6963_v45 = vld [vmem:[#allocation38_spill] sm:$0xff] }
 0x178   :  { %878 = vmatpush1.msra.mxu0 %v6944_v5  ;;  %949 = vmatpush1.msra.mxu1 %v6945_v18  ;;  %v6962_v5 = vld [vmem:[#allocation40_spill] sm:$0xff] }
 0x179   :  { %879 = vmatprep.subr.mxu0 %v6946_v58  ;;  %950 = vmatprep.subr.mxu1 %v6947_v62  ;;  %v6958_v62 = vld [vmem:[#allocation36_spill] sm:$0xff] }
 0x17a   :  { %880 = vmatpush1.msra.mxu0 %v6948_v36  ;;  %951 = vmatpush1.msra.mxu1 %v6949_v10  ;;  %v6959_v10 = vld [vmem:[#allocation14_spill] sm:$0xff] }
 0x17b   :  { %881 = vmatprep.subr.mxu0 %v6950_v4  ;;  %952 = vmatprep.subr.mxu1 %v6951_v0  ;;  %v6960_v4 = vld [vmem:[#allocation15_spill] sm:$0xff] }
 0x17c   :  { %882 = vmatpush1.msra.mxu0 %v6952_v11  ;;  %953 = vmatpush1.msra.mxu1 %v6953_v54 }
 0x17d   :  { %883 = vmatprep.subr.mxu0 %v6954_v2  ;;  %954 = vmatprep.subr.mxu1 %v6955_v27  ;;  %v6961_v2 = vld [vmem:[#allocation39_spill] sm:$0xff] }
 0x17e   :  { %884 = vmatpush1.msra.mxu0 %v6956_v1  ;;  %917 = vmatprep.mubr.f32.mxu0 %v6957_v6 }
 0x17f   :  { %955 = vmatpush1.msra.mxu1 %v6958_v62  ;;  %988 = vmatprep.mubr.f32.mxu1 %v6957_v6 }
 0x180   :  { %1032 = vmatprep.subr.mxu0 %v6959_v10  ;;  %1103 = vmatprep.subr.mxu1 %v6960_v4 }
 0x21f   :  { %v740_v0 = vpop.f32.mrf.mxu0  ;;  %v811_v27 = vpop.f32.mrf.mxu1 }
 0x220   :  { %v816_v11 = vadd.f32 %v740_v0, %v4911_v3  ;;  %v818_v6 = vadd.f32 %v811_v27, %v6963_v45  ;;  %v6987_v27 = vld [vmem:[#allocation44_spill] sm:$0xff] }
 0x221   :  { %v742_v54 = vpop.f32.mrf.mxu0  ;;  %v813_v18 = vpop.f32.mrf.mxu1 }
 0x222   :  { %v3871_v36 = vmul.f32 -1.442695, %v816_v11  ;;  %v817_v58 = vadd.f32 %v742_v54, %v6961_v2  ;;  %v819_v62 = vadd.f32 %v813_v18, %v6962_v5 }
 0x224   :  { %3995 = vpow2.f32 %v3871_v36  ;;  %v3872_v1 = vmul.f32 -1.442695, %v817_v58  ;;  %v3873_v60 = vmul.f32 -1.442695, %v819_v62 }
 0x226   :  { %3997 = vpow2.f32 %v3872_v1 }
 0x227   :  { %3999 = vtanh.f32 %v818_v6 }
 0x228   :  { %4001 = vpow2.f32 %v3873_v60 }
 0x231   :  { %v3996_v10 = vpop.eup %3995 }
 0x232   :  { %v823_v7 = vadd.f32 1.0, %v3996_v10 }
 0x233   :  { %v3998_v4 = vpop.eup %3997 }
 0x234   :  { %4003 = vrcp.f32 %v823_v7  ;;  %v829_v3 = vadd.f32 1.0, %v3998_v4  ;;  %v4000_v0 = vpop.eup %3999  ;;  %v6988_v4 = vld [vmem:[#allocation42_spill] sm:$0xff] }
 0x235   :  { %v4002_v11 = vpop.eup %4001 }
 0x236   :  { %4005 = vrcp.f32 %v829_v3  ;;  %v836_v2 = vadd.f32 1.0, %v4002_v11 }
 0x238   :  { %4007 = vrcp.f32 %v836_v2 }
 0x241   :  { %v4004_v36 = vpop.eup %4003 }
 0x242   :  { %v840_v54 = vmul.f32 %v4004_v36, %v4000_v0 }
 0x243   :  { %v4006_v58 = vpop.eup %4005 }
 0x244   :  { %v839_v1 = vmul.f32 %v4006_v58, %v4990_v9 }
 0x245   :  { %v4008_v45 = vpop.eup %4007 }
 0x246   :  { %v5068_v5 = vadd.f32 %v840_v54, %v839_v1 }
 0x248   :  { %4009 = vtanh.f32 %v5068_v5 }
 0x255   :  { %v4010_v6 = vpop.eup %4009 }
 0x256   :  { %v5071_v18 = vmul.f32 %v4010_v6, %v4008_v45 }
 0x258   :  { %6964 = vst [vmem:[#allocation16_spill] sm:$0xff] %v5071_v18  ;;  %918 = vmatmul.mubr.f32.vlgmr.msra.gmra.mxu0 %v5071_v18  ;;  %989 = vmatmul.mubr.f32.vlgmr.msra.gmra.mxu1 %v5071_v18  ;;  %v5226_v18 = vld [vmem:[#allocation6 + $0x138] sm:$0xff] }
 0x259   :  { %1033 = vmatpush1.msra.mxu0 %v4570_v12  ;;  %1104 = vmatpush1.msra.mxu1 %v4572_v13  ;;  %v6965_v12 = vld [vmem:[#allocation20_spill] sm:$0xff]  ;;  %v6966_v13 = vld [vmem:[#allocation21_spill] sm:$0xff] }
 0x25a   :  { %1034 = vmatprep.subr.mxu0 %v4576_v14  ;;  %1105 = vmatprep.subr.mxu1 %v4578_v15  ;;  %v6967_v14 = vld [vmem:[#allocation22_spill] sm:$0xff]  ;;  %v6968_v15 = vld [vmem:[#allocation23_spill] sm:$0xff] }
 0x25b   :  { %1035 = vmatpush1.msra.mxu0 %v4584_v16  ;;  %1106 = vmatpush1.msra.mxu1 %v4586_v17  ;;  %v6969_v16 = vld [vmem:[#allocation24_spill] sm:$0xff]  ;;  %v6970_v17 = vld [vmem:[#allocation25_spill] sm:$0xff] }
 0x25c   :  { %1036 = vmatprep.subr.mxu0 %v4595_v19  ;;  %1107 = vmatprep.subr.mxu1 %v4597_v20  ;;  %v6971_v19 = vld [vmem:[#allocation26_spill] sm:$0xff]  ;;  %v6972_v20 = vld [vmem:[#allocation27_spill] sm:$0xff] }
 0x25d   :  { %1037 = vmatpush1.msra.mxu0 %v4601_v21  ;;  %1108 = vmatpush1.msra.mxu1 %v4603_v22  ;;  %v6973_v21 = vld [vmem:[#allocation28_spill] sm:$0xff]  ;;  %v6974_v22 = vld [vmem:[#allocation29_spill] sm:$0xff] }
 0x25e   :  { %1038 = vmatprep.subr.mxu0 %v4607_v23  ;;  %1109 = vmatprep.subr.mxu1 %v4609_v24  ;;  %v6975_v23 = vld [vmem:[#allocation30_spill] sm:$0xff]  ;;  %v6976_v24 = vld [vmem:[#allocation31_spill] sm:$0xff] }
 0x25f   :  { %1039 = vmatpush1.msra.mxu0 %v4615_v25  ;;  %1110 = vmatpush1.msra.mxu1 %v4617_v26  ;;  %v6977_v25 = vld [vmem:[#allocation32_spill] sm:$0xff]  ;;  %v6978_v26 = vld [vmem:[#allocation33_spill] sm:$0xff] }
 0x260   :  { %1040 = vmatprep.subr.mxu0 %v4626_v28  ;;  %1111 = vmatprep.subr.mxu1 %v4628_v29  ;;  %v6979_v28 = vld [vmem:[#allocation34_spill] sm:$0xff]  ;;  %v6980_v29 = vld [vmem:[#allocation35_spill] sm:$0xff] }
 0x261   :  { %1041 = vmatpush1.msra.mxu0 %v4632_v30  ;;  %1112 = vmatpush1.msra.mxu1 %v4634_v31  ;;  %v6981_v30 = vmov 0.0   ;;  %v6982_v31 = vld [vmem:[#allocation36_spill] sm:$0xff] }
 0x262   :  { %1042 = vmatprep.subr.mxu0 %v4638_v32  ;;  %1113 = vmatprep.subr.mxu1 %v4640_v33  ;;  %v5139_v32 = vld [vmem:[#allocation6 + $0x1e8] sm:$0xff]  ;;  %v5142_v33 = vld [vmem:[#allocation6 + $0x1f8] sm:$0xff] }
 0x263   :  { %1043 = vmatpush1.msra.mxu0 %v4646_v34  ;;  %1114 = vmatpush1.msra.mxu1 %v4648_v35  ;;  %6983 = vst [vmem:[#allocation17_spill] sm:$0xff] %v5139_v32  ;;  %6984 = vst [vmem:[#allocation18_spill] sm:$0xff] %v5142_v33  ;;  %v6985_v35 = vld [vmem:[#allocation41_spill] sm:$0xff] }
 0x264   :  { %1044 = vmatprep.subr.mxu0 %v4657_v37  ;;  %1115 = vmatprep.subr.mxu1 %v4659_v38 }
 0x265   :  { %1045 = vmatpush1.msra.mxu0 %v4663_v39  ;;  %1116 = vmatpush1.msra.mxu1 %v4665_v40  ;;  %v6986_v40 = vld [vmem:[#allocation43_spill] sm:$0xff] }
 0x266   :  { %1046 = vmatprep.subr.mxu0 %v4669_v41  ;;  %1117 = vmatprep.subr.mxu1 %v4671_v42 }
 0x267   :  { %1047 = vmatpush1.msra.mxu0 %v4677_v43  ;;  %1118 = vmatpush1.msra.mxu1 %v4679_v44 }
 0x268   :  { %1048 = vmatprep.subr.mxu0 %v4688_v46  ;;  %1119 = vmatprep.subr.mxu1 %v4690_v47 }
 0x269   :  { %1049 = vmatpush1.msra.mxu0 %v4694_v48  ;;  %1120 = vmatpush1.msra.mxu1 %v4696_v49 }
 0x26a   :  { %1050 = vmatprep.subr.mxu0 %v4700_v50  ;;  %1121 = vmatprep.subr.mxu1 %v4702_v51 }
 0x26b   :  { %1051 = vmatpush1.msra.mxu0 %v4708_v52  ;;  %1122 = vmatpush1.msra.mxu1 %v4710_v53 }
 0x26c   :  { %1052 = vmatprep.subr.mxu0 %v4719_v55  ;;  %1123 = vmatprep.subr.mxu1 %v4721_v56 }
 0x26d   :  { %1053 = vmatpush1.msra.mxu0 %v4725_v57  ;;  %1124 = vmatpush1.msra.mxu1 %v6937_v63 }
 0x26e   :  { %1054 = vmatprep.subr.mxu0 %v6938_v61  ;;  %1125 = vmatprep.subr.mxu1 %v6939_v59 }
 0x26f   :  { %1055 = vmatpush1.msra.mxu0 %v6940_v8  ;;  %1126 = vmatpush1.msra.mxu1 %v6965_v12 }
 0x270   :  { %1056 = vmatprep.subr.mxu0 %v6966_v13  ;;  %1127 = vmatprep.subr.mxu1 %v6967_v14 }
 0x271   :  { %1057 = vmatpush1.msra.mxu0 %v6968_v15  ;;  %1128 = vmatpush1.msra.mxu1 %v6969_v16 }
 0x272   :  { %1058 = vmatprep.subr.mxu0 %v6970_v17  ;;  %1129 = vmatprep.subr.mxu1 %v6971_v19 }
 0x273   :  { %1059 = vmatpush1.msra.mxu0 %v6972_v20  ;;  %1130 = vmatpush1.msra.mxu1 %v6973_v21 }
 0x274   :  { %1060 = vmatprep.subr.mxu0 %v6974_v22  ;;  %1131 = vmatprep.subr.mxu1 %v6975_v23 }
 0x275   :  { %1061 = vmatpush1.msra.mxu0 %v6976_v24  ;;  %1132 = vmatpush1.msra.mxu1 %v6977_v25 }
 0x276   :  { %1062 = vmatprep.subr.mxu0 %v6978_v26  ;;  %1133 = vmatprep.subr.mxu1 %v6979_v28 }
 0x277   :  { %1063 = vmatpush1.msra.mxu0 %v6980_v29  ;;  %1096 = vmatprep.mubr.f32.mxu0 %v6981_v30 }
 0x278   :  { %1134 = vmatpush1.msra.mxu1 %v6982_v31  ;;  %1167 = vmatprep.mubr.f32.mxu1 %v6981_v30 }
 0x279   :  { %1211 = vmatprep.subr.mxu0 %v5139_v32  ;;  %1282 = vmatprep.subr.mxu1 %v5142_v33 }
 0x318   :  { %v919_v34 = vpop.f32.mrf.mxu0  ;;  %v990_v7 = vpop.f32.mrf.mxu1 }
 0x319   :  { %v995_v37 = vadd.f32 %v919_v34, %v6985_v35  ;;  %v997_v3 = vadd.f32 %v990_v7, %v6988_v4  ;;  %v5157_v7 = vld [vmem:[#allocation6 + $0x1e0] sm:$0xff]  ;;  %v5175_v4 = vld [vmem:[#allocation6 + $0x1a8] sm:$0xff] }
 0x31a   :  { %v921_v38 = vpop.f32.mrf.mxu0  ;;  %v992_v62 = vpop.f32.mrf.mxu1 }
 0x31b   :  { %v3874_v39 = vmul.f32 -1.442695, %v995_v37  ;;  %v996_v9 = vadd.f32 %v921_v38, %v6986_v40  ;;  %v998_v10 = vadd.f32 %v992_v62, %v6987_v27  ;;  %v5166_v62 = vld [vmem:[#allocation6 + $0x1d8] sm:$0xff]  ;;  %v5169_v27 = vld [vmem:[#allocation6 + $0x1c0] sm:$0xff] }
 0x31d   :  { %4011 = vpow2.f32 %v3874_v39  ;;  %v3875_v60 = vmul.f32 -1.442695, %v996_v9  ;;  %v3876_v0 = vmul.f32 -1.442695, %v998_v10  ;;  %v5172_v10 = vld [vmem:[#allocation6 + $0x1d0] sm:$0xff] }
 0x31f   :  { %4013 = vpow2.f32 %v3875_v60  ;;  %v5160_v60 = vld [vmem:[#allocation6 + $0x1f0] sm:$0xff] }
 0x320   :  { %4015 = vtanh.f32 %v997_v3  ;;  %v5178_v3 = vld [vmem:[#allocation6 + $0x1b8] sm:$0xff] }
 0x321   :  { %4017 = vpow2.f32 %v3876_v0  ;;  %v5181_v0 = vld [vmem:[#allocation6 + $0x1a0] sm:$0xff] }
 0x32a   :  { %v4012_v11 = vpop.eup %4011 }
 0x32b   :  { %v1002_v36 = vadd.f32 1.0, %v4012_v11  ;;  %v5184_v11 = vld [vmem:[#allocation6 + $0x1b0] sm:$0xff] }
 0x32c   :  { %v4014_v54 = vpop.eup %4013 }
 0x32d   :  { %4019 = vrcp.f32 %v1002_v36  ;;  %v1008_v58 = vadd.f32 1.0, %v4014_v54  ;;  %v4016_v2 = vpop.eup %4015  ;;  %v5187_v36 = vld [vmem:[#allocation6 + $0x188] sm:$0xff]  ;;  %v5190_v54 = vld [vmem:[#allocation6 + $0x198] sm:$0xff] }
 0x32e   :  { %v4018_v1 = vpop.eup %4017 }
 0x32f   :  { %4021 = vrcp.f32 %v1008_v58  ;;  %v1015_v35 = vadd.f32 1.0, %v4018_v1  ;;  %v5193_v58 = vld [vmem:[#allocation6 + $0x180] sm:$0xff]  ;;  %v5199_v1 = vld [vmem:[#allocation6 + $0x168] sm:$0xff] }
 0x331   :  { %4023 = vrcp.f32 %v1015_v35  ;;  %v5211_v35 = vld [vmem:[#allocation6 + $0x148] sm:$0xff] }
 0x332   :  { %6990 = vst [vmem:[#allocation14_spill] sm:$0xff] %v5211_v35 }
 0x33a   :  { %v4020_v45 = vpop.eup %4019 }
 0x33b   :  { %v1019_v6 = vmul.f32 %v4020_v45, %v4016_v2  ;;  %v5196_v2 = vld [vmem:[#allocation6 + $0x190] sm:$0xff]  ;;  %v5202_v45 = vld [vmem:[#allocation6 + $0x178] sm:$0xff] }
 0x33c   :  { %v4022_v34 = vpop.eup %4021 }
 0x33d   :  { %v1018_v37 = vmul.f32 %v4022_v34, %v5068_v5  ;;  %v5163_v5 = vld [vmem:[#allocation6 + $0x1c8] sm:$0xff]  ;;  %v5208_v34 = vld [vmem:[#allocation6 + $0x170] sm:$0xff] }
 0x33e   :  { %v4024_v39 = vpop.eup %4023 }
 0x33f   :  { %v5150_v38 = vadd.f32 %v1019_v6, %v1018_v37  ;;  %v5205_v6 = vld [vmem:[#allocation6 + $0x160] sm:$0xff]  ;;  %v5214_v37 = vld [vmem:[#allocation6 + $0x158] sm:$0xff] }
 0x340   :  { %6991 = vst [vmem:[#allocation15_spill] sm:$0xff] %v5214_v37 }
 0x341   :  { %4025 = vtanh.f32 %v5150_v38 }
 0x34e   :  { %v4026_v40 = vpop.eup %4025 }
 0x34f   :  { %v5153_v9 = vmul.f32 %v4026_v40, %v4024_v39  ;;  %v5217_v39 = vld [vmem:[#allocation6 + $0x140] sm:$0xff]  ;;  %v5220_v40 = vld [vmem:[#allocation6 + $0x150] sm:$0xff] }
 0x351   :  { %6989 = vst [vmem:[#allocation19_spill] sm:$0xff] %v5153_v9  ;;  %1097 = vmatmul.mubr.f32.vlgmr.msra.gmra.mxu0 %v5153_v9  ;;  %1168 = vmatmul.mubr.f32.vlgmr.msra.gmra.mxu1 %v5153_v9  ;;  %v5223_v9 = vld [vmem:[#allocation6 + $0x128] sm:$0xff] }
 0x352   :  { %1212 = vmatpush1.msra.mxu0 %v5157_v7  ;;  %1283 = vmatpush1.msra.mxu1 %v5160_v60 }
 0x353   :  { %1213 = vmatprep.subr.mxu0 %v5163_v5  ;;  %1284 = vmatprep.subr.mxu1 %v5166_v62 }
 0x354   :  { %1214 = vmatpush1.msra.mxu0 %v5169_v27  ;;  %1285 = vmatpush1.msra.mxu1 %v5172_v10 }
 0x355   :  { %1215 = vmatprep.subr.mxu0 %v5175_v4  ;;  %1286 = vmatprep.subr.mxu1 %v5178_v3 }
 0x356   :  { %1216 = vmatpush1.msra.mxu0 %v5181_v0  ;;  %1287 = vmatpush1.msra.mxu1 %v5184_v11 }
 0x357   :  { %1217 = vmatprep.subr.mxu0 %v5187_v36  ;;  %1288 = vmatprep.subr.mxu1 %v5190_v54 }
 0x358   :  { %1218 = vmatpush1.msra.mxu0 %v5193_v58  ;;  %1289 = vmatpush1.msra.mxu1 %v5196_v2 }
 0x359   :  { %1219 = vmatprep.subr.mxu0 %v5199_v1  ;;  %1290 = vmatprep.subr.mxu1 %v5202_v45 }
 0x35a   :  { %1220 = vmatpush1.msra.mxu0 %v5205_v6  ;;  %1291 = vmatpush1.msra.mxu1 %v5208_v34 }
 0x35b   :  { %1221 = vmatprep.subr.mxu0 %v5211_v35  ;;  %1292 = vmatprep.subr.mxu1 %v5214_v37  ;;  %v5229_v35 = vld [vmem:[#allocation6 + $0x120] sm:$0xff]  ;;  %v5232_v37 = vld [vmem:[#allocation6 + $0x130] sm:$0xff] }
 0x35c   :  { %1222 = vmatpush1.msra.mxu0 %v5217_v39  ;;  %1293 = vmatpush1.msra.mxu1 %v5220_v40 }
 0x35d   :  { %1223 = vmatprep.subr.mxu0 %v5223_v9  ;;  %1294 = vmatprep.subr.mxu1 %v5226_v18 }
 0x35e   :  { %1224 = vmatpush1.msra.mxu0 %v5229_v35  ;;  %1295 = vmatpush1.msra.mxu1 %v5232_v37 }
 0x35f   :  { %1225 = vmatprep.subr.mxu0 %v4669_v41  ;;  %1296 = vmatprep.subr.mxu1 %v4671_v42  ;;  %v6992_v42 = vld [vmem:[#allocation45_spill] sm:$0xff] }
 0x360   :  { %1226 = vmatpush1.msra.mxu0 %v4677_v43  ;;  %1297 = vmatpush1.msra.mxu1 %v4679_v44 }
 0x361   :  { %1227 = vmatprep.subr.mxu0 %v4688_v46  ;;  %1298 = vmatprep.subr.mxu1 %v4690_v47  ;;  %v6993_v47 = vld [vmem:[#allocation47_spill] sm:$0xff] }
 0x362   :  { %1228 = vmatpush1.msra.mxu0 %v4694_v48  ;;  %1299 = vmatpush1.msra.mxu1 %v4696_v49 }
 0x363   :  { %1229 = vmatprep.subr.mxu0 %v4700_v50  ;;  %1300 = vmatprep.subr.mxu1 %v4702_v51 }
 0x364   :  { %1230 = vmatpush1.msra.mxu0 %v4708_v52  ;;  %1301 = vmatpush1.msra.mxu1 %v4710_v53  ;;  %v6994_v52 = vld [vmem:[#allocation48_spill] sm:$0xff] }
 0x365   :  { %1231 = vmatprep.subr.mxu0 %v4719_v55  ;;  %1302 = vmatprep.subr.mxu1 %v4721_v56  ;;  %v6995_v55 = vld [vmem:[#allocation46_spill] sm:$0xff] }
 0x366   :  { %1232 = vmatpush1.msra.mxu0 %v4725_v57  ;;  %1303 = vmatpush1.msra.mxu1 %v6937_v63 }
 0x367   :  { %1233 = vmatprep.subr.mxu0 %v6938_v61  ;;  %1304 = vmatprep.subr.mxu1 %v6939_v59 }
 0x368   :  { %1234 = vmatpush1.msra.mxu0 %v6940_v8  ;;  %1305 = vmatpush1.msra.mxu1 %v6965_v12 }
 0x369   :  { %1235 = vmatprep.subr.mxu0 %v6966_v13  ;;  %1306 = vmatprep.subr.mxu1 %v6967_v14 }
 0x36a   :  { %1236 = vmatpush1.msra.mxu0 %v6968_v15  ;;  %1307 = vmatpush1.msra.mxu1 %v6969_v16 }
 0x36b   :  { %1237 = vmatprep.subr.mxu0 %v6970_v17  ;;  %1308 = vmatprep.subr.mxu1 %v6971_v19 }
 0x36c   :  { %1238 = vmatpush1.msra.mxu0 %v6972_v20  ;;  %1309 = vmatpush1.msra.mxu1 %v6973_v21 }
 0x36d   :  { %1239 = vmatprep.subr.mxu0 %v6974_v22  ;;  %1310 = vmatprep.subr.mxu1 %v6975_v23 }
 0x36e   :  { %1240 = vmatpush1.msra.mxu0 %v6976_v24  ;;  %1311 = vmatpush1.msra.mxu1 %v6977_v25  ;;  %v6997_v24 = vld [vmem:[#allocation14_spill] sm:$0xff]  ;;  %v6998_v25 = vld [vmem:[#allocation15_spill] sm:$0xff] }
 0x36f   :  { %1241 = vmatprep.subr.mxu0 %v6978_v26  ;;  %1312 = vmatprep.subr.mxu1 %v6979_v28  ;;  %v5313_v26 = vld [vmem:[#allocation6 + $0x108] sm:$0xff]  ;;  %v5316_v28 = vld [vmem:[#allocation6 + $0x118] sm:$0xff] }
 0x370   :  { %1242 = vmatpush1.msra.mxu0 %v6980_v29  ;;  %1275 = vmatprep.mubr.f32.mxu0 %v6981_v30  ;;  %v5319_v29 = vld [vmem:[#allocation6 + $0x100] sm:$0xff] }
 0x371   :  { %1313 = vmatpush1.msra.mxu1 %v6982_v31  ;;  %1346 = vmatprep.mubr.f32.mxu1 %v6981_v30  ;;  %v5322_v31 = vld [vmem:[#allocation6 + $0x110] sm:$0xff] }
 0x372   :  { %1390 = vmatprep.subr.mxu0 %v5139_v32  ;;  %1461 = vmatprep.subr.mxu1 %v5142_v33 }
 0x411   :  { %v1098_v41 = vpop.f32.mrf.mxu0  ;;  %v1169_v49 = vpop.f32.mrf.mxu1 }
 0x412   :  { %v1174_v43 = vadd.f32 %v1098_v41, %v6992_v42  ;;  %v1176_v56 = vadd.f32 %v1169_v49, %v6995_v55  ;;  %v5328_v41 = vld [vmem:[#allocation6 + $0xf8] sm:$0xff]  ;;  %v5331_v42 = vld [vmem:[#allocation6 + $0xe0] sm:$0xff]  ;;  %v5349_v49 = vld [vmem:[#allocation6 + $0xa8] sm:$0xff] }
 0x413   :  { %v1100_v44 = vpop.f32.mrf.mxu0  ;;  %v1171_v51 = vpop.f32.mrf.mxu1  ;;  %v5364_v55 = vld [vmem:[#allocation6 + $0x98] sm:$0xff] }
 0x414   :  { %v3877_v46 = vmul.f32 -1.442695, %v1174_v43  ;;  %v1175_v48 = vadd.f32 %v1100_v44, %v6993_v47  ;;  %v1177_v53 = vadd.f32 %v1171_v51, %v6994_v52  ;;  %v5334_v43 = vld [vmem:[#allocation6 + $0xf0] sm:$0xff]  ;;  %v5337_v44 = vld [vmem:[#allocation6 + $0xc8] sm:$0xff]  ;;  %v5343_v47 = vld [vmem:[#allocation6 + $0xc0] sm:$0xff] }
 0x415   :  { %v5355_v51 = vld [vmem:[#allocation6 + $0xa0] sm:$0xff]  ;;  %v5358_v52 = vld [vmem:[#allocation6 + $0xb0] sm:$0xff] }
 0x416   :  { %4027 = vpow2.f32 %v3877_v46  ;;  %v3878_v50 = vmul.f32 -1.442695, %v1175_v48  ;;  %v3879_v57 = vmul.f32 -1.442695, %v1177_v53  ;;  %v5340_v46 = vld [vmem:[#allocation6 + $0xd8] sm:$0xff]  ;;  %v5346_v48 = vld [vmem:[#allocation6 + $0xd0] sm:$0xff] }
 0x417   :  { %v5361_v53 = vld [vmem:[#allocation6 + $0x88] sm:$0xff] }
 0x418   :  { %4029 = vpow2.f32 %v3878_v50  ;;  %v5352_v50 = vld [vmem:[#allocation6 + $0xb8] sm:$0xff] }
 0x419   :  { %4031 = vtanh.f32 %v1176_v56  ;;  %v5367_v56 = vld [vmem:[#allocation6 + $0x80] sm:$0xff] }
 0x41a   :  { %4033 = vpow2.f32 %v3879_v57  ;;  %v5370_v57 = vld [vmem:[#allocation6 + $0x90] sm:$0xff] }
 0x41b   :  { %6999 = vst [vmem:[#allocation40_spill] sm:$0xff] %v5370_v57 }
 0x423   :  { %v4028_v63 = vpop.eup %4027 }
 0x424   :  { %v1181_v61 = vadd.f32 1.0, %v4028_v63  ;;  %v5373_v63 = vld [vmem:[#allocation6 + $0x68] sm:$0xff] }
 0x425   :  { %v4030_v59 = vpop.eup %4029  ;;  %7000 = vst [vmem:[#allocation38_spill] sm:$0xff] %v5373_v63 }
 0x426   :  { %4035 = vrcp.f32 %v1181_v61  ;;  %v1187_v8 = vadd.f32 1.0, %v4030_v59  ;;  %v4032_v12 = vpop.eup %4031  ;;  %v5376_v61 = vld [vmem:[#allocation6 + $0x78] sm:$0xff]  ;;  %v5379_v59 = vld [vmem:[#allocation6 + $0x60] sm:$0xff] }
 0x427   :  { %v4034_v13 = vpop.eup %4033  ;;  %7001 = vst [vmem:[#allocation20_spill] sm:$0xff] %v5376_v61  ;;  %7002 = vst [vmem:[#allocation21_spill] sm:$0xff] %v5379_v59 }
 0x428   :  { %4037 = vrcp.f32 %v1187_v8  ;;  %v1194_v17 = vadd.f32 1.0, %v4034_v13  ;;  %v5382_v8 = vld [vmem:[#allocation6 + $0x70] sm:$0xff]  ;;  %v5388_v13 = vld [vmem:[#allocation6 + $0x58] sm:$0xff] }
 0x429   :  { %7003 = vst [vmem:[#allocation22_spill] sm:$0xff] %v5382_v8  ;;  %7005 = vst [vmem:[#allocation24_spill] sm:$0xff] %v5388_v13 }
 0x42a   :  { %4039 = vrcp.f32 %v1194_v17  ;;  %v5400_v17 = vld [vmem:[#allocation6 + $0x38] sm:$0xff] }
 0x42b   :  { %7009 = vst [vmem:[#allocation28_spill] sm:$0xff] %v5400_v17 }
 0x433   :  { %v4036_v14 = vpop.eup %4035 }
 0x434   :  { %v1198_v15 = vmul.f32 %v4036_v14, %v4032_v12  ;;  %v5385_v12 = vld [vmem:[#allocation6 + $0x48] sm:$0xff]  ;;  %v5391_v14 = vld [vmem:[#allocation6 + $0x40] sm:$0xff] }
 0x435   :  { %v4038_v16 = vpop.eup %4037  ;;  %7004 = vst [vmem:[#allocation23_spill] sm:$0xff] %v5385_v12  ;;  %7006 = vst [vmem:[#allocation25_spill] sm:$0xff] %v5391_v14 }
 0x436   :  { %v1197_v19 = vmul.f32 %v4038_v16, %v5150_v38  ;;  %v5325_v38 = vld [vmem:[#allocation6 + $0xe8] sm:$0xff] }
 0x437   :  { %v4040_v21 = vpop.eup %4039  ;;  %v5397_v16 = vld [vmem:[#allocation6 + $0x28] sm:$0xff] }
 0x438   :  { %v5280_v20 = vadd.f32 %v1198_v15, %v1197_v19  ;;  %v5394_v15 = vld [vmem:[#allocation6 + $0x50] sm:$0xff]  ;;  %7008 = vst [vmem:[#allocation27_spill] sm:$0xff] %v5397_v16  ;;  %v5403_v19 = vld [vmem:[#allocation6 + $0x20] sm:$0xff] }
 0x439   :  { %7007 = vst [vmem:[#allocation26_spill] sm:$0xff] %v5394_v15  ;;  %7010 = vst [vmem:[#allocation29_spill] sm:$0xff] %v5403_v19 }
 0x43a   :  { %4041 = vtanh.f32 %v5280_v20 }
 0x447   :  { %v4042_v22 = vpop.eup %4041 }
 0x448   :  { %v5283_v23 = vmul.f32 %v4042_v22, %v4040_v21  ;;  %v5406_v21 = vld [vmem:[#allocation6 + $0x30] sm:$0xff]  ;;  %v5409_v22 = vld [vmem:[#allocation6 + $0x8] sm:$0xff] }
 0x449   :  { %7011 = vst [vmem:[#allocation30_spill] sm:$0xff] %v5406_v21  ;;  %7012 = vst [vmem:[#allocation31_spill] sm:$0xff] %v5409_v22 }
 0x44a   :  { %6996 = vst [vmem:[#allocation39_spill] sm:$0xff] %v5283_v23  ;;  %1276 = vmatmul.mubr.f32.vlgmr.msra.gmra.mxu0 %v5283_v23  ;;  %1347 = vmatmul.mubr.f32.vlgmr.msra.gmra.mxu1 %v5283_v23  ;;  %v5412_v23 = vld [vmem:[#allocation6 + $0x18] sm:$0xff] }
 0x44b   :  { %1391 = vmatpush1.msra.mxu0 %v5157_v7  ;;  %1462 = vmatpush1.msra.mxu1 %v5160_v60  ;;  %7013 = vst [vmem:[#allocation32_spill] sm:$0xff] %v5412_v23 }
 0x44c   :  { %1392 = vmatprep.subr.mxu0 %v5163_v5  ;;  %1463 = vmatprep.subr.mxu1 %v5166_v62 }
 0x44d   :  { %1393 = vmatpush1.msra.mxu0 %v5169_v27  ;;  %1464 = vmatpush1.msra.mxu1 %v5172_v10 }
 0x44e   :  { %1394 = vmatprep.subr.mxu0 %v5175_v4  ;;  %1465 = vmatprep.subr.mxu1 %v5178_v3 }
 0x44f   :  { %1395 = vmatpush1.msra.mxu0 %v5181_v0  ;;  %1466 = vmatpush1.msra.mxu1 %v5184_v11 }
 0x450   :  { %1396 = vmatprep.subr.mxu0 %v5187_v36  ;;  %1467 = vmatprep.subr.mxu1 %v5190_v54 }
 0x451   :  { %1397 = vmatpush1.msra.mxu0 %v5193_v58  ;;  %1468 = vmatpush1.msra.mxu1 %v5196_v2 }
 0x452   :  { %1398 = vmatprep.subr.mxu0 %v5199_v1  ;;  %1469 = vmatprep.subr.mxu1 %v5202_v45 }
 0x453   :  { %1399 = vmatpush1.msra.mxu0 %v5205_v6  ;;  %1470 = vmatpush1.msra.mxu1 %v5208_v34 }
 0x454   :  { %1400 = vmatprep.subr.mxu0 %v6997_v24  ;;  %1471 = vmatprep.subr.mxu1 %v6998_v25 }
 0x455   :  { %1401 = vmatpush1.msra.mxu0 %v5217_v39  ;;  %1472 = vmatpush1.msra.mxu1 %v5220_v40 }
 0x456   :  { %1402 = vmatprep.subr.mxu0 %v5223_v9  ;;  %1473 = vmatprep.subr.mxu1 %v5226_v18 }
 0x457   :  { %1403 = vmatpush1.msra.mxu0 %v5229_v35  ;;  %1474 = vmatpush1.msra.mxu1 %v5232_v37 }
 0x458   :  { %1404 = vmatprep.subr.mxu0 %v5313_v26  ;;  %1475 = vmatprep.subr.mxu1 %v5316_v28 }
 0x459   :  { %1405 = vmatpush1.msra.mxu0 %v5319_v29  ;;  %1476 = vmatpush1.msra.mxu1 %v5322_v31 }
 0x45a   :  { %1406 = vmatprep.subr.mxu0 %v5325_v38  ;;  %1477 = vmatprep.subr.mxu1 %v5328_v41 }
 0x45b   :  { %1407 = vmatpush1.msra.mxu0 %v5331_v42  ;;  %1478 = vmatpush1.msra.mxu1 %v5334_v43 }
 0x45c   :  { %1408 = vmatprep.subr.mxu0 %v5337_v44  ;;  %1479 = vmatprep.subr.mxu1 %v5340_v46 }
 0x45d   :  { %1409 = vmatpush1.msra.mxu0 %v5343_v47  ;;  %1480 = vmatpush1.msra.mxu1 %v5346_v48 }
 0x45e   :  { %1410 = vmatprep.subr.mxu0 %v5349_v49  ;;  %1481 = vmatprep.subr.mxu1 %v5352_v50 }
 0x45f   :  { %1411 = vmatpush1.msra.mxu0 %v5355_v51  ;;  %1482 = vmatpush1.msra.mxu1 %v5358_v52 }
 0x460   :  { %1412 = vmatprep.subr.mxu0 %v5361_v53  ;;  %1483 = vmatprep.subr.mxu1 %v5364_v55 }
 0x461   :  { %1413 = vmatpush1.msra.mxu0 %v5367_v56  ;;  %1484 = vmatpush1.msra.mxu1 %v5370_v57 }
 0x462   :  { %1414 = vmatprep.subr.mxu0 %v5373_v63  ;;  %1485 = vmatprep.subr.mxu1 %v5376_v61  ;;  %v7019_v61 = vld [vmem:[#allocation50_spill] sm:$0xff] }
 0x463   :  { %1415 = vmatpush1.msra.mxu0 %v5379_v59  ;;  %1486 = vmatpush1.msra.mxu1 %v5382_v8  ;;  %v7018_v59 = vld [vmem:[#allocation52_spill] sm:$0xff] }
 0x464   :  { %1416 = vmatprep.subr.mxu0 %v5385_v12  ;;  %1487 = vmatprep.subr.mxu1 %v5388_v13 }
 0x465   :  { %1417 = vmatpush1.msra.mxu0 %v5391_v14  ;;  %1488 = vmatpush1.msra.mxu1 %v5394_v15  ;;  %v7017_v14 = vld [vmem:[#allocation51_spill] sm:$0xff] }
 0x466   :  { %1418 = vmatprep.subr.mxu0 %v5397_v16  ;;  %1489 = vmatprep.subr.mxu1 %v5400_v17  ;;  %v5415_v16 = vld [vmem:[#allocation6] sm:$0xff]  ;;  %v5419_v17 = vld [vmem:[#allocation6 + $0x10] sm:$0xff] }
 0x467   :  { %1419 = vmatpush1.msra.mxu0 %v5403_v19  ;;  %1490 = vmatpush1.msra.mxu1 %v5406_v21  ;;  %7014 = vst [vmem:[#allocation33_spill] sm:$0xff] %v5415_v16  ;;  %7015 = vst [vmem:[#allocation34_spill] sm:$0xff] %v5419_v17  ;;  %v7016_v21 = vld [vmem:[#allocation49_spill] sm:$0xff] }
 0x468   :  { %1420 = vmatprep.subr.mxu0 %v5409_v22  ;;  %1491 = vmatprep.subr.mxu1 %v5412_v23 }
 0x469   :  { %1421 = vmatpush1.msra.mxu0 %v5415_v16  ;;  %1454 = vmatprep.mubr.f32.mxu0 %v6981_v30 }
 0x46a   :  { %1492 = vmatpush1.msra.mxu1 %v5419_v17  ;;  %1525 = vmatprep.mubr.f32.mxu1 %v6981_v30 }
 0x46b   :  { %1569 = vmatprep.subr.mxu0 %v5139_v32  ;;  %1640 = vmatprep.subr.mxu1 %v5142_v33 }
 0x50a   :  { %v1277_v22 = vpop.f32.mrf.mxu0  ;;  %v1348_v16 = vpop.f32.mrf.mxu1 }
 0x50b   :  { %v1353_v19 = vadd.f32 %v1277_v22, %v7016_v21  ;;  %v1355_v30 = vadd.f32 %v1348_v16, %v7019_v61  ;;  %v7026_v16 = vld [vmem:[#allocation23_spill] sm:$0xff] }
 0x50c   :  { %v1279_v23 = vpop.f32.mrf.mxu0  ;;  %v1350_v8 = vpop.f32.mrf.mxu1 }
 0x50d   :  { %v3880_v15 = vmul.f32 -1.442695, %v1353_v19  ;;  %v1354_v13 = vadd.f32 %v1279_v23, %v7017_v14  ;;  %v1356_v17 = vadd.f32 %v1350_v8, %v7018_v59  ;;  %v7025_v8 = vld [vmem:[#allocation22_spill] sm:$0xff] }
 0x50f   :  { %4043 = vpow2.f32 %v3880_v15  ;;  %v3881_v12 = vmul.f32 -1.442695, %v1354_v13  ;;  %v3882_v63 = vmul.f32 -1.442695, %v1356_v17  ;;  %v7027_v17 = vld [vmem:[#allocation24_spill] sm:$0xff] }
 0x511   :  { %4045 = vpow2.f32 %v3881_v12 }
 0x512   :  { %4047 = vtanh.f32 %v1355_v30 }
 0x513   :  { %4049 = vpow2.f32 %v3882_v63  ;;  %v7024_v63 = vld [vmem:[#allocation21_spill] sm:$0xff] }
 0x51c   :  { %v4044_v32 = vpop.eup %4043 }
 0x51d   :  { %v1360_v57 = vadd.f32 1.0, %v4044_v32 }
 0x51e   :  { %v4046_v33 = vpop.eup %4045 }
 0x51f   :  { %4051 = vrcp.f32 %v1360_v57  ;;  %v1366_v21 = vadd.f32 1.0, %v4046_v33  ;;  %v4048_v19 = vpop.eup %4047  ;;  %v7021_v33 = vld [vmem:[#allocation40_spill] sm:$0xff] }
 0x520   :  { %v4050_v23 = vpop.eup %4049  ;;  %v7023_v57 = vld [vmem:[#allocation20_spill] sm:$0xff] }
 0x521   :  { %4053 = vrcp.f32 %v1366_v21  ;;  %v1373_v12 = vadd.f32 1.0, %v4050_v23  ;;  %v7028_v21 = vld [vmem:[#allocation25_spill] sm:$0xff]  ;;  %v7030_v23 = vld [vmem:[#allocation27_spill] sm:$0xff] }
 0x523   :  { %4055 = vrcp.f32 %v1373_v12  ;;  %v7034_v12 = vld [vmem:[#allocation31_spill] sm:$0xff] }
 0x52c   :  { %v4052_v14 = vpop.eup %4051 }
 0x52d   :  { %v1377_v15 = vmul.f32 %v4052_v14, %v4048_v19  ;;  %v7029_v19 = vld [vmem:[#allocation26_spill] sm:$0xff]  ;;  %v7031_v14 = vld [vmem:[#allocation28_spill] sm:$0xff] }
 0x52e   :  { %v4054_v13 = vpop.eup %4053 }
 0x52f   :  { %v1376_v22 = vmul.f32 %v4054_v13, %v5280_v20  ;;  %v7022_v20 = vld [vmem:[#allocation38_spill] sm:$0xff] }
 0x530   :  { %v4056_v32 = vpop.eup %4055  ;;  %v7033_v13 = vld [vmem:[#allocation30_spill] sm:$0xff] }
 0x531   :  { %v5430_v59 = vadd.f32 %v1377_v15, %v1376_v22  ;;  %v7032_v15 = vld [vmem:[#allocation29_spill] sm:$0xff]  ;;  %v7035_v22 = vld [vmem:[#allocation32_spill] sm:$0xff] }
 0x533   :  { %4057 = vtanh.f32 %v5430_v59 }
 0x540   :  { %v4058_v30 = vpop.eup %4057 }
 0x541   :  { %v5433_v61 = vmul.f32 %v4058_v30, %v4056_v32  ;;  %v7036_v32 = vld [vmem:[#allocation33_spill] sm:$0xff]  ;;  %v7037_v30 = vmov 0.0  }
 0x543   :  { %7020 = vst [vmem:[#allocation35_spill] sm:$0xff] %v5433_v61  ;;  %1455 = vmatmul.mubr.f32.vlgmr.msra.gmra.mxu0 %v5433_v61  ;;  %1526 = vmatmul.mubr.f32.vlgmr.msra.gmra.mxu1 %v5433_v61  ;;  %v7038_v61 = vld [vmem:[#allocation34_spill] sm:$0xff] }
 0x544   :  { %1570 = vmatpush1.msra.mxu0 %v5157_v7  ;;  %1641 = vmatpush1.msra.mxu1 %v5160_v60 }
 0x545   :  { %1571 = vmatprep.subr.mxu0 %v5163_v5  ;;  %1642 = vmatprep.subr.mxu1 %v5166_v62 }
 0x546   :  { %1572 = vmatpush1.msra.mxu0 %v5169_v27  ;;  %1643 = vmatpush1.msra.mxu1 %v5172_v10 }
 0x547   :  { %1573 = vmatprep.subr.mxu0 %v5175_v4  ;;  %1644 = vmatprep.subr.mxu1 %v5178_v3 }
 0x548   :  { %1574 = vmatpush1.msra.mxu0 %v5181_v0  ;;  %1645 = vmatpush1.msra.mxu1 %v5184_v11 }
 0x549   :  { %1575 = vmatprep.subr.mxu0 %v5187_v36  ;;  %1646 = vmatprep.subr.mxu1 %v5190_v54 }
 0x54a   :  { %1576 = vmatpush1.msra.mxu0 %v5193_v58  ;;  %1647 = vmatpush1.msra.mxu1 %v5196_v2 }
 0x54b   :  { %1577 = vmatprep.subr.mxu0 %v5199_v1  ;;  %1648 = vmatprep.subr.mxu1 %v5202_v45 }
 0x54c   :  { %1578 = vmatpush1.msra.mxu0 %v5205_v6  ;;  %1649 = vmatpush1.msra.mxu1 %v5208_v34 }
 0x54d   :  { %1579 = vmatprep.subr.mxu0 %v6997_v24  ;;  %1650 = vmatprep.subr.mxu1 %v6998_v25 }
 0x54e   :  { %1580 = vmatpush1.msra.mxu0 %v5217_v39  ;;  %1651 = vmatpush1.msra.mxu1 %v5220_v40 }
 0x54f   :  { %1581 = vmatprep.subr.mxu0 %v5223_v9  ;;  %1652 = vmatprep.subr.mxu1 %v5226_v18 }
 0x550   :  { %1582 = vmatpush1.msra.mxu0 %v5229_v35  ;;  %1653 = vmatpush1.msra.mxu1 %v5232_v37 }
 0x551   :  { %1583 = vmatprep.subr.mxu0 %v5313_v26  ;;  %1654 = vmatprep.subr.mxu1 %v5316_v28 }
 0x552   :  { %1584 = vmatpush1.msra.mxu0 %v5319_v29  ;;  %1655 = vmatpush1.msra.mxu1 %v5322_v31 }
 0x553   :  { %1585 = vmatprep.subr.mxu0 %v5325_v38  ;;  %1656 = vmatprep.subr.mxu1 %v5328_v41 }
 0x554   :  { %1586 = vmatpush1.msra.mxu0 %v5331_v42  ;;  %1657 = vmatpush1.msra.mxu1 %v5334_v43 }
 0x555   :  { %1587 = vmatprep.subr.mxu0 %v5337_v44  ;;  %1658 = vmatprep.subr.mxu1 %v5340_v46 }
 0x556   :  { %1588 = vmatpush1.msra.mxu0 %v5343_v47  ;;  %1659 = vmatpush1.msra.mxu1 %v5346_v48 }
 0x557   :  { %1589 = vmatprep.subr.mxu0 %v5349_v49  ;;  %1660 = vmatprep.subr.mxu1 %v5352_v50 }
 0x558   :  { %1590 = vmatpush1.msra.mxu0 %v5355_v51  ;;  %1661 = vmatpush1.msra.mxu1 %v5358_v52 }
 0x559   :  { %1591 = vmatprep.subr.mxu0 %v5361_v53  ;;  %1662 = vmatprep.subr.mxu1 %v5364_v55 }
 0x55a   :  { %1592 = vmatpush1.msra.mxu0 %v5367_v56  ;;  %1663 = vmatpush1.msra.mxu1 %v7021_v33 }
 0x55b   :  { %1593 = vmatprep.subr.mxu0 %v7022_v20  ;;  %1664 = vmatprep.subr.mxu1 %v7023_v57  ;;  %v7044_v57 = vld [vmem:[#allocation54_spill] sm:$0xff] }
 0x55c   :  { %1594 = vmatpush1.msra.mxu0 %v7024_v63  ;;  %1665 = vmatpush1.msra.mxu1 %v7025_v8  ;;  %v7043_v63 = vld [vmem:[#allocation56_spill] sm:$0xff] }
 0x55d   :  { %1595 = vmatprep.subr.mxu0 %v7026_v16  ;;  %1666 = vmatprep.subr.mxu1 %v7027_v17 }
 0x55e   :  { %1596 = vmatpush1.msra.mxu0 %v7028_v21  ;;  %1667 = vmatpush1.msra.mxu1 %v7029_v19  ;;  %v7039_v19 = vld [vmem:[#allocation17_spill] sm:$0xff] }
 0x55f   :  { %1597 = vmatprep.subr.mxu0 %v7030_v23  ;;  %1668 = vmatprep.subr.mxu1 %v7031_v14  ;;  %v7040_v23 = vld [vmem:[#allocation18_spill] sm:$0xff] }
 0x560   :  { %1598 = vmatpush1.msra.mxu0 %v7032_v15  ;;  %1669 = vmatpush1.msra.mxu1 %v7033_v13  ;;  %v7041_v15 = vld [vmem:[#allocation53_spill] sm:$0xff] }
 0x561   :  { %1599 = vmatprep.subr.mxu0 %v7034_v12  ;;  %1670 = vmatprep.subr.mxu1 %v7035_v22  ;;  %v7042_v12 = vld [vmem:[#allocation55_spill] sm:$0xff] }
 0x562   :  { %1600 = vmatpush1.msra.mxu0 %v7036_v32  ;;  %1633 = vmatprep.mubr.f32.mxu0 %v7037_v30 }
 0x563   :  { %1671 = vmatpush1.msra.mxu1 %v7038_v61  ;;  %1704 = vmatprep.mubr.f32.mxu1 %v7037_v30 }
 0x564   :  { %1748 = vmatprep.subr.mxu0 %v7039_v19  ;;  %1819 = vmatprep.subr.mxu1 %v7040_v23 }
 0x603   :  { %v1456_v14 = vpop.f32.mrf.mxu0  ;;  %v1527_v22 = vpop.f32.mrf.mxu1 }
 0x604   :  { %v1532_v21 = vadd.f32 %v1456_v14, %v7041_v15  ;;  %v1534_v30 = vadd.f32 %v1527_v22, %v7044_v57 }
 0x605   :  { %v1458_v13 = vpop.f32.mrf.mxu0  ;;  %v1529_v8 = vpop.f32.mrf.mxu1 }
 0x606   :  { %v3883_v17 = vmul.f32 -1.442695, %v1532_v21  ;;  %v1533_v16 = vadd.f32 %v1458_v13, %v7042_v12  ;;  %v1535_v61 = vadd.f32 %v1529_v8, %v7043_v63 }
 0x608   :  { %4059 = vpow2.f32 %v3883_v17  ;;  %v3884_v32 = vmul.f32 -1.442695, %v1533_v16  ;;  %v3885_v20 = vmul.f32 -1.442695, %v1535_v61 }
 0x60a   :  { %4061 = vpow2.f32 %v3884_v32 }
 0x60b   :  { %4063 = vtanh.f32 %v1534_v30 }
 0x60c   :  { %4065 = vpow2.f32 %v3885_v20 }
 0x615   :  { %v4060_v19 = vpop.eup %4059 }
 0x616   :  { %v1539_v33 = vadd.f32 1.0, %v4060_v19  ;;  %v1982_v19 = vld [vmem:[#allocation8 + $0x1e0] sm:$0xff] }
 0x617   :  { %v4062_v23 = vpop.eup %4061 }
 0x618   :  { %4067 = vrcp.f32 %v1539_v33  ;;  %v1545_v14 = vadd.f32 1.0, %v4062_v23  ;;  %v4064_v21 = vpop.eup %4063  ;;  %v1984_v23 = vld [vmem:[#allocation8 + $0x1f0] sm:$0xff] }
 0x619   :  { %v4066_v15 = vpop.eup %4065 }
 0x61a   :  { %4069 = vrcp.f32 %v1545_v14  ;;  %v1552_v12 = vadd.f32 1.0, %v4066_v15  ;;  %v1979_v14 = vld [vmem:[#allocation8 + $0x1c8] sm:$0xff]  ;;  %v1978_v15 = vld [vmem:[#allocation8 + $0x1c0] sm:$0xff] }
 0x61c   :  { %4071 = vrcp.f32 %v1552_v12  ;;  %v1974_v12 = vld [vmem:[#allocation8 + $0x1a0] sm:$0xff] }
 0x625   :  { %v4068_v17 = vpop.eup %4067 }
 0x626   :  { %v1556_v13 = vmul.f32 %v4068_v17, %v4064_v21  ;;  %v1981_v21 = vld [vmem:[#allocation8 + $0x1d8] sm:$0xff]  ;;  %v1980_v17 = vld [vmem:[#allocation8 + $0x1d0] sm:$0xff] }
 0x627   :  { %v4070_v16 = vpop.eup %4069 }
 0x628   :  { %v1555_v32 = vmul.f32 %v4070_v16, %v5430_v59  ;;  %v1977_v16 = vld [vmem:[#allocation8 + $0x1b8] sm:$0xff] }
 0x629   :  { %v4072_v61 = vpop.eup %4071 }
 0x62a   :  { %v5508_v63 = vadd.f32 %v1556_v13, %v1555_v32  ;;  %v1975_v13 = vld [vmem:[#allocation8 + $0x1a8] sm:$0xff]  ;;  %v1976_v32 = vld [vmem:[#allocation8 + $0x1b0] sm:$0xff] }
 0x62c   :  { %4073 = vtanh.f32 %v5508_v63 }
 0x639   :  { %v4074_v57 = vpop.eup %4073 }
 0x63a   :  { %v5511_v8 = vmul.f32 %v4074_v57, %v4072_v61  ;;  %v1973_v61 = vld [vmem:[#allocation8 + $0x198] sm:$0xff]  ;;  %v1970_v57 = vld [vmem:[#allocation8 + $0x180] sm:$0xff] }
 0x63c   :  { %1634 = vmatmul.mubr.f32.vlgmr.msra.gmra.mxu0 %v5511_v8  ;;  %1705 = vmatmul.mubr.f32.vlgmr.msra.gmra.mxu1 %v5511_v8 }
 0x63d   :  { %1749 = vmatpush1.msra.mxu0 %v5157_v7  ;;  %1820 = vmatpush1.msra.mxu1 %v5160_v60  ;;  %v7047_v7 = vld [vmem:[#allocation20_spill] sm:$0xff]  ;;  %v7048_v60 = vld [vmem:[#allocation21_spill] sm:$0xff] }
 0x63e   :  { %1750 = vmatprep.subr.mxu0 %v5163_v5  ;;  %1821 = vmatprep.subr.mxu1 %v5166_v62  ;;  %v7049_v5 = vld [vmem:[#allocation22_spill] sm:$0xff]  ;;  %v7050_v62 = vld [vmem:[#allocation23_spill] sm:$0xff] }
 0x63f   :  { %1751 = vmatpush1.msra.mxu0 %v5169_v27  ;;  %1822 = vmatpush1.msra.mxu1 %v5172_v10  ;;  %v7051_v27 = vld [vmem:[#allocation24_spill] sm:$0xff]  ;;  %v7052_v10 = vld [vmem:[#allocation25_spill] sm:$0xff] }
 0x640   :  { %1752 = vmatprep.subr.mxu0 %v5175_v4  ;;  %1823 = vmatprep.subr.mxu1 %v5178_v3  ;;  %v7053_v4 = vld [vmem:[#allocation26_spill] sm:$0xff]  ;;  %v7054_v3 = vld [vmem:[#allocation27_spill] sm:$0xff] }
 0x641   :  { %1753 = vmatpush1.msra.mxu0 %v5181_v0  ;;  %1824 = vmatpush1.msra.mxu1 %v5184_v11  ;;  %v7055_v0 = vld [vmem:[#allocation28_spill] sm:$0xff]  ;;  %v7056_v11 = vld [vmem:[#allocation29_spill] sm:$0xff] }
 0x642   :  { %1754 = vmatprep.subr.mxu0 %v5187_v36  ;;  %1825 = vmatprep.subr.mxu1 %v5190_v54  ;;  %v7057_v36 = vld [vmem:[#allocation30_spill] sm:$0xff]  ;;  %v7058_v54 = vld [vmem:[#allocation31_spill] sm:$0xff] }
 0x643   :  { %1755 = vmatpush1.msra.mxu0 %v5193_v58  ;;  %1826 = vmatpush1.msra.mxu1 %v5196_v2  ;;  %v7059_v58 = vld [vmem:[#allocation32_spill] sm:$0xff]  ;;  %v7060_v2 = vld [vmem:[#allocation33_spill] sm:$0xff] }
 0x644   :  { %1756 = vmatprep.subr.mxu0 %v5199_v1  ;;  %1827 = vmatprep.subr.mxu1 %v5202_v45  ;;  %v7061_v1 = vld [vmem:[#allocation34_spill] sm:$0xff]  ;;  %v7062_v45 = vmov 0.0  }
 0x645   :  { %1757 = vmatpush1.msra.mxu0 %v5205_v6  ;;  %1828 = vmatpush1.msra.mxu1 %v5208_v34  ;;  %v1983_v6 = vld [vmem:[#allocation8 + $0x1e8] sm:$0xff]  ;;  %v1985_v34 = vld [vmem:[#allocation8 + $0x1f8] sm:$0xff] }
 0x646   :  { %1758 = vmatprep.subr.mxu0 %v6997_v24  ;;  %1829 = vmatprep.subr.mxu1 %v6998_v25  ;;  %v7064_v25 = vld [vmem:[#allocation59_spill] sm:$0xff] }
 0x647   :  { %1759 = vmatpush1.msra.mxu0 %v5217_v39  ;;  %1830 = vmatpush1.msra.mxu1 %v5220_v40 }
 0x648   :  { %1760 = vmatprep.subr.mxu0 %v5223_v9  ;;  %1831 = vmatprep.subr.mxu1 %v5226_v18  ;;  %v7045_v18 = vld [vmem:[#allocation40_spill] sm:$0xff]  ;;  %v7046_v9 = vld [vmem:[#allocation38_spill] sm:$0xff] }
 0x649   :  { %1761 = vmatpush1.msra.mxu0 %v5229_v35  ;;  %1832 = vmatpush1.msra.mxu1 %v5232_v37  ;;  %v7063_v37 = vld [vmem:[#allocation57_spill] sm:$0xff] }
 0x64a   :  { %1762 = vmatprep.subr.mxu0 %v5313_v26  ;;  %1833 = vmatprep.subr.mxu1 %v5316_v28 }
 0x64b   :  { %1763 = vmatpush1.msra.mxu0 %v5319_v29  ;;  %1834 = vmatpush1.msra.mxu1 %v5322_v31 }
 0x64c   :  { %1764 = vmatprep.subr.mxu0 %v5325_v38  ;;  %1835 = vmatprep.subr.mxu1 %v5328_v41  ;;  %v7065_v38 = vld [vmem:[#allocation60_spill] sm:$0xff] }
 0x64d   :  { %1765 = vmatpush1.msra.mxu0 %v5331_v42  ;;  %1836 = vmatpush1.msra.mxu1 %v5334_v43  ;;  %v7066_v42 = vld [vmem:[#allocation58_spill] sm:$0xff] }
 0x64e   :  { %1766 = vmatprep.subr.mxu0 %v5337_v44  ;;  %1837 = vmatprep.subr.mxu1 %v5340_v46 }
 0x64f   :  { %1767 = vmatpush1.msra.mxu0 %v5343_v47  ;;  %1838 = vmatpush1.msra.mxu1 %v5346_v48 }
 0x650   :  { %1768 = vmatprep.subr.mxu0 %v5349_v49  ;;  %1839 = vmatprep.subr.mxu1 %v5352_v50 }
 0x651   :  { %1769 = vmatpush1.msra.mxu0 %v5355_v51  ;;  %1840 = vmatpush1.msra.mxu1 %v5358_v52 }
 0x652   :  { %1770 = vmatprep.subr.mxu0 %v5361_v53  ;;  %1841 = vmatprep.subr.mxu1 %v5364_v55 }
 0x653   :  { %1771 = vmatpush1.msra.mxu0 %v5367_v56  ;;  %1842 = vmatpush1.msra.mxu1 %v7045_v18  ;;  %v1972_v18 = vld [vmem:[#allocation8 + $0x190] sm:$0xff] }
 0x654   :  { %1772 = vmatprep.subr.mxu0 %v7046_v9  ;;  %1843 = vmatprep.subr.mxu1 %v7047_v7  ;;  %v1967_v9 = vld [vmem:[#allocation8 + $0x168] sm:$0xff]  ;;  %v1969_v7 = vld [vmem:[#allocation8 + $0x178] sm:$0xff] }
 0x655   :  { %1773 = vmatpush1.msra.mxu0 %v7048_v60  ;;  %1844 = vmatpush1.msra.mxu1 %v7049_v5  ;;  %v1966_v60 = vld [vmem:[#allocation8 + $0x160] sm:$0xff]  ;;  %v1968_v5 = vld [vmem:[#allocation8 + $0x170] sm:$0xff] }
 0x656   :  { %1774 = vmatprep.subr.mxu0 %v7050_v62  ;;  %1845 = vmatprep.subr.mxu1 %v7051_v27  ;;  %v1963_v62 = vld [vmem:[#allocation8 + $0x148] sm:$0xff]  ;;  %v1965_v27 = vld [vmem:[#allocation8 + $0x158] sm:$0xff] }
 0x657   :  { %1775 = vmatpush1.msra.mxu0 %v7052_v10  ;;  %1846 = vmatpush1.msra.mxu1 %v7053_v4  ;;  %v1962_v10 = vld [vmem:[#allocation8 + $0x140] sm:$0xff]  ;;  %v1964_v4 = vld [vmem:[#allocation8 + $0x150] sm:$0xff] }
 0x658   :  { %1776 = vmatprep.subr.mxu0 %v7054_v3  ;;  %1847 = vmatprep.subr.mxu1 %v7055_v0  ;;  %v1959_v3 = vld [vmem:[#allocation8 + $0x128] sm:$0xff]  ;;  %v1961_v0 = vld [vmem:[#allocation8 + $0x138] sm:$0xff] }
 0x659   :  { %1777 = vmatpush1.msra.mxu0 %v7056_v11  ;;  %1848 = vmatpush1.msra.mxu1 %v7057_v36  ;;  %v1958_v11 = vld [vmem:[#allocation8 + $0x120] sm:$0xff]  ;;  %v1960_v36 = vld [vmem:[#allocation8 + $0x130] sm:$0xff] }
 0x65a   :  { %1778 = vmatprep.subr.mxu0 %v7058_v54  ;;  %1849 = vmatprep.subr.mxu1 %v7059_v58  ;;  %v1955_v54 = vld [vmem:[#allocation8 + $0x108] sm:$0xff]  ;;  %v1957_v58 = vld [vmem:[#allocation8 + $0x118] sm:$0xff] }
 0x65b   :  { %1779 = vmatpush1.msra.mxu0 %v7060_v2  ;;  %1850 = vmatpush1.msra.mxu1 %v7061_v1  ;;  %v1954_v2 = vld [vmem:[#allocation8 + $0x100] sm:$0xff]  ;;  %v1956_v1 = vld [vmem:[#allocation8 + $0x110] sm:$0xff] }
 0x65c   :  { %1812 = vmatprep.mubr.f32.mxu0 %v7062_v45  ;;  %1883 = vmatprep.mubr.f32.mxu1 %v7062_v45 }
 0x65d   :  { %2082 = vmatprep.subr.mxu0 %v1983_v6  ;;  %2195 = vmatprep.subr.mxu1 %v1985_v34  ;;  %v1951_v6 = vld [vmem:[#allocation8 + $0xe8] sm:$0xff]  ;;  %v1953_v34 = vld [vmem:[#allocation8 + $0xf8] sm:$0xff] }
 0x6fc   :  { %v1635_v35 = vpop.f32.mrf.mxu0  ;;  %v1706_v28 = vpop.f32.mrf.mxu1 }
 0x6fd   :  { %v1711_v39 = vadd.f32 %v1635_v35, %v7063_v37  ;;  %v1713_v43 = vadd.f32 %v1706_v28, %v7066_v42  ;;  %v1950_v35 = vld [vmem:[#allocation8 + $0xe0] sm:$0xff]  ;;  %v1952_v37 = vld [vmem:[#allocation8 + $0xf0] sm:$0xff]  ;;  %v1945_v28 = vld [vmem:[#allocation8 + $0xb8] sm:$0xff] }
 0x6fe   :  { %v1637_v40 = vpop.f32.mrf.mxu0  ;;  %v1708_v31 = vpop.f32.mrf.mxu1  ;;  %v1938_v42 = vld [vmem:[#allocation8 + $0x80] sm:$0xff] }
 0x6ff   :  { %v3886_v24 = vmul.f32 -1.442695, %v1711_v39  ;;  %v1712_v26 = vadd.f32 %v1637_v40, %v7064_v25  ;;  %v1714_v41 = vadd.f32 %v1708_v31, %v7065_v38  ;;  %v1947_v39 = vld [vmem:[#allocation8 + $0xc8] sm:$0xff]  ;;  %v1949_v40 = vld [vmem:[#allocation8 + $0xd8] sm:$0xff]  ;;  %v1948_v25 = vld [vmem:[#allocation8 + $0xd0] sm:$0xff] }
 0x700   :  { %v1944_v31 = vld [vmem:[#allocation8 + $0xb0] sm:$0xff]  ;;  %v1939_v38 = vld [vmem:[#allocation8 + $0x88] sm:$0xff] }
 0x701   :  { %4075 = vpow2.f32 %v3886_v24  ;;  %v3887_v29 = vmul.f32 -1.442695, %v1712_v26  ;;  %v3888_v44 = vmul.f32 -1.442695, %v1714_v41  ;;  %v1946_v24 = vld [vmem:[#allocation8 + $0xc0] sm:$0xff]  ;;  %v1943_v26 = vld [vmem:[#allocation8 + $0xa8] sm:$0xff] }
 0x702   :  { %v1941_v41 = vld [vmem:[#allocation8 + $0x98] sm:$0xff] }
 0x703   :  { %4077 = vpow2.f32 %v3887_v29  ;;  %v1942_v29 = vld [vmem:[#allocation8 + $0xa0] sm:$0xff] }
 0x704   :  { %4079 = vtanh.f32 %v1713_v43  ;;  %v1940_v43 = vld [vmem:[#allocation8 + $0x90] sm:$0xff] }
 0x705   :  { %4081 = vpow2.f32 %v3888_v44  ;;  %v1935_v44 = vld [vmem:[#allocation8 + $0x68] sm:$0xff] }
 0x70e   :  { %v4076_v46 = vpop.eup %4075 }
 0x70f   :  { %v1718_v47 = vadd.f32 1.0, %v4076_v46  ;;  %v1937_v46 = vld [vmem:[#allocation8 + $0x78] sm:$0xff] }
 0x710   :  { %v4078_v48 = vpop.eup %4077 }
 0x711   :  { %4083 = vrcp.f32 %v1718_v47  ;;  %v1724_v49 = vadd.f32 1.0, %v4078_v48  ;;  %v4080_v50 = vpop.eup %4079  ;;  %v1934_v47 = vld [vmem:[#allocation8 + $0x60] sm:$0xff]  ;;  %v1936_v48 = vld [vmem:[#allocation8 + $0x70] sm:$0xff] }
 0x712   :  { %v4082_v51 = vpop.eup %4081 }
 0x713   :  { %4085 = vrcp.f32 %v1724_v49  ;;  %v1731_v56 = vadd.f32 1.0, %v4082_v51  ;;  %v1931_v49 = vld [vmem:[#allocation8 + $0x48] sm:$0xff]  ;;  %v1930_v51 = vld [vmem:[#allocation8 + $0x40] sm:$0xff] }
 0x715   :  { %4087 = vrcp.f32 %v1731_v56  ;;  %v1926_v56 = vld [vmem:[#allocation8 + $0x20] sm:$0xff] }
 0x71e   :  { %v4084_v52 = vpop.eup %4083 }
 0x71f   :  { %v1735_v53 = vmul.f32 %v4084_v52, %v4080_v50  ;;  %v1933_v50 = vld [vmem:[#allocation8 + $0x58] sm:$0xff]  ;;  %v1932_v52 = vld [vmem:[#allocation8 + $0x50] sm:$0xff] }
 0x720   :  { %v4086_v55 = vpop.eup %4085 }
 0x721   :  { %v1734_v59 = vmul.f32 %v4086_v55, %v5508_v63  ;;  %v1971_v63 = vld [vmem:[#allocation8 + $0x188] sm:$0xff]  ;;  %v1929_v55 = vld [vmem:[#allocation8 + $0x38] sm:$0xff] }
 0x722   :  { %v4088_v20 = vpop.eup %4087 }
 0x723   :  { %v5584_v33 = vadd.f32 %v1735_v53, %v1734_v59  ;;  %v1927_v53 = vld [vmem:[#allocation8 + $0x28] sm:$0xff]  ;;  %v1928_v59 = vld [vmem:[#allocation8 + $0x30] sm:$0xff] }
 0x725   :  { %4089 = vtanh.f32 %v5584_v33 }
 0x732   :  { %v4090_v22 = vpop.eup %4089 }
 0x733   :  { %v5587_v30 = vmul.f32 %v4090_v22, %v4088_v20  ;;  %v1923_v20 = vld [vmem:[#allocation8 + $0x8] sm:$0xff]  ;;  %v1925_v22 = vld [vmem:[#allocation8 + $0x18] sm:$0xff] }
 0x735   :  { %1813 = vmatmul.mubr.f32.vlgmr.msra.gmra.mxu0 %v5587_v30  ;;  %1884 = vmatmul.mubr.f32.vlgmr.msra.gmra.mxu1 %v5587_v30 }
 0x736   :  { %2083 = vmatpush1.msra.mxu0 %v1982_v19  ;;  %2196 = vmatpush1.msra.mxu1 %v1984_v23  ;;  %v1922_v19 = vld [vmem:[#allocation8] sm:$0xff]  ;;  %v1924_v23 = vld [vmem:[#allocation8 + $0x10] sm:$0xff] }
 0x737   :  { %2084 = vmatprep.subr.mxu0 %v1979_v14  ;;  %2197 = vmatprep.subr.mxu1 %v1981_v21  ;;  %v7067_v14 = vld [vmem:[#allocation65_spill] sm:$0xff]  ;;  %v7068_v21 = vld [vmem:[#allocation16_spill] sm:$0xff] }
 0x738   :  { %2085 = vmatpush1.msra.mxu0 %v1978_v15  ;;  %2198 = vmatpush1.msra.mxu1 %v1980_v17  ;;  %v7069_v15 = vld [vmem:[#allocation19_spill] sm:$0xff] }
 0x739   :  { %2086 = vmatprep.subr.mxu0 %v1975_v13  ;;  %2199 = vmatprep.subr.mxu1 %v1977_v16  ;;  %v7070_v17 = vld [vmem:[#allocation39_spill] sm:$0xff] }
 0x73a   :  { %2087 = vmatpush1.msra.mxu0 %v1974_v12  ;;  %2200 = vmatpush1.msra.mxu1 %v1976_v32  ;;  %v7071_v13 = vld [vmem:[#allocation35_spill] sm:$0xff]  ;;  %v5623_v12 = vld [vmem:[#allocation9 + $0x1f8] sm:$0xff]  ;;  %v5629_v32 = vld [vmem:[#allocation9 + $0x1f0] sm:$0xff] }
 0x73b   :  { %2088 = vmatprep.subr.mxu0 %v1971_v63  ;;  %2201 = vmatprep.subr.mxu1 %v1973_v61  ;;  %v5621_v16 = vld [vmem:[#allocation9 + $0x1e8] sm:$0xff]  ;;  %7073 = vst [vmem:[#allocation41_spill] sm:$0xff] %v5623_v12  ;;  %v5635_v63 = vld [vmem:[#allocation9 + $0x1d8] sm:$0xff]  ;;  %v5639_v61 = vld [vmem:[#allocation9 + $0x1c0] sm:$0xff] }
 0x73c   :  { %2089 = vmatpush1.msra.mxu0 %v1970_v57  ;;  %2202 = vmatpush1.msra.mxu1 %v1972_v18  ;;  %7072 = vst [vmem:[#allocation36_spill] sm:$0xff] %v5621_v16  ;;  %v5641_v57 = vld [vmem:[#allocation9 + $0x1d0] sm:$0xff]  ;;  %v5645_v18 = vld [vmem:[#allocation9 + $0x1a8] sm:$0xff] }
 0x73d   :  { %2090 = vmatprep.subr.mxu0 %v1967_v9  ;;  %2203 = vmatprep.subr.mxu1 %v1969_v7  ;;  %v5647_v9 = vld [vmem:[#allocation9 + $0x1b8] sm:$0xff]  ;;  %v5651_v7 = vld [vmem:[#allocation9 + $0x1a0] sm:$0xff] }
 0x73e   :  { %2091 = vmatpush1.msra.mxu0 %v1966_v60  ;;  %2204 = vmatpush1.msra.mxu1 %v1968_v5  ;;  %v5653_v60 = vld [vmem:[#allocation9 + $0x1b0] sm:$0xff]  ;;  %v5657_v5 = vld [vmem:[#allocation9 + $0x188] sm:$0xff] }
 0x73f   :  { %2092 = vmatprep.subr.mxu0 %v1963_v62  ;;  %2205 = vmatprep.subr.mxu1 %v1965_v27  ;;  %v5659_v62 = vld [vmem:[#allocation9 + $0x198] sm:$0xff]  ;;  %v5663_v27 = vld [vmem:[#allocation9 + $0x180] sm:$0xff] }
 0x740   :  { %2093 = vmatpush1.msra.mxu0 %v1962_v10  ;;  %2206 = vmatpush1.msra.mxu1 %v1964_v4  ;;  %v5665_v10 = vld [vmem:[#allocation9 + $0x190] sm:$0xff]  ;;  %v5669_v4 = vld [vmem:[#allocation9 + $0x168] sm:$0xff] }
 0x741   :  { %2094 = vmatprep.subr.mxu0 %v1959_v3  ;;  %2207 = vmatprep.subr.mxu1 %v1961_v0  ;;  %v5671_v3 = vld [vmem:[#allocation9 + $0x178] sm:$0xff]  ;;  %v5675_v0 = vld [vmem:[#allocation9 + $0x160] sm:$0xff] }
 0x742   :  { %2095 = vmatpush1.msra.mxu0 %v1958_v11  ;;  %2208 = vmatpush1.msra.mxu1 %v1960_v36  ;;  %v5677_v11 = vld [vmem:[#allocation9 + $0x170] sm:$0xff]  ;;  %v5681_v36 = vld [vmem:[#allocation9 + $0x148] sm:$0xff] }
 0x743   :  { %2096 = vmatprep.subr.mxu0 %v1955_v54  ;;  %2209 = vmatprep.subr.mxu1 %v1957_v58  ;;  %v5683_v54 = vld [vmem:[#allocation9 + $0x158] sm:$0xff]  ;;  %v5687_v58 = vld [vmem:[#allocation9 + $0x140] sm:$0xff] }
 0x744   :  { %2097 = vmatpush1.msra.mxu0 %v1954_v2  ;;  %2210 = vmatpush1.msra.mxu1 %v1956_v1  ;;  %v5689_v2 = vld [vmem:[#allocation9 + $0x150] sm:$0xff]  ;;  %v5693_v1 = vld [vmem:[#allocation9 + $0x128] sm:$0xff] }
 0x745   :  { %2098 = vmatprep.subr.mxu0 %v1951_v6  ;;  %2211 = vmatprep.subr.mxu1 %v1953_v34  ;;  %v5695_v6 = vld [vmem:[#allocation9 + $0x138] sm:$0xff]  ;;  %v5699_v34 = vld [vmem:[#allocation9 + $0x120] sm:$0xff] }
 0x746   :  { %2099 = vmatpush1.msra.mxu0 %v1950_v35  ;;  %2212 = vmatpush1.msra.mxu1 %v1952_v37  ;;  %v5701_v35 = vld [vmem:[#allocation9 + $0x130] sm:$0xff]  ;;  %v5705_v37 = vld [vmem:[#allocation9 + $0x108] sm:$0xff] }
 0x747   :  { %2100 = vmatprep.subr.mxu0 %v1947_v39  ;;  %2213 = vmatprep.subr.mxu1 %v1949_v40  ;;  %v5707_v39 = vld [vmem:[#allocation9 + $0x118] sm:$0xff]  ;;  %v5711_v40 = vld [vmem:[#allocation9 + $0x100] sm:$0xff] }
 0x748   :  { %2101 = vmatpush1.msra.mxu0 %v1946_v24  ;;  %2214 = vmatpush1.msra.mxu1 %v1948_v25  ;;  %v5713_v24 = vld [vmem:[#allocation9 + $0x110] sm:$0xff]  ;;  %v5717_v25 = vld [vmem:[#allocation9 + $0xe8] sm:$0xff] }
 0x749   :  { %2102 = vmatprep.subr.mxu0 %v1943_v26  ;;  %2215 = vmatprep.subr.mxu1 %v1945_v28  ;;  %v5719_v26 = vld [vmem:[#allocation9 + $0xf8] sm:$0xff]  ;;  %v5723_v28 = vld [vmem:[#allocation9 + $0xe0] sm:$0xff] }
 0x74a   :  { %2103 = vmatpush1.msra.mxu0 %v1942_v29  ;;  %2216 = vmatpush1.msra.mxu1 %v1944_v31  ;;  %v5725_v29 = vld [vmem:[#allocation9 + $0xf0] sm:$0xff]  ;;  %v5729_v31 = vld [vmem:[#allocation9 + $0xc8] sm:$0xff] }
 0x74b   :  { %2104 = vmatprep.subr.mxu0 %v1939_v38  ;;  %2217 = vmatprep.subr.mxu1 %v1941_v41  ;;  %v5731_v38 = vld [vmem:[#allocation9 + $0xd8] sm:$0xff]  ;;  %v5735_v41 = vld [vmem:[#allocation9 + $0xc0] sm:$0xff] }
 0x74c   :  { %2105 = vmatpush1.msra.mxu0 %v1938_v42  ;;  %2218 = vmatpush1.msra.mxu1 %v1940_v43  ;;  %v5737_v42 = vld [vmem:[#allocation9 + $0xd0] sm:$0xff]  ;;  %v5741_v43 = vld [vmem:[#allocation9 + $0xa8] sm:$0xff] }
 0x74d   :  { %2106 = vmatprep.subr.mxu0 %v1935_v44  ;;  %2219 = vmatprep.subr.mxu1 %v1937_v46  ;;  %v5743_v44 = vld [vmem:[#allocation9 + $0xb8] sm:$0xff]  ;;  %v5747_v46 = vld [vmem:[#allocation9 + $0xa0] sm:$0xff] }
 0x74e   :  { %2107 = vmatpush1.msra.mxu0 %v1934_v47  ;;  %2220 = vmatpush1.msra.mxu1 %v1936_v48  ;;  %v5749_v47 = vld [vmem:[#allocation9 + $0xb0] sm:$0xff]  ;;  %v5753_v48 = vld [vmem:[#allocation9 + $0x88] sm:$0xff] }
 0x74f   :  { %2108 = vmatprep.subr.mxu0 %v1931_v49  ;;  %2221 = vmatprep.subr.mxu1 %v1933_v50  ;;  %7074 = vst [vmem:[#allocation43_spill] sm:$0xff] %v5749_v47  ;;  %7075 = vst [vmem:[#allocation44_spill] sm:$0xff] %v5753_v48  ;;  %v5755_v49 = vld [vmem:[#allocation9 + $0x98] sm:$0xff]  ;;  %v5759_v50 = vld [vmem:[#allocation9 + $0x80] sm:$0xff] }
 0x750   :  { %2109 = vmatpush1.msra.mxu0 %v1930_v51  ;;  %2222 = vmatpush1.msra.mxu1 %v1932_v52  ;;  %7076 = vst [vmem:[#allocation42_spill] sm:$0xff] %v5755_v49  ;;  %7077 = vst [vmem:[#allocation45_spill] sm:$0xff] %v5759_v50  ;;  %v5761_v51 = vld [vmem:[#allocation9 + $0x90] sm:$0xff]  ;;  %v5765_v52 = vld [vmem:[#allocation9 + $0x68] sm:$0xff] }
 0x751   :  { %2110 = vmatprep.subr.mxu0 %v1927_v53  ;;  %2223 = vmatprep.subr.mxu1 %v1929_v55  ;;  %7078 = vst [vmem:[#allocation47_spill] sm:$0xff] %v5761_v51  ;;  %7079 = vst [vmem:[#allocation48_spill] sm:$0xff] %v5765_v52  ;;  %v5767_v53 = vld [vmem:[#allocation9 + $0x78] sm:$0xff]  ;;  %v5771_v55 = vld [vmem:[#allocation9 + $0x60] sm:$0xff] }
 0x752   :  { %2111 = vmatpush1.msra.mxu0 %v1926_v56  ;;  %2224 = vmatpush1.msra.mxu1 %v1928_v59  ;;  %7080 = vst [vmem:[#allocation46_spill] sm:$0xff] %v5767_v53  ;;  %7081 = vst [vmem:[#allocation14_spill] sm:$0xff] %v5771_v55  ;;  %v5773_v56 = vld [vmem:[#allocation9 + $0x70] sm:$0xff]  ;;  %v5777_v59 = vld [vmem:[#allocation9 + $0x48] sm:$0xff] }
 0x753   :  { %2112 = vmatprep.subr.mxu0 %v1923_v20  ;;  %2225 = vmatprep.subr.mxu1 %v1925_v22  ;;  %7082 = vst [vmem:[#allocation15_spill] sm:$0xff] %v5773_v56  ;;  %7083 = vst [vmem:[#allocation49_spill] sm:$0xff] %v5777_v59  ;;  %v5779_v20 = vld [vmem:[#allocation9 + $0x58] sm:$0xff]  ;;  %v5783_v22 = vld [vmem:[#allocation9 + $0x40] sm:$0xff] }
 0x754   :  { %2113 = vmatpush1.msra.mxu0 %v1922_v19  ;;  %2146 = vmatprep.mubr.f32.mxu0 %v7062_v45  ;;  %7084 = vst [vmem:[#allocation51_spill] sm:$0xff] %v5779_v20  ;;  %7085 = vst [vmem:[#allocation52_spill] sm:$0xff] %v5783_v22  ;;  %v5785_v19 = vld [vmem:[#allocation9 + $0x50] sm:$0xff] }
 0x755   :  { %2226 = vmatpush1.msra.mxu1 %v1924_v23  ;;  %2259 = vmatprep.mubr.f32.mxu1 %v7062_v45  ;;  %7086 = vst [vmem:[#allocation50_spill] sm:$0xff] %v5785_v19  ;;  %v5789_v23 = vld [vmem:[#allocation9 + $0x28] sm:$0xff] }
 0x756   :  { %2147 = vmatmul.mubr.f32.vlgmr.msra.gmra.mxu0 %v7067_v14  ;;  %2260 = vmatmul.mubr.f32.vlgmr.msra.gmra.mxu1 %v7067_v14  ;;  %7087 = vst [vmem:[#allocation17_spill] sm:$0xff] %v5789_v23  ;;  %v5791_v14 = vld [vmem:[#allocation9 + $0x38] sm:$0xff] }
 0x757   :  { %2152 = vmatprep.mubr.f32.mxu0 %v7062_v45  ;;  %2265 = vmatprep.mubr.f32.mxu1 %v7062_v45  ;;  %7088 = vst [vmem:[#allocation18_spill] sm:$0xff] %v5791_v14 }
 0x758   :  { %2344 = vmatprep.subr.mxu0 %v5621_v16  ;;  %2415 = vmatprep.subr.mxu1 %v5623_v12 }
 0x759   :  { %2416 = vmatpush1.msra.mxu1 %v5629_v32 }
 0x75a   :  { %2153 = vmatmul.mubr.f32.gmra.mxu0 %v7068_v21  ;;  %2266 = vmatmul.mubr.f32.gmra.mxu1 %v7068_v21  ;;  %v5795_v21 = vld [vmem:[#allocation9 + $0x20] sm:$0xff] }
 0x75b   :  { %2158 = vmatprep.mubr.f32.mxu0 %v7062_v45  ;;  %2271 = vmatprep.mubr.f32.mxu1 %v7062_v45  ;;  %7089 = vst [vmem:[#allocation53_spill] sm:$0xff] %v5795_v21 }
 0x75c   :  { %2417 = vmatprep.subr.mxu1 %v5635_v63 }
 0x75d   :  { %2418 = vmatpush1.msra.mxu1 %v5641_v57 }
 0x75e   :  { %2159 = vmatmul.mubr.f32.gmra.mxu0 %v7069_v15  ;;  %2272 = vmatmul.mubr.f32.gmra.mxu1 %v7069_v15  ;;  %v5797_v15 = vld [vmem:[#allocation9 + $0x30] sm:$0xff] }
 0x75f   :  { %2164 = vmatprep.mubr.f32.mxu0 %v7062_v45  ;;  %2277 = vmatprep.mubr.f32.mxu1 %v7062_v45  ;;  %7090 = vst [vmem:[#allocation55_spill] sm:$0xff] %v5797_v15 }
 0x760   :  { %2419 = vmatprep.subr.mxu1 %v5647_v9 }
 0x761   :  { %2420 = vmatpush1.msra.mxu1 %v5653_v60 }
 0x762   :  { %2165 = vmatmul.mubr.f32.gmra.mxu0 %v7070_v17  ;;  %2278 = vmatmul.mubr.f32.gmra.mxu1 %v7070_v17  ;;  %v5801_v17 = vld [vmem:[#allocation9 + $0x8] sm:$0xff] }
 0x763   :  { %2170 = vmatprep.mubr.f32.mxu0 %v7062_v45  ;;  %2283 = vmatprep.mubr.f32.mxu1 %v7062_v45  ;;  %7091 = vst [vmem:[#allocation56_spill] sm:$0xff] %v5801_v17 }
 0x764   :  { %2421 = vmatprep.subr.mxu1 %v5659_v62 }
 0x765   :  { %2422 = vmatpush1.msra.mxu1 %v5665_v10 }
 0x766   :  { %2171 = vmatmul.mubr.f32.gmra.mxu0 %v7071_v13  ;;  %2284 = vmatmul.mubr.f32.gmra.mxu1 %v7071_v13  ;;  %v5803_v13 = vld [vmem:[#allocation9 + $0x18] sm:$0xff] }
 0x767   :  { %2176 = vmatprep.mubr.f32.mxu0 %v7062_v45  ;;  %2289 = vmatprep.mubr.f32.mxu1 %v7062_v45  ;;  %7092 = vst [vmem:[#allocation54_spill] sm:$0xff] %v5803_v13 }
 0x768   :  { %2423 = vmatprep.subr.mxu1 %v5671_v3 }
 0x769   :  { %2424 = vmatpush1.msra.mxu1 %v5677_v11 }
 0x76a   :  { %2177 = vmatmul.mubr.f32.gmra.mxu0 %v5511_v8  ;;  %2290 = vmatmul.mubr.f32.gmra.mxu1 %v5511_v8  ;;  %v5627_v8 = vld [vmem:[#allocation9 + $0x1e0] sm:$0xff] }
 0x76b   :  { %2182 = vmatprep.mubr.f32.mxu0 %v7062_v45  ;;  %2295 = vmatprep.mubr.f32.mxu1 %v7062_v45 }
 0x76c   :  { %2345 = vmatpush1.msra.mxu0 %v5627_v8  ;;  %2425 = vmatprep.subr.mxu1 %v5683_v54 }
 0x76d   :  { %2426 = vmatpush1.msra.mxu1 %v5689_v2 }
 0x76e   :  { %2183 = vmatmul.mubr.f32.gmra.mxu0 %v5587_v30  ;;  %2296 = vmatmul.mubr.f32.gmra.mxu1 %v5587_v30  ;;  %v5633_v30 = vld [vmem:[#allocation9 + $0x1c8] sm:$0xff] }
 0x76f   :  { %2188 = vmatprep.mubr.f32.mxu0 %v7062_v45  ;;  %2301 = vmatprep.mubr.f32.mxu1 %v7062_v45 }
 0x770   :  { %2346 = vmatprep.subr.mxu0 %v5633_v30  ;;  %2427 = vmatprep.subr.mxu1 %v5695_v6 }
 0x771   :  { %2347 = vmatpush1.msra.mxu0 %v5639_v61  ;;  %2428 = vmatpush1.msra.mxu1 %v5701_v35 }
 0x772   :  { %2348 = vmatprep.subr.mxu0 %v5645_v18  ;;  %2429 = vmatprep.subr.mxu1 %v5707_v39 }
 0x773   :  { %2349 = vmatpush1.msra.mxu0 %v5651_v7  ;;  %2430 = vmatpush1.msra.mxu1 %v5713_v24 }
 0x774   :  { %2350 = vmatprep.subr.mxu0 %v5657_v5  ;;  %2431 = vmatprep.subr.mxu1 %v5719_v26 }
 0x775   :  { %2351 = vmatpush1.msra.mxu0 %v5663_v27  ;;  %2432 = vmatpush1.msra.mxu1 %v5725_v29 }
 0x776   :  { %2352 = vmatprep.subr.mxu0 %v5669_v4  ;;  %2433 = vmatprep.subr.mxu1 %v5731_v38 }
 0x777   :  { %2353 = vmatpush1.msra.mxu0 %v5675_v0  ;;  %2434 = vmatpush1.msra.mxu1 %v5737_v42 }
 0x778   :  { %2354 = vmatprep.subr.mxu0 %v5681_v36  ;;  %2435 = vmatprep.subr.mxu1 %v5743_v44 }
 0x779   :  { %2355 = vmatpush1.msra.mxu0 %v5687_v58  ;;  %2436 = vmatpush1.msra.mxu1 %v5749_v47 }
 0x77a   :  { %2356 = vmatprep.subr.mxu0 %v5693_v1  ;;  %2437 = vmatprep.subr.mxu1 %v5755_v49 }
 0x77b   :  { %2357 = vmatpush1.msra.mxu0 %v5699_v34  ;;  %2438 = vmatpush1.msra.mxu1 %v5761_v51 }
 0x77c   :  { %2358 = vmatprep.subr.mxu0 %v5705_v37  ;;  %2439 = vmatprep.subr.mxu1 %v5767_v53  ;;  %v7097_v53 = vld [vmem:[#allocation64_spill] sm:$0xff] }
 0x77d   :  { %2359 = vmatpush1.msra.mxu0 %v5711_v40  ;;  %2440 = vmatpush1.msra.mxu1 %v5773_v56 }
 0x77e   :  { %2360 = vmatprep.subr.mxu0 %v5717_v25  ;;  %2441 = vmatprep.subr.mxu1 %v5779_v20 }
 0x77f   :  { %2361 = vmatpush1.msra.mxu0 %v5723_v28  ;;  %2442 = vmatpush1.msra.mxu1 %v5785_v19  ;;  %v5805_v19 = vld [vmem:[#allocation9] sm:$0xff] }
 0x780   :  { %2362 = vmatprep.subr.mxu0 %v5729_v31  ;;  %2443 = vmatprep.subr.mxu1 %v5791_v14  ;;  %7093 = vst [vmem:[#allocation40_spill] sm:$0xff] %v5805_v19 }
 0x781   :  { %2363 = vmatpush1.msra.mxu0 %v5735_v41  ;;  %2444 = vmatpush1.msra.mxu1 %v5797_v15 }
 0x782   :  { %2364 = vmatprep.subr.mxu0 %v5741_v43  ;;  %2445 = vmatprep.subr.mxu1 %v5803_v13 }
 0x783   :  { %2365 = vmatpush1.msra.mxu0 %v5747_v46 }
 0x784   :  { %2366 = vmatprep.subr.mxu0 %v5753_v48 }
 0x785   :  { %2367 = vmatpush1.msra.mxu0 %v5759_v50 }
 0x786   :  { %2368 = vmatprep.subr.mxu0 %v5765_v52  ;;  %v7098_v52 = vld [vmem:[#allocation62_spill] sm:$0xff] }
 0x787   :  { %2369 = vmatpush1.msra.mxu0 %v5771_v55 }
 0x788   :  { %2370 = vmatprep.subr.mxu0 %v5777_v59  ;;  %v7096_v59 = vld [vmem:[#allocation63_spill] sm:$0xff] }
 0x789   :  { %2371 = vmatpush1.msra.mxu0 %v5783_v22 }
 0x78a   :  { %2372 = vmatprep.subr.mxu0 %v5789_v23  ;;  %v5809_v23 = vld [vmem:[#allocation9 + $0x10] sm:$0xff] }
 0x78b   :  { %2373 = vmatpush1.msra.mxu0 %v5795_v21  ;;  %7094 = vst [vmem:[#allocation38_spill] sm:$0xff] %v5809_v23  ;;  %2446 = vmatpush1.msra.mxu1 %v5809_v23  ;;  %v7095_v21 = vld [vmem:[#allocation61_spill] sm:$0xff] }
 0x78c   :  { %2374 = vmatprep.subr.mxu0 %v5801_v17  ;;  %2589 = vmatprep.subr.mxu1 %v5623_v12 }
 0x78d   :  { %2375 = vmatpush1.msra.mxu0 %v5805_v19 }
 0x78e   :  { %2518 = vmatprep.subr.mxu0 %v5621_v16 }
 0x7f5   :  { %v1814_v15 = vpop.f32.mrf.mxu0  ;;  %v1885_v17 = vpop.f32.mrf.mxu1 }
 0x7f6   :  { %v1890_v14 = vadd.f32 %v1814_v15, %v7095_v21  ;;  %v1892_v23 = vadd.f32 %v1885_v17, %v7098_v52  ;;  %v7100_v52 = vld [vmem:[#allocation47_spill] sm:$0xff] }
 0x7f7   :  { %v1816_v22 = vpop.f32.mrf.mxu0  ;;  %v1887_v55 = vpop.f32.mrf.mxu1  ;;  %v7104_v17 = vld [vmem:[#allocation15_spill] sm:$0xff] }
 0x7f8   :  { %v3889_v20 = vmul.f32 -1.442695, %v1890_v14  ;;  %v1891_v56 = vadd.f32 %v1816_v22, %v7096_v59  ;;  %v1893_v19 = vadd.f32 %v1887_v55, %v7097_v53  ;;  %v7101_v55 = vld [vmem:[#allocation48_spill] sm:$0xff] }
 0x7fa   :  { %4091 = vpow2.f32 %v3889_v20  ;;  %v3890_v13 = vmul.f32 -1.442695, %v1891_v56  ;;  %v3891_v51 = vmul.f32 -1.442695, %v1893_v19  ;;  %v7102_v19 = vld [vmem:[#allocation46_spill] sm:$0xff] }
 0x7fc   :  { %4093 = vpow2.f32 %v3890_v13 }
 0x7fd   :  { %4095 = vtanh.f32 %v1892_v23  ;;  %v7103_v23 = vld [vmem:[#allocation14_spill] sm:$0xff] }
 0x7fe   :  { %4097 = vpow2.f32 %v3891_v51 }
 0x807   :  { %v4092_v16 = vpop.eup %4091 }
 0x808   :  { %v1897_v50 = vadd.f32 1.0, %v4092_v16 }
 0x809   :  { %v4094_v12 = vpop.eup %4093 }
 0x80a   :  { %4099 = vrcp.f32 %v1897_v50  ;;  %v1903_v21 = vadd.f32 1.0, %v4094_v12  ;;  %v4096_v14 = vpop.eup %4095  ;;  %v7099_v12 = vld [vmem:[#allocation45_spill] sm:$0xff] }
 0x80b   :  { %v4098_v59 = vpop.eup %4097 }
 0x80c   :  { %4101 = vrcp.f32 %v1903_v21  ;;  %v1910_v15 = vadd.f32 1.0, %v4098_v59  ;;  %v7105_v21 = vld [vmem:[#allocation49_spill] sm:$0xff]  ;;  %v7107_v59 = vld [vmem:[#allocation52_spill] sm:$0xff] }
 0x80e   :  { %4103 = vrcp.f32 %v1910_v15  ;;  %v7111_v15 = vld [vmem:[#allocation53_spill] sm:$0xff] }
 0x817   :  { %v4100_v20 = vpop.eup %4099 }
 0x818   :  { %v1914_v22 = vmul.f32 %v4100_v20, %v4096_v14  ;;  %v7106_v14 = vld [vmem:[#allocation51_spill] sm:$0xff]  ;;  %v7108_v20 = vld [vmem:[#allocation50_spill] sm:$0xff] }
 0x819   :  { %v4102_v56 = vpop.eup %4101 }
 0x81a   :  { %v1913_v13 = vmul.f32 %v4102_v56, %v5584_v33  ;;  %v2051_v33 = vld [vmem:[%s6671_s9] sm:$0xff] }
 0x81b   :  { %v4104_v16 = vpop.eup %4103  ;;  %v7110_v56 = vld [vmem:[#allocation18_spill] sm:$0xff] }
 0x81c   :  { %v1915_v53 = vadd.f32 %v1914_v22, %v1913_v13  ;;  %v7109_v22 = vld [vmem:[#allocation17_spill] sm:$0xff]  ;;  %v7112_v13 = vld [vmem:[#allocation55_spill] sm:$0xff] }
 0x81e   :  { %4105 = vtanh.f32 %v1915_v53  ;;  %1921 = vst [vmem:[%s6677_s15] sm:$0xff] %v1915_v53  ;;  %v7113_v53 = vld [vmem:[#allocation56_spill] sm:$0xff] }
 0x82b   :  { %v4106_v51 = vpop.eup %4105 }
 0x82c   :  { %v1917_v50 = vmul.f32 %v4106_v51, %v4104_v16  ;;  %v7114_v16 = vld [vmem:[#allocation54_spill] sm:$0xff]  ;;  %v7115_v51 = vld [vmem:[#allocation40_spill] sm:$0xff] }
 0x82e   :  { %1920 = vst [vmem:[%s6676_s14] sm:$0xff] %v1917_v50  ;;  %2189 = vmatmul.mubr.f32.gmra.mxu0 %v1917_v50  ;;  %2302 = vmatmul.mubr.f32.gmra.mxu1 %v1917_v50  ;;  %v7116_v50 = vld [vmem:[#allocation38_spill] sm:$0xff] }
 0x82f   :  { %2408 = vmatprep.mubr.f32.mxu0 %v7062_v45  ;;  %2479 = vmatprep.mubr.f32.mxu1 %v7062_v45 }
 0x832   :  { %2409 = vmatmul.mubr.f32.vlgmr.msra.gmra.mxu0 %v2051_v33  ;;  %2480 = vmatmul.mubr.f32.vlgmr.msra.gmra.mxu1 %v2051_v33  ;;  %v7117_v33 = vld [vmem:[#allocation36_spill] sm:$0xff] }
 0x833   :  { %2519 = vmatpush1.msra.mxu0 %v5627_v8  ;;  %2590 = vmatpush1.msra.mxu1 %v5629_v32 }
 0x834   :  { %2520 = vmatprep.subr.mxu0 %v5633_v30  ;;  %2591 = vmatprep.subr.mxu1 %v5635_v63 }
 0x835   :  { %2521 = vmatpush1.msra.mxu0 %v5639_v61  ;;  %2592 = vmatpush1.msra.mxu1 %v5641_v57 }
 0x836   :  { %2522 = vmatprep.subr.mxu0 %v5645_v18  ;;  %2593 = vmatprep.subr.mxu1 %v5647_v9 }
 0x837   :  { %2523 = vmatpush1.msra.mxu0 %v5651_v7  ;;  %2594 = vmatpush1.msra.mxu1 %v5653_v60 }
 0x838   :  { %2524 = vmatprep.subr.mxu0 %v5657_v5  ;;  %2595 = vmatprep.subr.mxu1 %v5659_v62 }
 0x839   :  { %2525 = vmatpush1.msra.mxu0 %v5663_v27  ;;  %2596 = vmatpush1.msra.mxu1 %v5665_v10 }
 0x83a   :  { %2526 = vmatprep.subr.mxu0 %v5669_v4  ;;  %2597 = vmatprep.subr.mxu1 %v5671_v3 }
 0x83b   :  { %2527 = vmatpush1.msra.mxu0 %v5675_v0  ;;  %2598 = vmatpush1.msra.mxu1 %v5677_v11 }
 0x83c   :  { %2528 = vmatprep.subr.mxu0 %v5681_v36  ;;  %2599 = vmatprep.subr.mxu1 %v5683_v54 }
 0x83d   :  { %2529 = vmatpush1.msra.mxu0 %v5687_v58  ;;  %2600 = vmatpush1.msra.mxu1 %v5689_v2 }
 0x83e   :  { %2530 = vmatprep.subr.mxu0 %v5693_v1  ;;  %2601 = vmatprep.subr.mxu1 %v5695_v6 }
 0x83f   :  { %2531 = vmatpush1.msra.mxu0 %v5699_v34  ;;  %2602 = vmatpush1.msra.mxu1 %v5701_v35 }
 0x840   :  { %2532 = vmatprep.subr.mxu0 %v5705_v37  ;;  %2603 = vmatprep.subr.mxu1 %v5707_v39 }
 0x841   :  { %2533 = vmatpush1.msra.mxu0 %v5711_v40  ;;  %2604 = vmatpush1.msra.mxu1 %v5713_v24 }
 0x842   :  { %2534 = vmatprep.subr.mxu0 %v5717_v25  ;;  %2605 = vmatprep.subr.mxu1 %v5719_v26 }
 0x843   :  { %2535 = vmatpush1.msra.mxu0 %v5723_v28  ;;  %2606 = vmatpush1.msra.mxu1 %v5725_v29 }
 0x844   :  { %2536 = vmatprep.subr.mxu0 %v5729_v31  ;;  %2607 = vmatprep.subr.mxu1 %v5731_v38 }
 0x845   :  { %2537 = vmatpush1.msra.mxu0 %v5735_v41  ;;  %2608 = vmatpush1.msra.mxu1 %v5737_v42 }
 0x846   :  { %2538 = vmatprep.subr.mxu0 %v5741_v43  ;;  %2609 = vmatprep.subr.mxu1 %v5743_v44 }
 0x847   :  { %2539 = vmatpush1.msra.mxu0 %v5747_v46  ;;  %2610 = vmatpush1.msra.mxu1 %v5749_v47 }
 0x848   :  { %2540 = vmatprep.subr.mxu0 %v5753_v48  ;;  %2611 = vmatprep.subr.mxu1 %v5755_v49 }
 0x849   :  { %2541 = vmatpush1.msra.mxu0 %v7099_v12  ;;  %2612 = vmatpush1.msra.mxu1 %v7100_v52 }
 0x84a   :  { %2542 = vmatprep.subr.mxu0 %v7101_v55  ;;  %2613 = vmatprep.subr.mxu1 %v7102_v19 }
 0x84b   :  { %2543 = vmatpush1.msra.mxu0 %v7103_v23  ;;  %2614 = vmatpush1.msra.mxu1 %v7104_v17 }
 0x84c   :  { %2544 = vmatprep.subr.mxu0 %v7105_v21  ;;  %2615 = vmatprep.subr.mxu1 %v7106_v14 }
 0x84d   :  { %2545 = vmatpush1.msra.mxu0 %v7107_v59  ;;  %2616 = vmatpush1.msra.mxu1 %v7108_v20 }
 0x84e   :  { %2546 = vmatprep.subr.mxu0 %v7109_v22  ;;  %2617 = vmatprep.subr.mxu1 %v7110_v56  ;;  %v7118_v22 = vld [vmem:[#allocation41_spill] sm:$0xff]  ;;  %v2148_v56 = vpop.f32.mrf.mxu0 }
 0x84f   :  { %2547 = vmatpush1.msra.mxu0 %v7111_v15  ;;  %2618 = vmatpush1.msra.mxu1 %v7112_v13  ;;  %v2261_v15 = vpop.f32.mrf.mxu1 }
 0x850   :  { %2548 = vmatprep.subr.mxu0 %v7113_v53  ;;  %2619 = vmatprep.subr.mxu1 %v7114_v16  ;;  %v2150_v20 = vpop.f32.mrf.mxu0 }
 0x851   :  { %2549 = vmatpush1.msra.mxu0 %v7115_v51  ;;  %2582 = vmatprep.mubr.f32.mxu0 %v7062_v45  ;;  %v2263_v13 = vpop.f32.mrf.mxu1 }
 0x852   :  { %2620 = vmatpush1.msra.mxu1 %v7116_v50  ;;  %2653 = vmatprep.mubr.f32.mxu1 %v7062_v45  ;;  %v5897_v59 = vpop.f32.mrf.mxu0 }
 0x853   :  { %2692 = vmatprep.subr.mxu0 %v7117_v33  ;;  %2763 = vmatprep.subr.mxu1 %v7118_v22  ;;  %7119 = vst [vmem:[#allocation20_spill] sm:$0xff] %v5897_v59  ;;  %v5899_v53 = vpop.f32.mrf.mxu1 }
 0x854   :  { %7120 = vst [vmem:[#allocation21_spill] sm:$0xff] %v5899_v53  ;;  %v5901_v16 = vpop.f32.mrf.mxu0 }
 0x855   :  { %7121 = vst [vmem:[#allocation22_spill] sm:$0xff] %v5901_v16  ;;  %v5903_v51 = vpop.f32.mrf.mxu1 }
 0x856   :  { %7122 = vst [vmem:[#allocation23_spill] sm:$0xff] %v5903_v51  ;;  %v5905_v14 = vpop.f32.mrf.mxu0 }
 0x857   :  { %7123 = vst [vmem:[#allocation24_spill] sm:$0xff] %v5905_v14  ;;  %v5907_v50 = vpop.f32.mrf.mxu1 }
 0x858   :  { %7124 = vst [vmem:[#allocation25_spill] sm:$0xff] %v5907_v50  ;;  %v5909_v45 = vpop.f32.mrf.mxu0 }
 0x859   :  { %7125 = vst [vmem:[#allocation26_spill] sm:$0xff] %v5909_v45  ;;  %v5911_v33 = vpop.f32.mrf.mxu1 }
 0x85a   :  { %7126 = vst [vmem:[#allocation27_spill] sm:$0xff] %v5911_v33  ;;  %v5913_v22 = vpop.f32.mrf.mxu0 }
 0x85b   :  { %7127 = vst [vmem:[#allocation28_spill] sm:$0xff] %v5913_v22  ;;  %v5915_v21 = vpop.f32.mrf.mxu1 }
 0x85c   :  { %7128 = vst [vmem:[#allocation29_spill] sm:$0xff] %v5915_v21  ;;  %v5917_v17 = vpop.f32.mrf.mxu0 }
 0x85d   :  { %7129 = vst [vmem:[#allocation30_spill] sm:$0xff] %v5917_v17  ;;  %v5919_v59 = vpop.f32.mrf.mxu1 }
 0x85e   :  { %7130 = vst [vmem:[#allocation31_spill] sm:$0xff] %v5919_v59  ;;  %v5921_v53 = vpop.f32.mrf.mxu0 }
 0x85f   :  { %7131 = vst [vmem:[#allocation32_spill] sm:$0xff] %v5921_v53  ;;  %v5923_v16 = vpop.f32.mrf.mxu1 }
 0x860   :  { %7132 = vst [vmem:[#allocation33_spill] sm:$0xff] %v5923_v16  ;;  %v5925_v51 = vpop.f32.mrf.mxu0  ;;  %v2050_v16 = vld [vmem:[%s6670_s8] sm:$0xf] }
 0x861   :  { %7133 = vst [vmem:[#allocation34_spill] sm:$0xff] %v5925_v51  ;;  %v5927_v14 = vpop.f32.mrf.mxu1  ;;  %v7142_v51 = vld [vmem:[#allocation37_spill] sm:$0xff] }
 0x862   :  { %7134 = vst [vmem:[#allocation57_spill] sm:$0xff] %v5927_v14  ;;  %v5929_v50 = vpop.f32.mrf.mxu0  ;;  %v7143_v14 = vsub.s32 0, %v7142_v51 }
 0x863   :  { %7135 = vst [vmem:[#allocation59_spill] sm:$0xff] %v5929_v50  ;;  %v5931_v45 = vpop.f32.mrf.mxu1 }
 0x864   :  { %7136 = vst [vmem:[#allocation60_spill] sm:$0xff] %v5931_v45  ;;  %v5933_v33 = vpop.f32.mrf.mxu0  ;;  %v5948_v59 = vrot.slane %v2050_v16, %v7143_v14 }
 0x865   :  { %7137 = vst [vmem:[#allocation58_spill] sm:$0xff] %v5933_v33  ;;  %v5935_v22 = vpop.f32.mrf.mxu1 }
 0x866   :  { %7138 = vst [vmem:[#allocation65_spill] sm:$0xff] %v5935_v22  ;;  %v5937_v21 = vpop.f32.mrf.mxu0  ;;  %7144 = vst [vmem:[#allocation35_spill] sm:$0xff] %v5948_v59  ;;  %v7147_v22 = vsub.s32 1, %v7142_v51  ;;  %v2149_v23 = vadd.f32 %v2148_v56, %v5948_v59 }
 0x867   :  { %7139 = vst [vmem:[#allocation16_spill] sm:$0xff] %v5937_v21  ;;  %v5939_v17 = vpop.f32.mrf.mxu1 }
 0x868   :  { %7140 = vst [vmem:[#allocation19_spill] sm:$0xff] %v5939_v17  ;;  %v5944_v53 = vpop.f32.mrf.mxu0  ;;  %v5956_v33 = vrot.slane %v2050_v16, %v7147_v22  ;;  %v7151_v22 = vsub.s32 3, %v7142_v51 }
 0x869   :  { %7141 = vst [vmem:[#allocation39_spill] sm:$0xff] %v5944_v53  ;;  %v5950_v50 = vpop.f32.mrf.mxu1 }
 0x86a   :  { %7145 = vst [vmem:[#allocation61_spill] sm:$0xff] %v5950_v50  ;;  %v2151_v53 = vadd.f32 %v2150_v20, %v5956_v33  ;;  %v5968_v48 = vrot.slane %v2050_v16, %v7151_v22 }
 0x86c   :  { %v2264_v56 = vadd.f32 %v2263_v13, %v5968_v48 }
 0x8ee   :  { %v5952_v45 = vpop.f32.mrf.mxu0  ;;  %v5958_v21 = vpop.f32.mrf.mxu1 }
 0x8ef   :  { %7146 = vst [vmem:[#allocation63_spill] sm:$0xff] %v5952_v45  ;;  %7148 = vst [vmem:[#allocation64_spill] sm:$0xff] %v5958_v21 }
 0x8f0   :  { %v5960_v17 = vpop.f32.mrf.mxu0  ;;  %v5964_v55 = vpop.f32.mrf.mxu1 }
 0x8f1   :  { %7149 = vst [vmem:[#allocation62_spill] sm:$0xff] %v5960_v17  ;;  %7150 = vst [vmem:[#allocation37_spill] sm:$0xff] %v5964_v55  ;;  %v7152_v17 = vsub.s32 2, %v7142_v51 }
 0x8f2   :  { %v2410_v19 = vpop.f32.mrf.mxu0  ;;  %v2481_v45 = vpop.f32.mrf.mxu1 }
 0x8f3   :  { %v2486_v14 = vadd.f32 %v2410_v19, %v2149_v23  ;;  %v5973_v20 = vrot.slane %v2050_v16, %v7152_v17  ;;  %v2052_v17 = vld [vmem:[%s6672_s10] sm:$0xff] }
 0x8f4   :  { %v2412_v52 = vpop.f32.mrf.mxu0  ;;  %v2483_v21 = vpop.f32.mrf.mxu1 }
 0x8f5   :  { %v3892_v50 = vmul.f32 -1.442695, %v2486_v14  ;;  %v2487_v12 = vadd.f32 %v2412_v52, %v2151_v53  ;;  %v2489_v55 = vadd.f32 %v2483_v21, %v2264_v56  ;;  %v2262_v19 = vadd.f32 %v2261_v15, %v5973_v20 }
 0x8f7   :  { %4107 = vpow2.f32 %v3892_v50  ;;  %v3893_v49 = vmul.f32 -1.442695, %v2487_v12  ;;  %v3894_v23 = vmul.f32 -1.442695, %v2489_v55  ;;  %v2488_v53 = vadd.f32 %v2481_v45, %v2262_v19 }
 0x8f9   :  { %4109 = vpow2.f32 %v3893_v49 }
 0x8fa   :  { %4111 = vpow2.f32 %v3894_v23  ;;  %v7153_v23 = vld [vmem:[#allocation44_spill] sm:$0xff] }
 0x904   :  { %v4108_v52 = vpop.eup %4107 }
 0x905   :  { %v2493_v50 = vadd.f32 1.0, %v4108_v52  ;;  %v7154_v52 = vld [vmem:[#allocation42_spill] sm:$0xff] }
 0x906   :  { %v4110_v12 = vpop.eup %4109 }
 0x907   :  { %4113 = vrcp.f32 %v2493_v50  ;;  %v2499_v14 = vadd.f32 1.0, %v4110_v12  ;;  %v4112_v49 = vpop.eup %4111  ;;  %v7156_v50 = vld [vmem:[#allocation47_spill] sm:$0xff]  ;;  %v7157_v12 = vld [vmem:[#allocation48_spill] sm:$0xff] }
 0x908   :  { %4115 = vtanh.f32 %v2488_v53  ;;  %v2506_v16 = vadd.f32 1.0, %v4112_v49  ;;  %v7155_v53 = vld [vmem:[#allocation45_spill] sm:$0xff]  ;;  %v7159_v49 = vld [vmem:[#allocation14_spill] sm:$0xff] }
 0x909   :  { %4117 = vrcp.f32 %v2499_v14  ;;  %v7158_v14 = vld [vmem:[#allocation46_spill] sm:$0xff] }
 0x90a   :  { %4119 = vrcp.f32 %v2506_v16  ;;  %v7164_v16 = vld [vmem:[#allocation50_spill] sm:$0xff] }
 0x914   :  { %v4114_v22 = vpop.eup %4113 }
 0x915   :  { %v4116_v13 = vpop.eup %4115 }
 0x916   :  { %v4118_v21 = vpop.eup %4117  ;;  %v2510_v15 = vmul.f32 %v4116_v13, %v4114_v22  ;;  %v7160_v22 = vld [vmem:[#allocation15_spill] sm:$0xff] }
 0x917   :  { %v2509_v55 = vmul.f32 %v4118_v21, %v2052_v17  ;;  %v4120_v45 = vpop.eup %4119  ;;  %v7161_v17 = vld [vmem:[#allocation49_spill] sm:$0xff]  ;;  %v7162_v13 = vld [vmem:[#allocation51_spill] sm:$0xff]  ;;  %v7163_v21 = vld [vmem:[#allocation52_spill] sm:$0xff] }
 0x919   :  { %v5979_v51 = vadd.f32 %v2510_v15, %v2509_v55  ;;  %v7165_v15 = vld [vmem:[#allocation17_spill] sm:$0xff]  ;;  %v7166_v55 = vld [vmem:[#allocation18_spill] sm:$0xff] }
 0x91b   :  { %4121 = vtanh.f32 %v5979_v51 }
 0x928   :  { %v4122_v56 = vpop.eup %4121 }
 0x929   :  { %v2513_v19 = vmul.f32 %v4122_v56, %v4120_v45  ;;  %v7167_v45 = vld [vmem:[#allocation53_spill] sm:$0xff]  ;;  %v7168_v56 = vld [vmem:[#allocation55_spill] sm:$0xff] }
 0x92b   :  { %2583 = vmatmul.mubr.f32.vlgmr.msra.gmra.mxu0 %v2513_v19  ;;  %2654 = vmatmul.mubr.f32.vlgmr.msra.gmra.mxu1 %v2513_v19  ;;  %v7169_v19 = vld [vmem:[#allocation56_spill] sm:$0xff] }
 0x92c   :  { %2693 = vmatpush1.msra.mxu0 %v5627_v8  ;;  %2764 = vmatpush1.msra.mxu1 %v5629_v32 }
 0x92d   :  { %2694 = vmatprep.subr.mxu0 %v5633_v30  ;;  %2765 = vmatprep.subr.mxu1 %v5635_v63 }
 0x92e   :  { %2695 = vmatpush1.msra.mxu0 %v5639_v61  ;;  %2766 = vmatpush1.msra.mxu1 %v5641_v57 }
 0x92f   :  { %2696 = vmatprep.subr.mxu0 %v5645_v18  ;;  %2767 = vmatprep.subr.mxu1 %v5647_v9 }
 0x930   :  { %2697 = vmatpush1.msra.mxu0 %v5651_v7  ;;  %2768 = vmatpush1.msra.mxu1 %v5653_v60 }
 0x931   :  { %2698 = vmatprep.subr.mxu0 %v5657_v5  ;;  %2769 = vmatprep.subr.mxu1 %v5659_v62 }
 0x932   :  { %2699 = vmatpush1.msra.mxu0 %v5663_v27  ;;  %2770 = vmatpush1.msra.mxu1 %v5665_v10 }
 0x933   :  { %2700 = vmatprep.subr.mxu0 %v5669_v4  ;;  %2771 = vmatprep.subr.mxu1 %v5671_v3 }
 0x934   :  { %2701 = vmatpush1.msra.mxu0 %v5675_v0  ;;  %2772 = vmatpush1.msra.mxu1 %v5677_v11 }
 0x935   :  { %2702 = vmatprep.subr.mxu0 %v5681_v36  ;;  %2773 = vmatprep.subr.mxu1 %v5683_v54 }
 0x936   :  { %2703 = vmatpush1.msra.mxu0 %v5687_v58  ;;  %2774 = vmatpush1.msra.mxu1 %v5689_v2 }
 0x937   :  { %2704 = vmatprep.subr.mxu0 %v5693_v1  ;;  %2775 = vmatprep.subr.mxu1 %v5695_v6 }
 0x938   :  { %2705 = vmatpush1.msra.mxu0 %v5699_v34  ;;  %2776 = vmatpush1.msra.mxu1 %v5701_v35 }
 0x939   :  { %2706 = vmatprep.subr.mxu0 %v5705_v37  ;;  %2777 = vmatprep.subr.mxu1 %v5707_v39 }
 0x93a   :  { %2707 = vmatpush1.msra.mxu0 %v5711_v40  ;;  %2778 = vmatpush1.msra.mxu1 %v5713_v24 }
 0x93b   :  { %2708 = vmatprep.subr.mxu0 %v5717_v25  ;;  %2779 = vmatprep.subr.mxu1 %v5719_v26 }
 0x93c   :  { %2709 = vmatpush1.msra.mxu0 %v5723_v28  ;;  %2780 = vmatpush1.msra.mxu1 %v5725_v29 }
 0x93d   :  { %2710 = vmatprep.subr.mxu0 %v5729_v31  ;;  %2781 = vmatprep.subr.mxu1 %v5731_v38 }
 0x93e   :  { %2711 = vmatpush1.msra.mxu0 %v5735_v41  ;;  %2782 = vmatpush1.msra.mxu1 %v5737_v42 }
 0x93f   :  { %2712 = vmatprep.subr.mxu0 %v5741_v43  ;;  %2783 = vmatprep.subr.mxu1 %v5743_v44 }
 0x940   :  { %2713 = vmatpush1.msra.mxu0 %v5747_v46  ;;  %2784 = vmatpush1.msra.mxu1 %v5749_v47 }
 0x941   :  { %2714 = vmatprep.subr.mxu0 %v7153_v23  ;;  %2785 = vmatprep.subr.mxu1 %v7154_v52  ;;  %v7179_v52 = vld [vmem:[#allocation21_spill] sm:$0xff] }
 0x942   :  { %2715 = vmatpush1.msra.mxu0 %v7155_v53  ;;  %2786 = vmatpush1.msra.mxu1 %v7156_v50 }
 0x943   :  { %2716 = vmatprep.subr.mxu0 %v7157_v12  ;;  %2787 = vmatprep.subr.mxu1 %v7158_v14 }
 0x944   :  { %2717 = vmatpush1.msra.mxu0 %v7159_v49  ;;  %2788 = vmatpush1.msra.mxu1 %v7160_v22  ;;  %v7170_v49 = vld [vmem:[#allocation54_spill] sm:$0xff]  ;;  %v7171_v22 = vld [vmem:[#allocation40_spill] sm:$0xff] }
 0x945   :  { %2718 = vmatprep.subr.mxu0 %v7161_v17  ;;  %2789 = vmatprep.subr.mxu1 %v7162_v13  ;;  %v7172_v17 = vmov 0.0   ;;  %v7173_v13 = vld [vmem:[#allocation38_spill] sm:$0xff] }
 0x946   :  { %2719 = vmatpush1.msra.mxu0 %v7163_v21  ;;  %2790 = vmatpush1.msra.mxu1 %v7164_v16  ;;  %v7174_v16 = vld [vmem:[#allocation36_spill] sm:$0xff] }
 0x947   :  { %2720 = vmatprep.subr.mxu0 %v7165_v15  ;;  %2791 = vmatprep.subr.mxu1 %v7166_v55  ;;  %v7175_v15 = vld [vmem:[#allocation41_spill] sm:$0xff] }
 0x948   :  { %2721 = vmatpush1.msra.mxu0 %v7167_v45  ;;  %2792 = vmatpush1.msra.mxu1 %v7168_v56  ;;  %v7176_v45 = vld [vmem:[#allocation20_spill] sm:$0xff] }
 0x949   :  { %2722 = vmatprep.subr.mxu0 %v7169_v19  ;;  %2793 = vmatprep.subr.mxu1 %v7170_v49  ;;  %v2155_v55 = vadd.f32 %v7176_v45, %v5948_v59  ;;  %v7177_v19 = vld [vmem:[#allocation22_spill] sm:$0xff]  ;;  %v2268_v45 = vadd.f32 %v7179_v52, %v5973_v20 }
 0x94a   :  { %2723 = vmatpush1.msra.mxu0 %v7171_v22  ;;  %2756 = vmatprep.mubr.f32.mxu0 %v7172_v17  ;;  %v2157_v21 = vadd.f32 %v7177_v19, %v5956_v33 }
 0x94b   :  { %2794 = vmatpush1.msra.mxu1 %v7173_v13  ;;  %2827 = vmatprep.mubr.f32.mxu1 %v7172_v17 }
 0x94c   :  { %2866 = vmatprep.subr.mxu0 %v7174_v16  ;;  %2937 = vmatprep.subr.mxu1 %v7175_v15  ;;  %v7178_v16 = vld [vmem:[#allocation23_spill] sm:$0xff] }
 0x94d   :  { %v2270_v53 = vadd.f32 %v7178_v16, %v5968_v48 }
 0x9eb   :  { %v2584_v56 = vpop.f32.mrf.mxu0  ;;  %v2655_v50 = vpop.f32.mrf.mxu1 }
 0x9ec   :  { %v2660_v49 = vadd.f32 %v2584_v56, %v2155_v55  ;;  %v2662_v59 = vadd.f32 %v2655_v50, %v2268_v45  ;;  %v7196_v50 = vld [vmem:[#allocation55_spill] sm:$0xff]  ;;  %v7198_v56 = vld [vmem:[#allocation54_spill] sm:$0xff]  ;;  %v7199_v45 = vld [vmem:[#allocation40_spill] sm:$0xff] }
 0x9ed   :  { %v2586_v14 = vpop.f32.mrf.mxu0  ;;  %v2657_v17 = vpop.f32.mrf.mxu1 }
 0x9ee   :  { %v3895_v22 = vmul.f32 -1.442695, %v2660_v49  ;;  %v2661_v12 = vadd.f32 %v2586_v14, %v2157_v21  ;;  %v2663_v15 = vadd.f32 %v2657_v17, %v2270_v53 }
 0x9f0   :  { %4123 = vpow2.f32 %v3895_v22  ;;  %v3896_v13 = vmul.f32 -1.442695, %v2661_v12  ;;  %v3897_v23 = vmul.f32 -1.442695, %v2663_v15  ;;  %v7197_v15 = vld [vmem:[#allocation56_spill] sm:$0xff] }
 0x9f2   :  { %4125 = vpow2.f32 %v3896_v13 }
 0x9f3   :  { %4127 = vtanh.f32 %v2662_v59 }
 0x9f4   :  { %4129 = vpow2.f32 %v3897_v23  ;;  %v7195_v23 = vld [vmem:[#allocation53_spill] sm:$0xff] }
 0x9fd   :  { %v4124_v47 = vpop.eup %4123 }
 0x9fe   :  { %v2667_v19 = vadd.f32 1.0, %v4124_v47 }
 0x9ff   :  { %v4126_v55 = vpop.eup %4125 }
 0xa00   :  { %4131 = vrcp.f32 %v2667_v19  ;;  %v2673_v14 = vadd.f32 1.0, %v4126_v55  ;;  %v4128_v12 = vpop.eup %4127  ;;  %v7200_v19 = vmov 0.0   ;;  %v7201_v55 = vld [vmem:[#allocation38_spill] sm:$0xff] }
 0xa01   :  { %v4130_v49 = vpop.eup %4129 }
 0xa02   :  { %4133 = vrcp.f32 %v2673_v14  ;;  %v2680_v16 = vadd.f32 1.0, %v4130_v49  ;;  %v7202_v14 = vld [vmem:[#allocation36_spill] sm:$0xff]  ;;  %v7204_v49 = vld [vmem:[#allocation35_spill] sm:$0xff] }
 0xa04   :  { %4135 = vrcp.f32 %v2680_v16  ;;  %v7206_v16 = vld [vmem:[#allocation26_spill] sm:$0xff] }
 0xa0d   :  { %v4132_v22 = vpop.eup %4131 }
 0xa0e   :  { %v2684_v13 = vmul.f32 %v4132_v22, %v4128_v12  ;;  %v7203_v12 = vld [vmem:[#allocation41_spill] sm:$0xff]  ;;  %v7205_v22 = vld [vmem:[#allocation24_spill] sm:$0xff] }
 0xa0f   :  { %v4134_v21 = vpop.eup %4133 }
 0xa10   :  { %v2683_v53 = vmul.f32 %v4134_v21, %v5979_v51  ;;  %v7194_v51 = vld [vmem:[#allocation18_spill] sm:$0xff] }
 0xa11   :  { %v4136_v47 = vpop.eup %4135 }
 0xa12   :  { %v6057_v17 = vadd.f32 %v2684_v13, %v2683_v53  ;;  %v2161_v13 = vadd.f32 %v7205_v22, %v7204_v49  ;;  %v2163_v53 = vadd.f32 %v7206_v16, %v5956_v33 }
 0xa14   :  { %4137 = vtanh.f32 %v6057_v17 }
 0xa21   :  { %v4138_v59 = vpop.eup %4137 }
 0xa22   :  { %v2687_v52 = vmul.f32 %v4138_v59, %v4136_v47 }
 0xa24   :  { %2757 = vmatmul.mubr.f32.vlgmr.msra.gmra.mxu0 %v2687_v52  ;;  %2828 = vmatmul.mubr.f32.vlgmr.msra.gmra.mxu1 %v2687_v52 }
 0xa25   :  { %2867 = vmatpush1.msra.mxu0 %v5627_v8  ;;  %2938 = vmatpush1.msra.mxu1 %v5629_v32  ;;  %v7180_v8 = vld [vmem:[#allocation43_spill] sm:$0xff]  ;;  %v7181_v32 = vld [vmem:[#allocation44_spill] sm:$0xff] }
 0xa26   :  { %2868 = vmatprep.subr.mxu0 %v5633_v30  ;;  %2939 = vmatprep.subr.mxu1 %v5635_v63  ;;  %v7182_v30 = vld [vmem:[#allocation42_spill] sm:$0xff]  ;;  %v7183_v63 = vld [vmem:[#allocation45_spill] sm:$0xff] }
 0xa27   :  { %2869 = vmatpush1.msra.mxu0 %v5639_v61  ;;  %2940 = vmatpush1.msra.mxu1 %v5641_v57  ;;  %v7184_v61 = vld [vmem:[#allocation47_spill] sm:$0xff]  ;;  %v7185_v57 = vld [vmem:[#allocation48_spill] sm:$0xff] }
 0xa28   :  { %2870 = vmatprep.subr.mxu0 %v5645_v18  ;;  %2941 = vmatprep.subr.mxu1 %v5647_v9  ;;  %v7186_v18 = vld [vmem:[#allocation46_spill] sm:$0xff] }
 0xa29   :  { %2871 = vmatpush1.msra.mxu0 %v5651_v7  ;;  %2942 = vmatpush1.msra.mxu1 %v5653_v60  ;;  %v7187_v9 = vld [vmem:[#allocation14_spill] sm:$0xff]  ;;  %v7188_v7 = vld [vmem:[#allocation15_spill] sm:$0xff]  ;;  %v7189_v60 = vld [vmem:[#allocation49_spill] sm:$0xff] }
 0xa2a   :  { %2872 = vmatprep.subr.mxu0 %v5657_v5  ;;  %2943 = vmatprep.subr.mxu1 %v5659_v62  ;;  %v7190_v5 = vld [vmem:[#allocation51_spill] sm:$0xff]  ;;  %v7191_v62 = vld [vmem:[#allocation52_spill] sm:$0xff] }
 0xa2b   :  { %2873 = vmatpush1.msra.mxu0 %v5663_v27  ;;  %2944 = vmatpush1.msra.mxu1 %v5665_v10  ;;  %v7192_v27 = vld [vmem:[#allocation50_spill] sm:$0xff]  ;;  %v7193_v10 = vld [vmem:[#allocation17_spill] sm:$0xff] }
 0xa2c   :  { %2874 = vmatprep.subr.mxu0 %v5669_v4  ;;  %2945 = vmatprep.subr.mxu1 %v5671_v3 }
 0xa2d   :  { %2875 = vmatpush1.msra.mxu0 %v5675_v0  ;;  %2946 = vmatpush1.msra.mxu1 %v5677_v11 }
 0xa2e   :  { %2876 = vmatprep.subr.mxu0 %v5681_v36  ;;  %2947 = vmatprep.subr.mxu1 %v5683_v54 }
 0xa2f   :  { %2877 = vmatpush1.msra.mxu0 %v5687_v58  ;;  %2948 = vmatpush1.msra.mxu1 %v5689_v2 }
 0xa30   :  { %2878 = vmatprep.subr.mxu0 %v5693_v1  ;;  %2949 = vmatprep.subr.mxu1 %v5695_v6 }
 0xa31   :  { %2879 = vmatpush1.msra.mxu0 %v5699_v34  ;;  %2950 = vmatpush1.msra.mxu1 %v5701_v35 }
 0xa32   :  { %2880 = vmatprep.subr.mxu0 %v5705_v37  ;;  %2951 = vmatprep.subr.mxu1 %v5707_v39 }
 0xa33   :  { %2881 = vmatpush1.msra.mxu0 %v5711_v40  ;;  %2952 = vmatpush1.msra.mxu1 %v5713_v24 }
 0xa34   :  { %2882 = vmatprep.subr.mxu0 %v5717_v25  ;;  %2953 = vmatprep.subr.mxu1 %v5719_v26 }
 0xa35   :  { %2883 = vmatpush1.msra.mxu0 %v5723_v28  ;;  %2954 = vmatpush1.msra.mxu1 %v5725_v29 }
 0xa36   :  { %2884 = vmatprep.subr.mxu0 %v5729_v31  ;;  %2955 = vmatprep.subr.mxu1 %v5731_v38 }
 0xa37   :  { %2885 = vmatpush1.msra.mxu0 %v5735_v41  ;;  %2956 = vmatpush1.msra.mxu1 %v5737_v42 }
 0xa38   :  { %2886 = vmatprep.subr.mxu0 %v5741_v43  ;;  %2957 = vmatprep.subr.mxu1 %v5743_v44 }
 0xa39   :  { %2887 = vmatpush1.msra.mxu0 %v5747_v46  ;;  %2958 = vmatpush1.msra.mxu1 %v7180_v8 }
 0xa3a   :  { %2888 = vmatprep.subr.mxu0 %v7181_v32  ;;  %2959 = vmatprep.subr.mxu1 %v7182_v30 }
 0xa3b   :  { %2889 = vmatpush1.msra.mxu0 %v7183_v63  ;;  %2960 = vmatpush1.msra.mxu1 %v7184_v61 }
 0xa3c   :  { %2890 = vmatprep.subr.mxu0 %v7185_v57  ;;  %2961 = vmatprep.subr.mxu1 %v7186_v18 }
 0xa3d   :  { %2891 = vmatpush1.msra.mxu0 %v7187_v9  ;;  %2962 = vmatpush1.msra.mxu1 %v7188_v7 }
 0xa3e   :  { %2892 = vmatprep.subr.mxu0 %v7189_v60  ;;  %2963 = vmatprep.subr.mxu1 %v7190_v5 }
 0xa3f   :  { %2893 = vmatpush1.msra.mxu0 %v7191_v62  ;;  %2964 = vmatpush1.msra.mxu1 %v7192_v27 }
 0xa40   :  { %2894 = vmatprep.subr.mxu0 %v7193_v10  ;;  %2965 = vmatprep.subr.mxu1 %v7194_v51 }
 0xa41   :  { %2895 = vmatpush1.msra.mxu0 %v7195_v23  ;;  %2966 = vmatpush1.msra.mxu1 %v7196_v50  ;;  %v7208_v50 = vld [vmem:[#allocation25_spill] sm:$0xff] }
 0xa42   :  { %2896 = vmatprep.subr.mxu0 %v7197_v15  ;;  %2967 = vmatprep.subr.mxu1 %v7198_v56  ;;  %v2274_v22 = vadd.f32 %v7208_v50, %v5973_v20 }
 0xa43   :  { %2897 = vmatpush1.msra.mxu0 %v7199_v45  ;;  %2930 = vmatprep.mubr.f32.mxu0 %v7200_v19 }
 0xa44   :  { %2968 = vmatpush1.msra.mxu1 %v7201_v55  ;;  %3001 = vmatprep.mubr.f32.mxu1 %v7200_v19 }
 0xa45   :  { %3040 = vmatprep.subr.mxu0 %v7202_v14  ;;  %3111 = vmatprep.subr.mxu1 %v7203_v12  ;;  %v7207_v14 = vld [vmem:[#allocation27_spill] sm:$0xff] }
 0xa46   :  { %v2276_v15 = vadd.f32 %v7207_v14, %v5968_v48  ;;  %v6144_v14 = vld [vmem:[#allocation9 + $0x1c8] sm:$0xff] }
 0xae4   :  { %v2758_v21 = vpop.f32.mrf.mxu0  ;;  %v2829_v56 = vpop.f32.mrf.mxu1 }
 0xae5   :  { %v2834_v47 = vadd.f32 %v2758_v21, %v2161_v13  ;;  %v2836_v49 = vadd.f32 %v2829_v56, %v2274_v22  ;;  %v6153_v22 = vld [vmem:[#allocation9 + $0x1d0] sm:$0xff] }
 0xae6   :  { %v2760_v59 = vpop.f32.mrf.mxu0  ;;  %v2831_v19 = vpop.f32.mrf.mxu1 }
 0xae7   :  { %v3898_v52 = vmul.f32 -1.442695, %v2834_v47  ;;  %v2835_v45 = vadd.f32 %v2760_v59, %v2163_v53  ;;  %v2837_v12 = vadd.f32 %v2831_v19, %v2276_v15 }
 0xae9   :  { %4139 = vpow2.f32 %v3898_v52  ;;  %v3899_v55 = vmul.f32 -1.442695, %v2835_v45  ;;  %v3900_v23 = vmul.f32 -1.442695, %v2837_v12  ;;  %v6150_v12 = vld [vmem:[#allocation9 + $0x1c0] sm:$0xff] }
 0xaeb   :  { %4141 = vpow2.f32 %v3899_v55 }
 0xaec   :  { %4143 = vtanh.f32 %v2836_v49  ;;  %v6141_v49 = vld [vmem:[#allocation9 + $0x1f0] sm:$0xff] }
 0xaed   :  { %4145 = vpow2.f32 %v3900_v23  ;;  %v6138_v23 = vld [vmem:[#allocation9 + $0x1e0] sm:$0xff] }
 0xaf6   :  { %v4140_v51 = vpop.eup %4139 }
 0xaf7   :  { %v2841_v16 = vadd.f32 1.0, %v4140_v51 }
 0xaf8   :  { %v4142_v13 = vpop.eup %4141 }
 0xaf9   :  { %4147 = vrcp.f32 %v2841_v16  ;;  %v2847_v21 = vadd.f32 1.0, %v4142_v13  ;;  %v4144_v45 = vpop.eup %4143  ;;  %v6156_v16 = vld [vmem:[#allocation9 + $0x1a8] sm:$0xff]  ;;  %v6159_v13 = vld [vmem:[#allocation9 + $0x1b8] sm:$0xff] }
 0xafa   :  { %v4146_v55 = vpop.eup %4145 }
 0xafb   :  { %4149 = vrcp.f32 %v2847_v21  ;;  %v2854_v52 = vadd.f32 1.0, %v4146_v55  ;;  %v6162_v21 = vld [vmem:[#allocation9 + $0x1a0] sm:$0xff]  ;;  %v6168_v55 = vld [vmem:[#allocation9 + $0x188] sm:$0xff] }
 0xafd   :  { %4151 = vrcp.f32 %v2854_v52 }
 0xb06   :  { %v4148_v53 = vpop.eup %4147 }
 0xb07   :  { %v2858_v47 = vmul.f32 %v4148_v53, %v4144_v45  ;;  %v6165_v45 = vld [vmem:[#allocation9 + $0x1b0] sm:$0xff]  ;;  %v6171_v53 = vld [vmem:[#allocation9 + $0x198] sm:$0xff] }
 0xb08   :  { %v4150_v59 = vpop.eup %4149 }
 0xb09   :  { %v2857_v15 = vmul.f32 %v4150_v59, %v6057_v17  ;;  %v6147_v17 = vld [vmem:[#allocation9 + $0x1d8] sm:$0xff]  ;;  %v6177_v59 = vld [vmem:[#allocation9 + $0x190] sm:$0xff] }
 0xb0a   :  { %v4152_v51 = vpop.eup %4151 }
 0xb0b   :  { %v6135_v19 = vadd.f32 %v2858_v47, %v2857_v15  ;;  %v6174_v47 = vld [vmem:[#allocation9 + $0x180] sm:$0xff] }
 0xb0d   :  { %4153 = vtanh.f32 %v6135_v19 }
 0xb1a   :  { %v4154_v50 = vpop.eup %4153 }
 0xb1b   :  { %v2861_v56 = vmul.f32 %v4154_v50, %v4152_v51 }
 0xb1d   :  { %2931 = vmatmul.mubr.f32.vlgmr.msra.gmra.mxu0 %v2861_v56  ;;  %3002 = vmatmul.mubr.f32.vlgmr.msra.gmra.mxu1 %v2861_v56  ;;  %v6265_v56 = vld [vmem:[#allocation9 + $0x178] sm:$0xff] }
 0xb1e   :  { %3041 = vmatpush1.msra.mxu0 %v6138_v23  ;;  %3112 = vmatpush1.msra.mxu1 %v6141_v49 }
 0xb1f   :  { %3042 = vmatprep.subr.mxu0 %v6144_v14  ;;  %3113 = vmatprep.subr.mxu1 %v6147_v17 }
 0xb20   :  { %3043 = vmatpush1.msra.mxu0 %v6150_v12  ;;  %3114 = vmatpush1.msra.mxu1 %v6153_v22 }
 0xb21   :  { %3044 = vmatprep.subr.mxu0 %v6156_v16  ;;  %3115 = vmatprep.subr.mxu1 %v6159_v13 }
 0xb22   :  { %3045 = vmatpush1.msra.mxu0 %v6162_v21  ;;  %3116 = vmatpush1.msra.mxu1 %v6165_v45 }
 0xb23   :  { %3046 = vmatprep.subr.mxu0 %v6168_v55  ;;  %3117 = vmatprep.subr.mxu1 %v6171_v53 }
 0xb24   :  { %3047 = vmatpush1.msra.mxu0 %v6174_v47  ;;  %3118 = vmatpush1.msra.mxu1 %v6177_v59 }
 0xb25   :  { %3048 = vmatprep.subr.mxu0 %v5669_v4  ;;  %3119 = vmatprep.subr.mxu1 %v5671_v3  ;;  %v7209_v4 = vld [vmem:[#allocation18_spill] sm:$0xff]  ;;  %v7210_v3 = vld [vmem:[#allocation53_spill] sm:$0xff] }
 0xb26   :  { %3049 = vmatpush1.msra.mxu0 %v5675_v0  ;;  %3120 = vmatpush1.msra.mxu1 %v5677_v11  ;;  %v7211_v0 = vld [vmem:[#allocation55_spill] sm:$0xff]  ;;  %v7212_v11 = vld [vmem:[#allocation56_spill] sm:$0xff] }
 0xb27   :  { %3050 = vmatprep.subr.mxu0 %v5681_v36  ;;  %3121 = vmatprep.subr.mxu1 %v5683_v54  ;;  %v7213_v36 = vld [vmem:[#allocation54_spill] sm:$0xff]  ;;  %v7214_v54 = vld [vmem:[#allocation40_spill] sm:$0xff] }
 0xb28   :  { %3051 = vmatpush1.msra.mxu0 %v5687_v58  ;;  %3122 = vmatpush1.msra.mxu1 %v5689_v2  ;;  %v7215_v58 = vmov 0.0   ;;  %v7216_v2 = vld [vmem:[#allocation38_spill] sm:$0xff] }
 0xb29   :  { %3052 = vmatprep.subr.mxu0 %v5693_v1  ;;  %3123 = vmatprep.subr.mxu1 %v5695_v6  ;;  %v6230_v1 = vld [vmem:[#allocation9 + $0x1e8] sm:$0xff]  ;;  %v6233_v6 = vld [vmem:[#allocation9 + $0x1f8] sm:$0xff] }
 0xb2a   :  { %3053 = vmatpush1.msra.mxu0 %v5699_v34  ;;  %3124 = vmatpush1.msra.mxu1 %v5701_v35  ;;  %7217 = vst [vmem:[#allocation20_spill] sm:$0xff] %v6230_v1  ;;  %7218 = vst [vmem:[#allocation22_spill] sm:$0xff] %v6233_v6  ;;  %v7219_v34 = vld [vmem:[#allocation35_spill] sm:$0xff]  ;;  %v7220_v35 = vld [vmem:[#allocation28_spill] sm:$0xff] }
 0xb2b   :  { %3054 = vmatprep.subr.mxu0 %v5705_v37  ;;  %3125 = vmatprep.subr.mxu1 %v5707_v39  ;;  %v2167_v37 = vadd.f32 %v7220_v35, %v7219_v34  ;;  %v6289_v35 = vld [vmem:[#allocation9 + $0x138] sm:$0xff] }
 0xb2c   :  { %3055 = vmatpush1.msra.mxu0 %v5711_v40  ;;  %3126 = vmatpush1.msra.mxu1 %v5713_v24  ;;  %v7221_v40 = vld [vmem:[#allocation30_spill] sm:$0xff] }
 0xb2d   :  { %3056 = vmatprep.subr.mxu0 %v5717_v25  ;;  %3127 = vmatprep.subr.mxu1 %v5719_v26  ;;  %v2169_v24 = vadd.f32 %v7221_v40, %v5956_v33  ;;  %v6298_v40 = vld [vmem:[#allocation9 + $0x108] sm:$0xff] }
 0xb2e   :  { %3057 = vmatpush1.msra.mxu0 %v5723_v28  ;;  %3128 = vmatpush1.msra.mxu1 %v5725_v29 }
 0xb2f   :  { %3058 = vmatprep.subr.mxu0 %v5729_v31  ;;  %3129 = vmatprep.subr.mxu1 %v5731_v38 }
 0xb30   :  { %3059 = vmatpush1.msra.mxu0 %v5735_v41  ;;  %3130 = vmatpush1.msra.mxu1 %v5737_v42  ;;  %v7222_v42 = vld [vmem:[#allocation31_spill] sm:$0xff] }
 0xb31   :  { %3060 = vmatprep.subr.mxu0 %v5741_v43  ;;  %3131 = vmatprep.subr.mxu1 %v5743_v44  ;;  %v2282_v43 = vadd.f32 %v7222_v42, %v5968_v48  ;;  %v6325_v42 = vld [vmem:[#allocation9 + $0xd8] sm:$0xff] }
 0xb32   :  { %3061 = vmatpush1.msra.mxu0 %v5747_v46  ;;  %3132 = vmatpush1.msra.mxu1 %v7180_v8  ;;  %v7223_v46 = vld [vmem:[#allocation29_spill] sm:$0xff] }
 0xb33   :  { %3062 = vmatprep.subr.mxu0 %v7181_v32  ;;  %3133 = vmatprep.subr.mxu1 %v7182_v30  ;;  %v2280_v8 = vadd.f32 %v7223_v46, %v5973_v20  ;;  %v6334_v46 = vld [vmem:[#allocation9 + $0xa8] sm:$0xff] }
 0xb34   :  { %3063 = vmatpush1.msra.mxu0 %v7183_v63  ;;  %3134 = vmatpush1.msra.mxu1 %v7184_v61 }
 0xb35   :  { %3064 = vmatprep.subr.mxu0 %v7185_v57  ;;  %3135 = vmatprep.subr.mxu1 %v7186_v18 }
 0xb36   :  { %3065 = vmatpush1.msra.mxu0 %v7187_v9  ;;  %3136 = vmatpush1.msra.mxu1 %v7188_v7 }
 0xb37   :  { %3066 = vmatprep.subr.mxu0 %v7189_v60  ;;  %3137 = vmatprep.subr.mxu1 %v7190_v5 }
 0xb38   :  { %3067 = vmatpush1.msra.mxu0 %v7191_v62  ;;  %3138 = vmatpush1.msra.mxu1 %v7192_v27 }
 0xb39   :  { %3068 = vmatprep.subr.mxu0 %v7193_v10  ;;  %3139 = vmatprep.subr.mxu1 %v7209_v4  ;;  %v6268_v4 = vld [vmem:[#allocation9 + $0x160] sm:$0xff] }
 0xb3a   :  { %3069 = vmatpush1.msra.mxu0 %v7210_v3  ;;  %3140 = vmatpush1.msra.mxu1 %v7211_v0  ;;  %v6271_v3 = vld [vmem:[#allocation9 + $0x170] sm:$0xff]  ;;  %v6274_v0 = vld [vmem:[#allocation9 + $0x148] sm:$0xff] }
 0xb3b   :  { %3070 = vmatprep.subr.mxu0 %v7212_v11  ;;  %3141 = vmatprep.subr.mxu1 %v7213_v36  ;;  %v6277_v11 = vld [vmem:[#allocation9 + $0x158] sm:$0xff]  ;;  %v6280_v36 = vld [vmem:[#allocation9 + $0x140] sm:$0xff] }
 0xb3c   :  { %3071 = vmatpush1.msra.mxu0 %v7214_v54  ;;  %3104 = vmatprep.mubr.f32.mxu0 %v7215_v58  ;;  %v6283_v54 = vld [vmem:[#allocation9 + $0x150] sm:$0xff] }
 0xb3d   :  { %3142 = vmatpush1.msra.mxu1 %v7216_v2  ;;  %3175 = vmatprep.mubr.f32.mxu1 %v7215_v58  ;;  %v6286_v2 = vld [vmem:[#allocation9 + $0x128] sm:$0xff] }
 0xb3e   :  { %3214 = vmatprep.subr.mxu0 %v6230_v1  ;;  %3285 = vmatprep.subr.mxu1 %v6233_v6 }
 0xbdd   :  { %v2932_v39 = vpop.f32.mrf.mxu0  ;;  %v3003_v31 = vpop.f32.mrf.mxu1 }
 0xbde   :  { %v3008_v25 = vadd.f32 %v2932_v39, %v2167_v37  ;;  %v3010_v32 = vadd.f32 %v3003_v31, %v2280_v8  ;;  %v6292_v37 = vld [vmem:[#allocation9 + $0x120] sm:$0xff]  ;;  %v6295_v39 = vld [vmem:[#allocation9 + $0x130] sm:$0xff]  ;;  %v6337_v8 = vld [vmem:[#allocation9 + $0xb8] sm:$0xff] }
 0xbdf   :  { %v2934_v26 = vpop.f32.mrf.mxu0  ;;  %v3005_v41 = vpop.f32.mrf.mxu1  ;;  %v6316_v31 = vld [vmem:[#allocation9 + $0xe0] sm:$0xff] }
 0xbe0   :  { %v3901_v28 = vmul.f32 -1.442695, %v3008_v25  ;;  %v3009_v29 = vadd.f32 %v2934_v26, %v2169_v24  ;;  %v3011_v44 = vadd.f32 %v3005_v41, %v2282_v43  ;;  %v6301_v24 = vld [vmem:[#allocation9 + $0x118] sm:$0xff]  ;;  %v6304_v25 = vld [vmem:[#allocation9 + $0x100] sm:$0xff]  ;;  %v6307_v26 = vld [vmem:[#allocation9 + $0x110] sm:$0xff] }
 0xbe1   :  { %v6322_v41 = vld [vmem:[#allocation9 + $0xc8] sm:$0xff]  ;;  %v6328_v43 = vld [vmem:[#allocation9 + $0xc0] sm:$0xff] }
 0xbe2   :  { %4155 = vpow2.f32 %v3901_v28  ;;  %v3902_v38 = vmul.f32 -1.442695, %v3009_v29  ;;  %v3903_v30 = vmul.f32 -1.442695, %v3011_v44  ;;  %v6310_v28 = vld [vmem:[#allocation9 + $0xe8] sm:$0xff]  ;;  %v6313_v29 = vld [vmem:[#allocation9 + $0xf8] sm:$0xff] }
 0xbe3   :  { %v6331_v44 = vld [vmem:[#allocation9 + $0xd0] sm:$0xff] }
 0xbe4   :  { %4157 = vpow2.f32 %v3902_v38  ;;  %v6319_v38 = vld [vmem:[#allocation9 + $0xf0] sm:$0xff] }
 0xbe5   :  { %4159 = vtanh.f32 %v3010_v32  ;;  %v6340_v32 = vld [vmem:[#allocation9 + $0xa0] sm:$0xff] }
 0xbe6   :  { %4161 = vpow2.f32 %v3903_v30  ;;  %v6343_v30 = vld [vmem:[#allocation9 + $0xb0] sm:$0xff] }
 0xbe7   :  { %7224 = vst [vmem:[#allocation23_spill] sm:$0xff] %v6343_v30 }
 0xbef   :  { %v4156_v63 = vpop.eup %4155 }
 0xbf0   :  { %v3015_v61 = vadd.f32 1.0, %v4156_v63  ;;  %v6346_v63 = vld [vmem:[#allocation9 + $0x88] sm:$0xff] }
 0xbf1   :  { %v4158_v57 = vpop.eup %4157  ;;  %7225 = vst [vmem:[#allocation21_spill] sm:$0xff] %v6346_v63 }
 0xbf2   :  { %4163 = vrcp.f32 %v3015_v61  ;;  %v3021_v18 = vadd.f32 1.0, %v4158_v57  ;;  %v4160_v9 = vpop.eup %4159  ;;  %v6349_v61 = vld [vmem:[#allocation9 + $0x98] sm:$0xff]  ;;  %v6352_v57 = vld [vmem:[#allocation9 + $0x80] sm:$0xff] }
 0xbf3   :  { %v4162_v7 = vpop.eup %4161  ;;  %7226 = vst [vmem:[#allocation43_spill] sm:$0xff] %v6349_v61  ;;  %7227 = vst [vmem:[#allocation44_spill] sm:$0xff] %v6352_v57 }
 0xbf4   :  { %4165 = vrcp.f32 %v3021_v18  ;;  %v3028_v27 = vadd.f32 1.0, %v4162_v7  ;;  %v6355_v18 = vld [vmem:[#allocation9 + $0x90] sm:$0xff]  ;;  %v6361_v7 = vld [vmem:[#allocation9 + $0x78] sm:$0xff] }
 0xbf5   :  { %7228 = vst [vmem:[#allocation42_spill] sm:$0xff] %v6355_v18  ;;  %7230 = vst [vmem:[#allocation47_spill] sm:$0xff] %v6361_v7 }
 0xbf6   :  { %4167 = vrcp.f32 %v3028_v27  ;;  %v6373_v27 = vld [vmem:[#allocation9 + $0x58] sm:$0xff] }
 0xbf7   :  { %7234 = vst [vmem:[#allocation15_spill] sm:$0xff] %v6373_v27 }
 0xbff   :  { %v4164_v60 = vpop.eup %4163 }
 0xc00   :  { %v3032_v5 = vmul.f32 %v4164_v60, %v4160_v9  ;;  %v6358_v9 = vld [vmem:[#allocation9 + $0x68] sm:$0xff]  ;;  %v6364_v60 = vld [vmem:[#allocation9 + $0x60] sm:$0xff] }
 0xc01   :  { %v4166_v62 = vpop.eup %4165  ;;  %7229 = vst [vmem:[#allocation45_spill] sm:$0xff] %v6358_v9  ;;  %7231 = vst [vmem:[#allocation48_spill] sm:$0xff] %v6364_v60 }
 0xc02   :  { %v3031_v10 = vmul.f32 %v4166_v62, %v6135_v19  ;;  %v6262_v19 = vld [vmem:[#allocation9 + $0x168] sm:$0xff] }
 0xc03   :  { %v4168_v15 = vpop.eup %4167  ;;  %v6370_v62 = vld [vmem:[#allocation9 + $0x48] sm:$0xff] }
 0xc04   :  { %v6245_v52 = vadd.f32 %v3032_v5, %v3031_v10  ;;  %v6367_v5 = vld [vmem:[#allocation9 + $0x70] sm:$0xff]  ;;  %7233 = vst [vmem:[#allocation14_spill] sm:$0xff] %v6370_v62  ;;  %v6376_v10 = vld [vmem:[#allocation9 + $0x40] sm:$0xff] }
 0xc05   :  { %7232 = vst [vmem:[#allocation46_spill] sm:$0xff] %v6367_v5  ;;  %7235 = vst [vmem:[#allocation49_spill] sm:$0xff] %v6376_v10 }
 0xc06   :  { %4169 = vtanh.f32 %v6245_v52 }
 0xc13   :  { %v4170_v51 = vpop.eup %4169 }
 0xc14   :  { %v3035_v50 = vmul.f32 %v4170_v51, %v4168_v15  ;;  %v6379_v15 = vld [vmem:[#allocation9 + $0x50] sm:$0xff]  ;;  %v6382_v51 = vld [vmem:[#allocation9 + $0x28] sm:$0xff] }
 0xc15   :  { %7236 = vst [vmem:[#allocation51_spill] sm:$0xff] %v6379_v15  ;;  %7237 = vst [vmem:[#allocation52_spill] sm:$0xff] %v6382_v51 }
 0xc16   :  { %3105 = vmatmul.mubr.f32.vlgmr.msra.gmra.mxu0 %v3035_v50  ;;  %3176 = vmatmul.mubr.f32.vlgmr.msra.gmra.mxu1 %v3035_v50  ;;  %v6385_v50 = vld [vmem:[#allocation9 + $0x38] sm:$0xff] }
 0xc17   :  { %3215 = vmatpush1.msra.mxu0 %v6138_v23  ;;  %3286 = vmatpush1.msra.mxu1 %v6141_v49  ;;  %7238 = vst [vmem:[#allocation50_spill] sm:$0xff] %v6385_v50 }
 0xc18   :  { %3216 = vmatprep.subr.mxu0 %v6144_v14  ;;  %3287 = vmatprep.subr.mxu1 %v6147_v17 }
 0xc19   :  { %3217 = vmatpush1.msra.mxu0 %v6150_v12  ;;  %3288 = vmatpush1.msra.mxu1 %v6153_v22 }
 0xc1a   :  { %3218 = vmatprep.subr.mxu0 %v6156_v16  ;;  %3289 = vmatprep.subr.mxu1 %v6159_v13 }
 0xc1b   :  { %3219 = vmatpush1.msra.mxu0 %v6162_v21  ;;  %3290 = vmatpush1.msra.mxu1 %v6165_v45 }
 0xc1c   :  { %3220 = vmatprep.subr.mxu0 %v6168_v55  ;;  %3291 = vmatprep.subr.mxu1 %v6171_v53 }
 0xc1d   :  { %3221 = vmatpush1.msra.mxu0 %v6174_v47  ;;  %3292 = vmatpush1.msra.mxu1 %v6177_v59 }
 0xc1e   :  { %3222 = vmatprep.subr.mxu0 %v6262_v19  ;;  %3293 = vmatprep.subr.mxu1 %v6265_v56 }
 0xc1f   :  { %3223 = vmatpush1.msra.mxu0 %v6268_v4  ;;  %3294 = vmatpush1.msra.mxu1 %v6271_v3 }
 0xc20   :  { %3224 = vmatprep.subr.mxu0 %v6274_v0  ;;  %3295 = vmatprep.subr.mxu1 %v6277_v11 }
 0xc21   :  { %3225 = vmatpush1.msra.mxu0 %v6280_v36  ;;  %3296 = vmatpush1.msra.mxu1 %v6283_v54 }
 0xc22   :  { %3226 = vmatprep.subr.mxu0 %v6286_v2  ;;  %3297 = vmatprep.subr.mxu1 %v6289_v35 }
 0xc23   :  { %3227 = vmatpush1.msra.mxu0 %v6292_v37  ;;  %3298 = vmatpush1.msra.mxu1 %v6295_v39 }
 0xc24   :  { %3228 = vmatprep.subr.mxu0 %v6298_v40  ;;  %3299 = vmatprep.subr.mxu1 %v6301_v24 }
 0xc25   :  { %3229 = vmatpush1.msra.mxu0 %v6304_v25  ;;  %3300 = vmatpush1.msra.mxu1 %v6307_v26 }
 0xc26   :  { %3230 = vmatprep.subr.mxu0 %v6310_v28  ;;  %3301 = vmatprep.subr.mxu1 %v6313_v29 }
 0xc27   :  { %3231 = vmatpush1.msra.mxu0 %v6316_v31  ;;  %3302 = vmatpush1.msra.mxu1 %v6319_v38 }
 0xc28   :  { %3232 = vmatprep.subr.mxu0 %v6322_v41  ;;  %3303 = vmatprep.subr.mxu1 %v6325_v42 }
 0xc29   :  { %3233 = vmatpush1.msra.mxu0 %v6328_v43  ;;  %3304 = vmatpush1.msra.mxu1 %v6331_v44 }
 0xc2a   :  { %3234 = vmatprep.subr.mxu0 %v6334_v46  ;;  %3305 = vmatprep.subr.mxu1 %v6337_v8 }
 0xc2b   :  { %3235 = vmatpush1.msra.mxu0 %v6340_v32  ;;  %3306 = vmatpush1.msra.mxu1 %v6343_v30 }
 0xc2c   :  { %3236 = vmatprep.subr.mxu0 %v6346_v63  ;;  %3307 = vmatprep.subr.mxu1 %v6349_v61  ;;  %v7248_v61 = vld [vmem:[#allocation33_spill] sm:$0xff] }
 0xc2d   :  { %3237 = vmatpush1.msra.mxu0 %v6352_v57  ;;  %3308 = vmatpush1.msra.mxu1 %v6355_v18 }
 0xc2e   :  { %3238 = vmatprep.subr.mxu0 %v6358_v9  ;;  %3309 = vmatprep.subr.mxu1 %v6361_v7 }
 0xc2f   :  { %3239 = vmatpush1.msra.mxu0 %v6364_v60  ;;  %3310 = vmatpush1.msra.mxu1 %v6367_v5 }
 0xc30   :  { %3240 = vmatprep.subr.mxu0 %v6370_v62  ;;  %3311 = vmatprep.subr.mxu1 %v6373_v27  ;;  %v6388_v62 = vld [vmem:[#allocation9 + $0x20] sm:$0xff]  ;;  %v6391_v27 = vld [vmem:[#allocation9 + $0x30] sm:$0xff] }
 0xc31   :  { %3241 = vmatpush1.msra.mxu0 %v6376_v10  ;;  %3312 = vmatpush1.msra.mxu1 %v6379_v15  ;;  %7239 = vst [vmem:[#allocation17_spill] sm:$0xff] %v6388_v62  ;;  %7240 = vst [vmem:[#allocation36_spill] sm:$0xff] %v6391_v27  ;;  %v6394_v10 = vld [vmem:[#allocation9 + $0x8] sm:$0xff]  ;;  %v6397_v15 = vld [vmem:[#allocation9 + $0x18] sm:$0xff] }
 0xc32   :  { %3242 = vmatprep.subr.mxu0 %v6382_v51  ;;  %3313 = vmatprep.subr.mxu1 %v6385_v50  ;;  %7241 = vst [vmem:[#allocation41_spill] sm:$0xff] %v6394_v10  ;;  %7242 = vst [vmem:[#allocation24_spill] sm:$0xff] %v6397_v15  ;;  %v6400_v51 = vld [vmem:[#allocation9] sm:$0xff]  ;;  %v6404_v50 = vld [vmem:[#allocation9 + $0x10] sm:$0xff] }
 0xc33   :  { %3243 = vmatpush1.msra.mxu0 %v6388_v62  ;;  %3314 = vmatpush1.msra.mxu1 %v6391_v27  ;;  %7243 = vst [vmem:[#allocation26_spill] sm:$0xff] %v6400_v51  ;;  %7244 = vst [vmem:[#allocation27_spill] sm:$0xff] %v6404_v50  ;;  %v7246_v62 = vld [vmem:[#allocation34_spill] sm:$0xff] }
 0xc34   :  { %3244 = vmatprep.subr.mxu0 %v6394_v10  ;;  %3315 = vmatprep.subr.mxu1 %v6397_v15  ;;  %v7245_v10 = vld [vmem:[#allocation32_spill] sm:$0xff]  ;;  %v2175_v5 = vadd.f32 %v7246_v62, %v5956_v33 }
 0xc35   :  { %3245 = vmatpush1.msra.mxu0 %v6400_v51  ;;  %3278 = vmatprep.mubr.f32.mxu0 %v7215_v58  ;;  %v2173_v27 = vadd.f32 %v7245_v10, %v7219_v34  ;;  %v2286_v10 = vadd.f32 %v7248_v61, %v5973_v20  ;;  %v7251_v61 = vld [vmem:[#allocation43_spill] sm:$0xff] }
 0xc36   :  { %3316 = vmatpush1.msra.mxu1 %v6404_v50  ;;  %3349 = vmatprep.mubr.f32.mxu1 %v7215_v58 }
 0xc37   :  { %3388 = vmatprep.subr.mxu0 %v6230_v1  ;;  %3459 = vmatprep.subr.mxu1 %v6233_v6  ;;  %v7247_v1 = vld [vmem:[#allocation57_spill] sm:$0xff] }
 0xc38   :  { %v2288_v57 = vadd.f32 %v7247_v1, %v5968_v48 }
 0xcd6   :  { %v3106_v15 = vpop.f32.mrf.mxu0  ;;  %v3177_v18 = vpop.f32.mrf.mxu1 }
 0xcd7   :  { %v3182_v51 = vadd.f32 %v3106_v15, %v2173_v27  ;;  %v3184_v34 = vadd.f32 %v3177_v18, %v2286_v10  ;;  %v7252_v18 = vld [vmem:[#allocation44_spill] sm:$0xff]  ;;  %v7254_v10 = vld [vmem:[#allocation45_spill] sm:$0xff] }
 0xcd8   :  { %v3108_v60 = vpop.f32.mrf.mxu0  ;;  %v3179_v58 = vpop.f32.mrf.mxu1 }
 0xcd9   :  { %v3904_v7 = vmul.f32 -1.442695, %v3182_v51  ;;  %v3183_v9 = vadd.f32 %v3108_v60, %v2175_v5  ;;  %v3185_v6 = vadd.f32 %v3179_v58, %v2288_v57 }
 0xcdb   :  { %4171 = vpow2.f32 %v3904_v7  ;;  %v3905_v50 = vmul.f32 -1.442695, %v3183_v9  ;;  %v3906_v63 = vmul.f32 -1.442695, %v3185_v6 }
 0xcdd   :  { %4173 = vpow2.f32 %v3905_v50  ;;  %v7253_v50 = vld [vmem:[#allocation42_spill] sm:$0xff] }
 0xcde   :  { %4175 = vtanh.f32 %v3184_v34 }
 0xcdf   :  { %4177 = vpow2.f32 %v3906_v63  ;;  %v7250_v63 = vld [vmem:[#allocation21_spill] sm:$0xff] }
 0xce8   :  { %v4172_v30 = vpop.eup %4171 }
 0xce9   :  { %v3189_v62 = vadd.f32 1.0, %v4172_v30 }
 0xcea   :  { %v4174_v27 = vpop.eup %4173 }
 0xceb   :  { %4179 = vrcp.f32 %v3189_v62  ;;  %v3195_v7 = vadd.f32 1.0, %v4174_v27  ;;  %v4176_v9 = vpop.eup %4175  ;;  %v7255_v62 = vld [vmem:[#allocation47_spill] sm:$0xff]  ;;  %v7256_v27 = vld [vmem:[#allocation48_spill] sm:$0xff] }
 0xcec   :  { %v4178_v60 = vpop.eup %4177 }
 0xced   :  { %4181 = vrcp.f32 %v3195_v7  ;;  %v3202_v1 = vadd.f32 1.0, %v4178_v60  ;;  %v7257_v7 = vld [vmem:[#allocation46_spill] sm:$0xff]  ;;  %v7259_v60 = vld [vmem:[#allocation15_spill] sm:$0xff] }
 0xcef   :  { %4183 = vrcp.f32 %v3202_v1  ;;  %v7263_v1 = vld [vmem:[#allocation50_spill] sm:$0xff] }
 0xcf8   :  { %v4180_v5 = vpop.eup %4179 }
 0xcf9   :  { %v3206_v15 = vmul.f32 %v4180_v5, %v4176_v9  ;;  %v7258_v9 = vld [vmem:[#allocation14_spill] sm:$0xff]  ;;  %v7260_v5 = vld [vmem:[#allocation49_spill] sm:$0xff] }
 0xcfa   :  { %v4182_v51 = vpop.eup %4181 }
 0xcfb   :  { %v3205_v58 = vmul.f32 %v4182_v51, %v6245_v52  ;;  %v7249_v52 = vld [vmem:[#allocation23_spill] sm:$0xff]  ;;  %v7262_v51 = vld [vmem:[#allocation52_spill] sm:$0xff] }
 0xcfc   :  { %v4184_v6 = vpop.eup %4183 }
 0xcfd   :  { %v6419_v57 = vadd.f32 %v3206_v15, %v3205_v58  ;;  %v7261_v15 = vld [vmem:[#allocation51_spill] sm:$0xff]  ;;  %v7264_v58 = vld [vmem:[#allocation17_spill] sm:$0xff] }
 0xcff   :  { %4185 = vtanh.f32 %v6419_v57 }
 0xd0c   :  { %v4186_v34 = vpop.eup %4185 }
 0xd0d   :  { %v3209_v30 = vmul.f32 %v4186_v34, %v4184_v6  ;;  %v7265_v6 = vld [vmem:[#allocation36_spill] sm:$0xff]  ;;  %v7266_v34 = vld [vmem:[#allocation41_spill] sm:$0xff] }
 0xd0f   :  { %3279 = vmatmul.mubr.f32.vlgmr.msra.gmra.mxu0 %v3209_v30  ;;  %3350 = vmatmul.mubr.f32.vlgmr.msra.gmra.mxu1 %v3209_v30  ;;  %v7267_v30 = vld [vmem:[#allocation24_spill] sm:$0xff] }
 0xd10   :  { %3389 = vmatpush1.msra.mxu0 %v6138_v23  ;;  %3460 = vmatpush1.msra.mxu1 %v6141_v49 }
 0xd11   :  { %3390 = vmatprep.subr.mxu0 %v6144_v14  ;;  %3461 = vmatprep.subr.mxu1 %v6147_v17 }
 0xd12   :  { %3391 = vmatpush1.msra.mxu0 %v6150_v12  ;;  %3462 = vmatpush1.msra.mxu1 %v6153_v22 }
 0xd13   :  { %3392 = vmatprep.subr.mxu0 %v6156_v16  ;;  %3463 = vmatprep.subr.mxu1 %v6159_v13 }
 0xd14   :  { %3393 = vmatpush1.msra.mxu0 %v6162_v21  ;;  %3464 = vmatpush1.msra.mxu1 %v6165_v45 }
 0xd15   :  { %3394 = vmatprep.subr.mxu0 %v6168_v55  ;;  %3465 = vmatprep.subr.mxu1 %v6171_v53 }
 0xd16   :  { %3395 = vmatpush1.msra.mxu0 %v6174_v47  ;;  %3466 = vmatpush1.msra.mxu1 %v6177_v59 }
 0xd17   :  { %3396 = vmatprep.subr.mxu0 %v6262_v19  ;;  %3467 = vmatprep.subr.mxu1 %v6265_v56 }
 0xd18   :  { %3397 = vmatpush1.msra.mxu0 %v6268_v4  ;;  %3468 = vmatpush1.msra.mxu1 %v6271_v3 }
 0xd19   :  { %3398 = vmatprep.subr.mxu0 %v6274_v0  ;;  %3469 = vmatprep.subr.mxu1 %v6277_v11 }
 0xd1a   :  { %3399 = vmatpush1.msra.mxu0 %v6280_v36  ;;  %3470 = vmatpush1.msra.mxu1 %v6283_v54 }
 0xd1b   :  { %3400 = vmatprep.subr.mxu0 %v6286_v2  ;;  %3471 = vmatprep.subr.mxu1 %v6289_v35 }
 0xd1c   :  { %3401 = vmatpush1.msra.mxu0 %v6292_v37  ;;  %3472 = vmatpush1.msra.mxu1 %v6295_v39 }
 0xd1d   :  { %3402 = vmatprep.subr.mxu0 %v6298_v40  ;;  %3473 = vmatprep.subr.mxu1 %v6301_v24 }
 0xd1e   :  { %3403 = vmatpush1.msra.mxu0 %v6304_v25  ;;  %3474 = vmatpush1.msra.mxu1 %v6307_v26 }
 0xd1f   :  { %3404 = vmatprep.subr.mxu0 %v6310_v28  ;;  %3475 = vmatprep.subr.mxu1 %v6313_v29 }
 0xd20   :  { %3405 = vmatpush1.msra.mxu0 %v6316_v31  ;;  %3476 = vmatpush1.msra.mxu1 %v6319_v38 }
 0xd21   :  { %3406 = vmatprep.subr.mxu0 %v6322_v41  ;;  %3477 = vmatprep.subr.mxu1 %v6325_v42 }
 0xd22   :  { %3407 = vmatpush1.msra.mxu0 %v6328_v43  ;;  %3478 = vmatpush1.msra.mxu1 %v6331_v44 }
 0xd23   :  { %3408 = vmatprep.subr.mxu0 %v6334_v46  ;;  %3479 = vmatprep.subr.mxu1 %v6337_v8 }
 0xd24   :  { %3409 = vmatpush1.msra.mxu0 %v6340_v32  ;;  %3480 = vmatpush1.msra.mxu1 %v7249_v52 }
 0xd25   :  { %3410 = vmatprep.subr.mxu0 %v7250_v63  ;;  %3481 = vmatprep.subr.mxu1 %v7251_v61  ;;  %v7277_v61 = vld [vmem:[#allocation60_spill] sm:$0xff] }
 0xd26   :  { %3411 = vmatpush1.msra.mxu0 %v7252_v18  ;;  %3482 = vmatpush1.msra.mxu1 %v7253_v50 }
 0xd27   :  { %3412 = vmatprep.subr.mxu0 %v7254_v10  ;;  %3483 = vmatprep.subr.mxu1 %v7255_v62 }
 0xd28   :  { %3413 = vmatpush1.msra.mxu0 %v7256_v27  ;;  %3484 = vmatpush1.msra.mxu1 %v7257_v7  ;;  %v7268_v7 = vld [vmem:[#allocation26_spill] sm:$0xff] }
 0xd29   :  { %3414 = vmatprep.subr.mxu0 %v7258_v9  ;;  %3485 = vmatprep.subr.mxu1 %v7259_v60  ;;  %v7269_v9 = vmov 0.0   ;;  %v7270_v60 = vld [vmem:[#allocation27_spill] sm:$0xff] }
 0xd2a   :  { %3415 = vmatpush1.msra.mxu0 %v7260_v5  ;;  %3486 = vmatpush1.msra.mxu1 %v7261_v15  ;;  %v7271_v15 = vld [vmem:[#allocation20_spill] sm:$0xff] }
 0xd2b   :  { %3416 = vmatprep.subr.mxu0 %v7262_v51  ;;  %3487 = vmatprep.subr.mxu1 %v7263_v1  ;;  %v7272_v51 = vld [vmem:[#allocation22_spill] sm:$0xff]  ;;  %v7273_v1 = vld [vmem:[#allocation35_spill] sm:$0xff] }
 0xd2c   :  { %3417 = vmatpush1.msra.mxu0 %v7264_v58  ;;  %3488 = vmatpush1.msra.mxu1 %v7265_v6  ;;  %v7274_v58 = vld [vmem:[#allocation59_spill] sm:$0xff] }
 0xd2d   :  { %3418 = vmatprep.subr.mxu0 %v7266_v34  ;;  %3489 = vmatprep.subr.mxu1 %v7267_v30  ;;  %v2179_v5 = vadd.f32 %v7274_v58, %v7273_v1  ;;  %v7275_v34 = vld [vmem:[#allocation58_spill] sm:$0xff]  ;;  %v2292_v58 = vadd.f32 %v7277_v61, %v5973_v20 }
 0xd2e   :  { %3419 = vmatpush1.msra.mxu0 %v7268_v7  ;;  %3452 = vmatprep.mubr.f32.mxu0 %v7269_v9  ;;  %v2181_v27 = vadd.f32 %v7275_v34, %v5956_v33 }
 0xd2f   :  { %3490 = vmatpush1.msra.mxu1 %v7270_v60  ;;  %3523 = vmatprep.mubr.f32.mxu1 %v7269_v9 }
 0xd30   :  { %3562 = vmatprep.subr.mxu0 %v7271_v15  ;;  %3633 = vmatprep.subr.mxu1 %v7272_v51  ;;  %v7276_v15 = vld [vmem:[#allocation65_spill] sm:$0xff] }
 0xd31   :  { %v2294_v18 = vadd.f32 %v7276_v15, %v5968_v48 }
 0xdcf   :  { %v3280_v6 = vpop.f32.mrf.mxu0  ;;  %v3351_v50 = vpop.f32.mrf.mxu1 }
 0xdd0   :  { %v3356_v30 = vadd.f32 %v3280_v6, %v2179_v5  ;;  %v3358_v1 = vadd.f32 %v3351_v50, %v2292_v58 }
 0xdd1   :  { %v3282_v62 = vpop.f32.mrf.mxu0  ;;  %v3353_v9 = vpop.f32.mrf.mxu1 }
 0xdd2   :  { %v3907_v7 = vmul.f32 -1.442695, %v3356_v30  ;;  %v3357_v10 = vadd.f32 %v3282_v62, %v2181_v27  ;;  %v3359_v51 = vadd.f32 %v3353_v9, %v2294_v18 }
 0xdd4   :  { %4187 = vpow2.f32 %v3907_v7  ;;  %v3908_v60 = vmul.f32 -1.442695, %v3357_v10  ;;  %v3909_v63 = vmul.f32 -1.442695, %v3359_v51 }
 0xdd6   :  { %4189 = vpow2.f32 %v3908_v60 }
 0xdd7   :  { %4191 = vtanh.f32 %v3358_v1 }
 0xdd8   :  { %4193 = vpow2.f32 %v3909_v63 }
 0xde1   :  { %v4188_v52 = vpop.eup %4187 }
 0xde2   :  { %v3363_v34 = vadd.f32 1.0, %v4188_v52 }
 0xde3   :  { %v4190_v5 = vpop.eup %4189 }
 0xde4   :  { %4195 = vrcp.f32 %v3363_v34  ;;  %v3369_v62 = vadd.f32 1.0, %v4190_v5  ;;  %v4192_v10 = vpop.eup %4191 }
 0xde5   :  { %v4194_v27 = vpop.eup %4193 }
 0xde6   :  { %4197 = vrcp.f32 %v3369_v62  ;;  %v3376_v30 = vadd.f32 1.0, %v4194_v27 }
 0xde8   :  { %4199 = vrcp.f32 %v3376_v30 }
 0xdf1   :  { %v4196_v7 = vpop.eup %4195 }
 0xdf2   :  { %v3380_v60 = vmul.f32 %v4196_v7, %v4192_v10 }
 0xdf3   :  { %v4198_v6 = vpop.eup %4197 }
 0xdf4   :  { %v3379_v18 = vmul.f32 %v4198_v6, %v6419_v57 }
 0xdf5   :  { %v4200_v52 = vpop.eup %4199 }
 0xdf6   :  { %v6497_v9 = vadd.f32 %v3380_v60, %v3379_v18 }
 0xdf8   :  { %4201 = vtanh.f32 %v6497_v9 }
 0xe05   :  { %v4202_v61 = vpop.eup %4201 }
 0xe06   :  { %v3383_v50 = vmul.f32 %v4202_v61, %v4200_v52  ;;  %v3751_v52 = vld [vmem:[%s6673_s11 + $0x78] sm:$0xff]  ;;  %v3749_v61 = vld [vmem:[%s6673_s11 + $0x68] sm:$0xff] }
 0xe08   :  { %3453 = vmatmul.mubr.f32.vlgmr.msra.gmra.mxu0 %v3383_v50  ;;  %3524 = vmatmul.mubr.f32.vlgmr.msra.gmra.mxu1 %v3383_v50  ;;  %v3748_v50 = vld [vmem:[%s6673_s11 + $0x60] sm:$0xff] }
 0xe09   :  { %3563 = vmatpush1.msra.mxu0 %v6138_v23  ;;  %3634 = vmatpush1.msra.mxu1 %v6141_v49  ;;  %v7278_v23 = vld [vmem:[#allocation23_spill] sm:$0xff]  ;;  %v7279_v49 = vld [vmem:[#allocation21_spill] sm:$0xff] }
 0xe0a   :  { %3564 = vmatprep.subr.mxu0 %v6144_v14  ;;  %3635 = vmatprep.subr.mxu1 %v6147_v17  ;;  %v7280_v14 = vld [vmem:[#allocation43_spill] sm:$0xff]  ;;  %v7281_v17 = vld [vmem:[#allocation44_spill] sm:$0xff] }
 0xe0b   :  { %3565 = vmatpush1.msra.mxu0 %v6150_v12  ;;  %3636 = vmatpush1.msra.mxu1 %v6153_v22  ;;  %v7282_v12 = vld [vmem:[#allocation42_spill] sm:$0xff]  ;;  %v7283_v22 = vld [vmem:[#allocation45_spill] sm:$0xff] }
 0xe0c   :  { %3566 = vmatprep.subr.mxu0 %v6156_v16  ;;  %3637 = vmatprep.subr.mxu1 %v6159_v13  ;;  %v7284_v16 = vld [vmem:[#allocation47_spill] sm:$0xff]  ;;  %v7285_v13 = vld [vmem:[#allocation48_spill] sm:$0xff] }
 0xe0d   :  { %3567 = vmatpush1.msra.mxu0 %v6162_v21  ;;  %3638 = vmatpush1.msra.mxu1 %v6165_v45  ;;  %v7286_v21 = vld [vmem:[#allocation46_spill] sm:$0xff] }
 0xe0e   :  { %3568 = vmatprep.subr.mxu0 %v6168_v55  ;;  %3639 = vmatprep.subr.mxu1 %v6171_v53  ;;  %v7287_v45 = vld [vmem:[#allocation14_spill] sm:$0xff]  ;;  %v7288_v55 = vld [vmem:[#allocation15_spill] sm:$0xff]  ;;  %v7289_v53 = vld [vmem:[#allocation49_spill] sm:$0xff] }
 0xe0f   :  { %3569 = vmatpush1.msra.mxu0 %v6174_v47  ;;  %3640 = vmatpush1.msra.mxu1 %v6177_v59  ;;  %v7290_v47 = vld [vmem:[#allocation51_spill] sm:$0xff]  ;;  %v7291_v59 = vld [vmem:[#allocation52_spill] sm:$0xff] }
 0xe10   :  { %3570 = vmatprep.subr.mxu0 %v6262_v19  ;;  %3641 = vmatprep.subr.mxu1 %v6265_v56  ;;  %v7292_v19 = vld [vmem:[#allocation50_spill] sm:$0xff]  ;;  %v7293_v56 = vld [vmem:[#allocation17_spill] sm:$0xff] }
 0xe11   :  { %3571 = vmatpush1.msra.mxu0 %v6268_v4  ;;  %3642 = vmatpush1.msra.mxu1 %v6271_v3  ;;  %v7294_v4 = vld [vmem:[#allocation36_spill] sm:$0xff]  ;;  %v7295_v3 = vld [vmem:[#allocation41_spill] sm:$0xff] }
 0xe12   :  { %3572 = vmatprep.subr.mxu0 %v6274_v0  ;;  %3643 = vmatprep.subr.mxu1 %v6277_v11  ;;  %v7296_v0 = vld [vmem:[#allocation24_spill] sm:$0xff]  ;;  %v7297_v11 = vld [vmem:[#allocation26_spill] sm:$0xff] }
 0xe13   :  { %3573 = vmatpush1.msra.mxu0 %v6280_v36  ;;  %3644 = vmatpush1.msra.mxu1 %v6283_v54  ;;  %v7298_v36 = vmov 0.0   ;;  %v7299_v54 = vld [vmem:[#allocation27_spill] sm:$0xff] }
 0xe14   :  { %3574 = vmatprep.subr.mxu0 %v6286_v2  ;;  %3645 = vmatprep.subr.mxu1 %v6289_v35  ;;  %v7300_v2 = vld [vmem:[#allocation35_spill] sm:$0xff]  ;;  %v7301_v35 = vld [vmem:[#allocation16_spill] sm:$0xff] }
 0xe15   :  { %3575 = vmatpush1.msra.mxu0 %v6292_v37  ;;  %3646 = vmatpush1.msra.mxu1 %v6295_v39  ;;  %v2185_v37 = vadd.f32 %v7301_v35, %v7300_v2 }
 0xe16   :  { %3576 = vmatprep.subr.mxu0 %v6298_v40  ;;  %3647 = vmatprep.subr.mxu1 %v6301_v24  ;;  %v7302_v40 = vld [vmem:[#allocation39_spill] sm:$0xff] }
 0xe17   :  { %3577 = vmatpush1.msra.mxu0 %v6304_v25  ;;  %3648 = vmatpush1.msra.mxu1 %v6307_v26  ;;  %v2187_v24 = vadd.f32 %v7302_v40, %v5956_v33  ;;  %v7307_v40 = vld [vmem:[#allocation37_spill] sm:$0xff] }
 0xe18   :  { %3578 = vmatprep.subr.mxu0 %v6310_v28  ;;  %3649 = vmatprep.subr.mxu1 %v6313_v29 }
 0xe19   :  { %3579 = vmatpush1.msra.mxu0 %v6316_v31  ;;  %3650 = vmatpush1.msra.mxu1 %v6319_v38 }
 0xe1a   :  { %3580 = vmatprep.subr.mxu0 %v6322_v41  ;;  %3651 = vmatprep.subr.mxu1 %v6325_v42  ;;  %v7303_v42 = vld [vmem:[#allocation61_spill] sm:$0xff] }
 0xe1b   :  { %3581 = vmatpush1.msra.mxu0 %v6328_v43  ;;  %3652 = vmatpush1.msra.mxu1 %v6331_v44  ;;  %v2300_v43 = vadd.f32 %v7303_v42, %v5968_v48 }
 0xe1c   :  { %3582 = vmatprep.subr.mxu0 %v6334_v46  ;;  %3653 = vmatprep.subr.mxu1 %v6337_v8  ;;  %v7304_v46 = vld [vmem:[#allocation19_spill] sm:$0xff] }
 0xe1d   :  { %3583 = vmatpush1.msra.mxu0 %v6340_v32  ;;  %3654 = vmatpush1.msra.mxu1 %v7278_v23  ;;  %v2298_v8 = vadd.f32 %v7304_v46, %v5973_v20  ;;  %v3747_v23 = vld [vmem:[%s6673_s11 + $0x58] sm:$0xff] }
 0xe1e   :  { %3584 = vmatprep.subr.mxu0 %v7279_v49  ;;  %3655 = vmatprep.subr.mxu1 %v7280_v14  ;;  %v3746_v49 = vld [vmem:[%s6673_s11 + $0x50] sm:$0xff]  ;;  %v3745_v14 = vld [vmem:[%s6673_s11 + $0x48] sm:$0xff] }
 0xe1f   :  { %3585 = vmatpush1.msra.mxu0 %v7281_v17  ;;  %3656 = vmatpush1.msra.mxu1 %v7282_v12  ;;  %v3744_v17 = vld [vmem:[%s6673_s11 + $0x40] sm:$0xff]  ;;  %v3743_v12 = vld [vmem:[%s6673_s11 + $0x38] sm:$0xff] }
 0xe20   :  { %3586 = vmatprep.subr.mxu0 %v7283_v22  ;;  %3657 = vmatprep.subr.mxu1 %v7284_v16  ;;  %v3742_v22 = vld [vmem:[%s6673_s11 + $0x30] sm:$0xff]  ;;  %v3741_v16 = vld [vmem:[%s6673_s11 + $0x28] sm:$0xff] }
 0xe21   :  { %3587 = vmatpush1.msra.mxu0 %v7285_v13  ;;  %3658 = vmatpush1.msra.mxu1 %v7286_v21  ;;  %v3740_v13 = vld [vmem:[%s6673_s11 + $0x20] sm:$0xff]  ;;  %v3739_v21 = vld [vmem:[%s6673_s11 + $0x18] sm:$0xff] }
 0xe22   :  { %3588 = vmatprep.subr.mxu0 %v7287_v45  ;;  %3659 = vmatprep.subr.mxu1 %v7288_v55  ;;  %v3738_v45 = vld [vmem:[%s6673_s11 + $0x10] sm:$0xff]  ;;  %v3737_v55 = vld [vmem:[%s6673_s11 + $0x8] sm:$0xff] }
 0xe23   :  { %3589 = vmatpush1.msra.mxu0 %v7289_v53  ;;  %3660 = vmatpush1.msra.mxu1 %v7290_v47  ;;  %v3736_v53 = vld [vmem:[%s6673_s11] sm:$0xff]  ;;  %v7305_v47 = vld [vmem:[#allocation63_spill] sm:$0xff] }
 0xe24   :  { %3590 = vmatprep.subr.mxu0 %v7291_v59  ;;  %3661 = vmatprep.subr.mxu1 %v7292_v19  ;;  %v2191_v59 = vadd.f32 %v7305_v47, %v7300_v2 }
 0xe25   :  { %3591 = vmatpush1.msra.mxu0 %v7293_v56  ;;  %3662 = vmatpush1.msra.mxu1 %v7294_v4  ;;  %v7306_v56 = vld [vmem:[#allocation62_spill] sm:$0xff] }
 0xe26   :  { %3592 = vmatprep.subr.mxu0 %v7295_v3  ;;  %3663 = vmatprep.subr.mxu1 %v7296_v0  ;;  %v2193_v4 = vadd.f32 %v7306_v56, %v5956_v33 }
 0xe27   :  { %3593 = vmatpush1.msra.mxu0 %v7297_v11  ;;  %3626 = vmatprep.mubr.f32.mxu0 %v7298_v36 }
 0xe28   :  { %3664 = vmatpush1.msra.mxu1 %v7299_v54  ;;  %3697 = vmatprep.mubr.f32.mxu1 %v7298_v36 }
 0xe29   :  { %3936 = vmatprep.subr.mxu0 %v7298_v36 }
 0xec8   :  { %v3454_v39 = vpop.f32.mrf.mxu0  ;;  %v3525_v31 = vpop.f32.mrf.mxu1 }
 0xec9   :  { %v3530_v25 = vadd.f32 %v3454_v39, %v2185_v37  ;;  %v3532_v32 = vadd.f32 %v3525_v31, %v2298_v8 }
 0xeca   :  { %v3456_v26 = vpop.f32.mrf.mxu0  ;;  %v3527_v41 = vpop.f32.mrf.mxu1 }
 0xecb   :  { %v3910_v28 = vmul.f32 -1.442695, %v3530_v25  ;;  %v3531_v29 = vadd.f32 %v3456_v26, %v2187_v24  ;;  %v3533_v44 = vadd.f32 %v3527_v41, %v2300_v43  ;;  %v7308_v25 = vld [vmem:[#allocation64_spill] sm:$0xff] }
 0xecc   :  { %v2304_v2 = vadd.f32 %v7308_v25, %v5973_v20 }
 0xecd   :  { %4203 = vpow2.f32 %v3910_v28  ;;  %v3911_v38 = vmul.f32 -1.442695, %v3531_v29  ;;  %v3912_v57 = vmul.f32 -1.442695, %v3533_v44 }
 0xecf   :  { %4205 = vpow2.f32 %v3911_v38 }
 0xed0   :  { %4207 = vtanh.f32 %v3532_v32 }
 0xed1   :  { %4209 = vpow2.f32 %v3912_v57 }
 0xeda   :  { %v4204_v63 = vpop.eup %4203 }
 0xedb   :  { %v3537_v1 = vadd.f32 1.0, %v4204_v63 }
 0xedc   :  { %v4206_v15 = vpop.eup %4205 }
 0xedd   :  { %4211 = vrcp.f32 %v3537_v1  ;;  %v3543_v51 = vadd.f32 1.0, %v4206_v15  ;;  %v4208_v58 = vpop.eup %4207  ;;  %v3918_v1 = vld [vmem:[%s6674_s12] ss:$0 sm:$0xff] }
 0xede   :  { %v4210_v34 = vpop.eup %4209 }
 0xedf   :  { %4213 = vrcp.f32 %v3543_v51  ;;  %v3550_v27 = vadd.f32 1.0, %v4210_v34 }
 0xee1   :  { %4215 = vrcp.f32 %v3550_v27 }
 0xeea   :  { %v4212_v5 = vpop.eup %4211 }
 0xeeb   :  { %v3554_v62 = vmul.f32 %v4212_v5, %v4208_v58 }
 0xeec   :  { %v4214_v10 = vpop.eup %4213 }
 0xeed   :  { %v3553_v7 = vmul.f32 %v4214_v10, %v6497_v9  ;;  %v3750_v9 = vld [vmem:[%s6673_s11 + $0x70] sm:$0xff] }
 0xeee   :  { %v4216_v6 = vpop.eup %4215 }
 0xeef   :  { %v6574_v60 = vadd.f32 %v3554_v62, %v3553_v7 }
 0xef1   :  { %4217 = vtanh.f32 %v6574_v60 }
 0xefe   :  { %v4218_v30 = vpop.eup %4217 }
 0xeff   :  { %v3557_v18 = vmul.f32 %v4218_v30, %v4216_v6 }
 0xf01   :  { %3627 = vmatmul.mubr.f32.vlgmr.msra.gmra.mxu0 %v3557_v18  ;;  %3698 = vmatmul.mubr.f32.vlgmr.msra.gmra.mxu1 %v3557_v18 }
 0xf02   :  { %3937 = vmatpush3.msra.mxu0 %v3751_v52  ;;  %3968 = vmatprep.mubr.msk.f32.mxu0 %vm4456_vm1, %v7298_v36 }
 0xf03   :  { %3938 = vmatprep.subr.mxu0 %v7298_v36 }
 0xf04   :  { %3939 = vmatpush3.msra.mxu0 %v3750_v9 }
 0xf05   :  { %3940 = vmatprep.subr.mxu0 %v7298_v36 }
 0xf06   :  { %3941 = vmatpush3.msra.mxu0 %v3749_v61 }
 0xf07   :  { %3942 = vmatprep.subr.mxu0 %v7298_v36 }
 0xf08   :  { %3943 = vmatpush3.msra.mxu0 %v3748_v50 }
 0xf09   :  { %3944 = vmatprep.subr.mxu0 %v7298_v36 }
 0xf0a   :  { %3945 = vmatpush3.msra.mxu0 %v3747_v23 }
 0xf0b   :  { %3946 = vmatprep.subr.mxu0 %v7298_v36 }
 0xf0c   :  { %3947 = vmatpush3.msra.mxu0 %v3746_v49 }
 0xf0d   :  { %3948 = vmatprep.subr.mxu0 %v7298_v36 }
 0xf0e   :  { %3949 = vmatpush3.msra.mxu0 %v3745_v14 }
 0xf0f   :  { %3950 = vmatprep.subr.mxu0 %v7298_v36 }
 0xf10   :  { %3951 = vmatpush3.msra.mxu0 %v3744_v17 }
 0xf11   :  { %3952 = vmatprep.subr.mxu0 %v7298_v36 }
 0xf12   :  { %3953 = vmatpush3.msra.mxu0 %v3743_v12 }
 0xf13   :  { %3954 = vmatprep.subr.mxu0 %v7298_v36 }
 0xf14   :  { %3955 = vmatpush3.msra.mxu0 %v3742_v22 }
 0xf15   :  { %3956 = vmatprep.subr.mxu0 %v7298_v36 }
 0xf16   :  { %3957 = vmatpush3.msra.mxu0 %v3741_v16 }
 0xf17   :  { %3958 = vmatprep.subr.mxu0 %v7298_v36 }
 0xf18   :  { %3959 = vmatpush3.msra.mxu0 %v3740_v13 }
 0xf19   :  { %3960 = vmatprep.subr.mxu0 %v7298_v36 }
 0xf1a   :  { %3961 = vmatpush3.msra.mxu0 %v3739_v21 }
 0xf1b   :  { %3962 = vmatprep.subr.mxu0 %v7298_v36 }
 0xf1c   :  { %3963 = vmatpush3.msra.mxu0 %v3738_v45 }
 0xf1d   :  { %3964 = vmatprep.subr.mxu0 %v7298_v36 }
 0xf1e   :  { %3965 = vmatpush3.msra.mxu0 %v3737_v55 }
 0xf1f   :  { %3966 = vmatprep.subr.mxu0 %v7298_v36  ;;  %v2306_v36 = vadd.f32 %v7307_v40, %v5968_v48 }
 0xf20   :  { %3967 = vmatpush3.msra.mxu0 %v3736_v53 }
 0xfc1   :  { %v3628_v19 = vpop.f32.mrf.mxu0  ;;  %v3699_v35 = vpop.f32.mrf.mxu1 }
 0xfc2   :  { %v3704_v3 = vadd.f32 %v3628_v19, %v2191_v59  ;;  %v3706_v26 = vadd.f32 %v3699_v35, %v2304_v2 }
 0xfc3   :  { %v3630_v0 = vpop.f32.mrf.mxu0  ;;  %v3701_v39 = vpop.f32.mrf.mxu1 }
 0xfc4   :  { %v3913_v11 = vmul.f32 -1.442695, %v3704_v3  ;;  %v3705_v54 = vadd.f32 %v3630_v0, %v2193_v4  ;;  %v3707_v24 = vadd.f32 %v3701_v39, %v2306_v36 }
 0xfc6   :  { %4219 = vpow2.f32 %v3913_v11  ;;  %v3914_v37 = vmul.f32 -1.442695, %v3705_v54  ;;  %v3915_v28 = vmul.f32 -1.442695, %v3707_v24 }
 0xfc8   :  { %4221 = vpow2.f32 %v3914_v37 }
 0xfc9   :  { %4223 = vtanh.f32 %v3706_v26 }
 0xfca   :  { %4225 = vpow2.f32 %v3915_v28 }
 0xfd3   :  { %v4220_v29 = vpop.eup %4219 }
 0xfd4   :  { %v3711_v33 = vadd.f32 1.0, %v4220_v29 }
 0xfd5   :  { %v4222_v31 = vpop.eup %4221 }
 0xfd6   :  { %4227 = vrcp.f32 %v3711_v33  ;;  %v3717_v38 = vadd.f32 1.0, %v4222_v31  ;;  %v4224_v41 = vpop.eup %4223 }
 0xfd7   :  { %v4226_v42 = vpop.eup %4225 }
 0xfd8   :  { %4229 = vrcp.f32 %v3717_v38  ;;  %v3724_v48 = vadd.f32 1.0, %v4226_v42 }
 0xfda   :  { %4231 = vrcp.f32 %v3724_v48 }
 0xfe3   :  { %v4228_v43 = vpop.eup %4227 }
 0xfe4   :  { %v3728_v44 = vmul.f32 %v4228_v43, %v4224_v41 }
 0xfe5   :  { %v4230_v46 = vpop.eup %4229 }
 0xfe6   :  { %v3727_v8 = vmul.f32 %v4230_v46, %v6574_v60 }
 0xfe7   :  { %v4232_v20 = vpop.eup %4231 }
 0xfe8   :  { %v3729_v32 = vadd.f32 %v3728_v44, %v3727_v8 }
 0xfea   :  { %3917 = vst [vmem:[%s6677_s15 + $0x8] sm:$0xff] %v3729_v32  ;;  %4233 = vtanh.f32 %v3729_v32 }
 0xff7   :  { %v4234_v57 = vpop.eup %4233 }
 0xff8   :  { %v3731_v63 = vmul.f32 %v4234_v57, %v4232_v20 }
 0xffa   :  { %3916 = vst [vmem:[%s6676_s14 + $0x8] sm:$0xff] %v3731_v63  ;;  %3969 = vmatmul.mubr.f32.vlgmr.msra.gmra.mxu0 %v3731_v63 }
0x10ba   :  { %v3825_v15 = vpop.f32.mrf.mxu0 }
0x10bb   :  { %v3826_v51 = vadd.f32 %v3918_v1, %v3825_v15 }
0x10bc   :  { %v3970_v58 = vpop.f32.mrf.mxu0 }
0x10bd   :  { %3829 = vst [vmem:[%s6675_s13] sm:$0xff] %v3826_v51 }
0x10be   :  { %3842 = vsyncpa [#allocation5], 1 }
0x10bf   :  { %3843 = vsyncpa [#allocation7], 1 }
0x10c0   :  { %3844 = vsyncpa [#allocation10], 1 }

</bundles_post_ra>
